<compile_context>
chip_gen: v5e
topology: v5e:2x2
jax: 0.10.0
libtpu: 0.0.40
codegen_flags: <defaults>
</compile_context>

<pallas_src>
import jax
import jax.numpy as jnp
import numpy as np
from jax.experimental import pallas as pl
from jax.experimental.pallas import tpu as pltpu

HIDDEN = 128
IN_FEATURES = 16000          # 10 * 40 * 40, fixed by the PyTorch module
K_PAD = 16384                # zero-padded contraction length (multiple of TK)
TK = 8192                    # fc1 K-tile -> 2 grid steps, double-buffered


def dqn_kernel(x_ref, w1_ref, b1_ref, w2_ref, b2_ref, w3_ref, b3_ref,
               out_ref, h1_acc):
    k = pl.program_id(0)

    @pl.when(k == 0)
    def _():
        h1_acc[...] = jnp.zeros_like(h1_acc)

    # x.float() / 255 and the partial fc1 contraction (f32 accumulation).
    xk = x_ref[...].astype(jnp.float32) * jnp.float32(1.0 / 255.0)
    h1_acc[...] += jnp.dot(xk, w1_ref[...].astype(jnp.float32),
                           preferred_element_type=jnp.float32)

    @pl.when(k == pl.num_programs(0) - 1)
    def _():
        h1 = jnp.maximum(h1_acc[...] + b1_ref[...], 0.0)             # relu(fc1)
        h2 = jnp.maximum(
            jnp.dot(h1, w2_ref[...].astype(jnp.float32),
                    preferred_element_type=jnp.float32) + b2_ref[...],
            0.0)                                                     # relu(fc2)
        out_ref[...] = (jnp.dot(h2, w3_ref[...].astype(jnp.float32),
                                preferred_element_type=jnp.float32)
                        + b3_ref[...])                               # fc3


def dqn_forward(x, params):
    """x: (B, C, H, W), any real/integer dtype. Returns (B, num_actions) f32.

    `params` must come from `prepare_params` (bf16 weights, w1 zero-padded
    to K_PAD input rows).
    """
    w1, b1, w2, b2, w3, b3 = params
    B = x.shape[0]
    A = w3.shape[1]

    # Glue mirroring x.view(B, -1): flatten, pad batch to a multiple of 8 and
    # features to K_PAD. bf16 holds the 0..255 integer pixels exactly.
    xf = x.reshape(B, -1).astype(jnp.bfloat16)
    assert xf.shape[1] == IN_FEATURES
    BP = ((B + 7) // 8) * 8
    xp = jnp.pad(xf, ((0, BP - B), (0, K_PAD - IN_FEATURES)))

    flops = 2 * BP * (K_PAD * HIDDEN + HIDDEN * HIDDEN + HIDDEN * A)
    bytes_accessed = (xp.size * 2 + w1.size * 2 + w2.size * 2 + w3.size * 2
                      + (b1.size + b2.size + b3.size) * 4 + BP * A * 4)

    out = pl.pallas_call(
        dqn_kernel,
        out_shape=jax.ShapeDtypeStruct((BP, A), jnp.float32),
        grid_spec=pltpu.PrefetchScalarGridSpec(
            num_scalar_prefetch=0,
            grid=(K_PAD // TK,),
            in_specs=[
                pl.BlockSpec((BP, TK), lambda k: (0, k)),            # x tile
                pl.BlockSpec((TK, HIDDEN), lambda k: (k, 0)),        # w1 tile
                pl.BlockSpec((1, HIDDEN), lambda k: (0, 0)),         # b1
                pl.BlockSpec((HIDDEN, HIDDEN), lambda k: (0, 0)),    # w2
                pl.BlockSpec((1, HIDDEN), lambda k: (0, 0)),         # b2
                pl.BlockSpec((HIDDEN, A), lambda k: (0, 0)),         # w3
                pl.BlockSpec((1, A), lambda k: (0, 0)),              # b3
            ],
            out_specs=pl.BlockSpec((BP, A), lambda k: (0, 0)),
            scratch_shapes=[pltpu.VMEM((BP, HIDDEN), jnp.float32)],
        ),
        compiler_params=pltpu.CompilerParams(
            dimension_semantics=("arbitrary",),
        ),
        cost_estimate=pl.CostEstimate(
            flops=flops, transcendentals=0, bytes_accessed=bytes_accessed),
    )(xp, w1, b1, w2, b2, w3, b3)
    return out[:B]


def init_params(key, num_actions):
    """Deterministic f32 init matching nn.Linear shapes (stored transposed)."""
    def linear(key, fan_in, fan_out):
        kw, kb = jax.random.split(key)
        bound = 1.0 / np.sqrt(fan_in)
        w = jax.random.uniform(kw, (fan_in, fan_out), jnp.float32, -bound, bound)
        b = jax.random.uniform(kb, (1, fan_out), jnp.float32, -bound, bound)
        return w, b

    k1, k2, k3 = jax.random.split(key, 3)
    w1, b1 = linear(k1, IN_FEATURES, HIDDEN)
    w2, b2 = linear(k2, HIDDEN, HIDDEN)
    w3, b3 = linear(k3, HIDDEN, num_actions)
    return (w1, b1, w2, b2, w3, b3)


def prepare_params(params):
    """One-time prep: zero-pad w1 to K_PAD rows, store weights as bf16."""
    w1, b1, w2, b2, w3, b3 = params
    w1p = jnp.pad(w1, ((0, K_PAD - IN_FEATURES), (0, 0))).astype(jnp.bfloat16)
    return (w1p, b1.astype(jnp.float32),
            w2.astype(jnp.bfloat16), b2.astype(jnp.float32),
            w3.astype(jnp.bfloat16), b3.astype(jnp.float32))


def dqn_ref(x, prepared_params):
    """Pure-JAX reference using the same bf16-quantized weights."""
    w1, b1, w2, b2, w3, b3 = prepared_params
    xf = x.reshape(x.shape[0], -1).astype(jnp.float32) / 255.0
    w1f = w1[:IN_FEATURES].astype(jnp.float32)
    h1 = jnp.maximum(xf @ w1f + b1, 0.0)
    h2 = jnp.maximum(h1 @ w2.astype(jnp.float32) + b2, 0.0)
    return h2 @ w3.astype(jnp.float32) + b3


if __name__ == "__main__":
    key = jax.random.PRNGKey(0)
    kx, kp = jax.random.split(key)

    batch = 2
    num_actions = 6
    # NCHW image-like input: 10 * 40 * 40 = 16000 features after flatten.
    x = jax.random.randint(kx, (batch, 10, 40, 40), 0, 256, dtype=jnp.int32)
    x = x.astype(jnp.uint8)

    params = prepare_params(init_params(kp, num_actions))

    fwd = jax.jit(dqn_forward)
    out = jax.block_until_ready(fwd(x, params))

    ref = dqn_ref(x, params)
    np.testing.assert_allclose(np.asarray(out), np.asarray(ref),
                               rtol=2e-3, atol=2e-3)
    print("KERNEL_OK")
</pallas_src>

<mosaic_0001>
module attributes {stable_mosaic.version = 11 : i64} {
  func.func @dqn_kernel(%arg0: i32, %arg1: memref<8x8192xbf16, #tpu.memory_space<vmem>>, %arg2: memref<8192x128xbf16, #tpu.memory_space<vmem>>, %arg3: memref<1x128xf32, #tpu.memory_space<vmem>>, %arg4: memref<128x128xbf16, #tpu.memory_space<vmem>>, %arg5: memref<1x128xf32, #tpu.memory_space<vmem>>, %arg6: memref<128x6xbf16, #tpu.memory_space<vmem>>, %arg7: memref<1x6xf32, #tpu.memory_space<vmem>>, %arg8: memref<8x6xf32, #tpu.memory_space<vmem>>, %arg9: memref<8x128xf32, #tpu.memory_space<vmem>>) attributes {dimension_semantics = [#tpu.dimension_semantics<arbitrary>], iteration_bounds = array<i64: 2>, scalar_prefetch = 0 : i64, scratch_operands = 1 : i64, tpu.core_type = #tpu.core_type<tc>, window_params = [{transform_indices = @transform_0, window_bounds = array<i64: 8, 8192>}, {transform_indices = @transform_1, window_bounds = array<i64: 8192, 128>}, {pipeline_mode = #tpu.pipeline_mode<synchronous>, transform_indices = @transform_2, window_bounds = array<i64: 1, 128>}, {pipeline_mode = #tpu.pipeline_mode<synchronous>, transform_indices = @transform_3, window_bounds = array<i64: 128, 128>}, {pipeline_mode = #tpu.pipeline_mode<synchronous>, transform_indices = @transform_4, window_bounds = array<i64: 1, 128>}, {pipeline_mode = #tpu.pipeline_mode<synchronous>, transform_indices = @transform_5, window_bounds = array<i64: 128, 6>}, {pipeline_mode = #tpu.pipeline_mode<synchronous>, transform_indices = @transform_6, window_bounds = array<i64: 1, 6>}, {pipeline_mode = #tpu.pipeline_mode<synchronous>, transform_indices = @transform_7, window_bounds = array<i64: 8, 6>}]} {
    %c0_i32 = arith.constant 0 : i32
    %0 = arith.cmpi eq, %arg0, %c0_i32 : i32
    %1 = arith.extui %0 : i1 to i32
    %c0_i32_0 = arith.constant 0 : i32
    %2 = arith.cmpi ne, %1, %c0_i32_0 : i32
    scf.if %2 {
      %cst_10 = arith.constant 0.000000e+00 : f32
      %16 = vector.broadcast %cst_10 : f32 to vector<8x128xf32>
      %c0_11 = arith.constant 0 : index
      %c0_12 = arith.constant 0 : index
      %17 = vector.load %arg9[%c0_11, %c0_12] : memref<8x128xf32, #tpu.memory_space<vmem>>, vector<8x128xf32>
      tpu.vector_store %arg9[%c0_11, %c0_12], %16 {strides = array<i32>} : memref<8x128xf32, #tpu.memory_space<vmem>>, vector<8x128xf32>,
    } else {
    }
    %c0 = arith.constant 0 : index
    %c0_1 = arith.constant 0 : index
    %3 = vector.load %arg1[%c0, %c0_1] : memref<8x8192xbf16, #tpu.memory_space<vmem>>, vector<8x8192xbf16>
    %4 = arith.extf %3 : vector<8x8192xbf16> to vector<8x8192xf32>
    %cst = arith.constant 0.00392156886 : f32
    %5 = vector.broadcast %cst : f32 to vector<8x8192xf32>
    %6 = arith.mulf %4, %5 : vector<8x8192xf32>
    %c0_2 = arith.constant 0 : index
    %c0_3 = arith.constant 0 : index
    %7 = vector.load %arg9[%c0_2, %c0_3] : memref<8x128xf32, #tpu.memory_space<vmem>>, vector<8x128xf32>
    %c0_4 = arith.constant 0 : index
    %c0_5 = arith.constant 0 : index
    %8 = vector.load %arg2[%c0_4, %c0_5] : memref<8192x128xbf16, #tpu.memory_space<vmem>>, vector<8192x128xbf16>
    %9 = arith.extf %8 : vector<8192x128xbf16> to vector<8192x128xf32>
    %cst_6 = arith.constant dense<0.000000e+00> : vector<8x128xf32>
    %10 = tpu.matmul %6, %9, %cst_6 {dimension_numbers = #tpu.dot_dimension_numbers<[1], [0], [0], [1], [0, 0, 1, 1], [], []>} : vector<8x8192xf32>, vector<8192x128xf32>, vector<8x128xf32> -> vector<8x128xf32>
    %11 = arith.addf %7, %10 : vector<8x128xf32>
    %c0_7 = arith.constant 0 : index
    %c0_8 = arith.constant 0 : index
    %12 = vector.load %arg9[%c0_7, %c0_8] : memref<8x128xf32, #tpu.memory_space<vmem>>, vector<8x128xf32>
    tpu.vector_store %arg9[%c0_7, %c0_8], %11 {strides = array<i32>} : memref<8x128xf32, #tpu.memory_space<vmem>>, vector<8x128xf32>,
    %c1_i32 = arith.constant 1 : i32
    %13 = arith.cmpi eq, %arg0, %c1_i32 : i32
    %14 = arith.extui %13 : i1 to i32
    %c0_i32_9 = arith.constant 0 : i32
    %15 = arith.cmpi ne, %14, %c0_i32_9 : i32
    scf.if %15 {
      %c0_10 = arith.constant 0 : index
      %c0_11 = arith.constant 0 : index
      %16 = vector.load %arg9[%c0_10, %c0_11] : memref<8x128xf32, #tpu.memory_space<vmem>>, vector<8x128xf32>
      %c0_12 = arith.constant 0 : index
      %c0_13 = arith.constant 0 : index
      %17 = vector.load %arg3[%c0_12, %c0_13] : memref<1x128xf32, #tpu.memory_space<vmem>>, vector<1x128xf32>
      %18 = vector.broadcast %17 : vector<1x128xf32> to vector<8x128xf32>
      %19 = arith.addf %16, %18 : vector<8x128xf32>
      %cst_14 = arith.constant 0.000000e+00 : f32
      %20 = vector.broadcast %cst_14 : f32 to vector<8x128xf32>
      %21 = arith.maximumf %19, %20 : vector<8x128xf32>
      %c0_15 = arith.constant 0 : index
      %c0_16 = arith.constant 0 : index
      %22 = vector.load %arg4[%c0_15, %c0_16] : memref<128x128xbf16, #tpu.memory_space<vmem>>, vector<128x128xbf16>
      %23 = arith.extf %22 : vector<128x128xbf16> to vector<128x128xf32>
      %cst_17 = arith.constant dense<0.000000e+00> : vector<8x128xf32>
      %24 = tpu.matmul %21, %23, %cst_17 {dimension_numbers = #tpu.dot_dimension_numbers<[1], [0], [0], [1], [0, 0, 1, 1], [], []>} : vector<8x128xf32>, vector<128x128xf32>, vector<8x128xf32> -> vector<8x128xf32>
      %c0_18 = arith.constant 0 : index
      %c0_19 = arith.constant 0 : index
      %25 = vector.load %arg5[%c0_18, %c0_19] : memref<1x128xf32, #tpu.memory_space<vmem>>, vector<1x128xf32>
      %26 = vector.broadcast %25 : vector<1x128xf32> to vector<8x128xf32>
      %27 = arith.addf %24, %26 : vector<8x128xf32>
      %cst_20 = arith.constant 0.000000e+00 : f32
      %28 = vector.broadcast %cst_20 : f32 to vector<8x128xf32>
      %29 = arith.maximumf %27, %28 : vector<8x128xf32>
      %c0_21 = arith.constant 0 : index
      %c0_22 = arith.constant 0 : index
      %30 = vector.load %arg6[%c0_21, %c0_22] : memref<128x6xbf16, #tpu.memory_space<vmem>>, vector<128x6xbf16>
      %31 = arith.extf %30 : vector<128x6xbf16> to vector<128x6xf32>
      %cst_23 = arith.constant dense<0.000000e+00> : vector<8x6xf32>
      %32 = tpu.matmul %29, %31, %cst_23 {dimension_numbers = #tpu.dot_dimension_numbers<[1], [0], [0], [1], [0, 0, 1, 1], [], []>} : vector<8x128xf32>, vector<128x6xf32>, vector<8x6xf32> -> vector<8x6xf32>
      %c0_24 = arith.constant 0 : index
      %c0_25 = arith.constant 0 : index
      %33 = vector.load %arg7[%c0_24, %c0_25] : memref<1x6xf32, #tpu.memory_space<vmem>>, vector<1x6xf32>
      %34 = vector.broadcast %33 : vector<1x6xf32> to vector<8x6xf32>
      %35 = arith.addf %32, %34 : vector<8x6xf32>
      %c0_26 = arith.constant 0 : index
      %c0_27 = arith.constant 0 : index
      %36 = vector.load %arg8[%c0_26, %c0_27] : memref<8x6xf32, #tpu.memory_space<vmem>>, vector<8x6xf32>
      tpu.vector_store %arg8[%c0_26, %c0_27], %35 {strides = array<i32>} : memref<8x6xf32, #tpu.memory_space<vmem>>, vector<8x6xf32>,
    } else {
    }
    return
  }
  func.func @transform_0(%arg0: i32) -> (i32, i32) {
    %c0_i32 = arith.constant 0 : i32
    %c0_i32_0 = arith.constant 0 : i32
    return %c0_i32, %arg0 : i32, i32
  }
  func.func @transform_1(%arg0: i32) -> (i32, i32) {
    %c0_i32 = arith.constant 0 : i32
    %c0_i32_0 = arith.constant 0 : i32
    return %arg0, %c0_i32 : i32, i32
  }
  func.func @transform_2(%arg0: i32) -> (i32, i32) {
    %c0_i32 = arith.constant 0 : i32
    %c0_i32_0 = arith.constant 0 : i32
    %c0_i32_1 = arith.constant 0 : i32
    return %c0_i32, %c0_i32_0 : i32, i32
  }
  func.func @transform_3(%arg0: i32) -> (i32, i32) {
    %c0_i32 = arith.constant 0 : i32
    %c0_i32_0 = arith.constant 0 : i32
    %c0_i32_1 = arith.constant 0 : i32
    return %c0_i32, %c0_i32_0 : i32, i32
  }
  func.func @transform_4(%arg0: i32) -> (i32, i32) {
    %c0_i32 = arith.constant 0 : i32
    %c0_i32_0 = arith.constant 0 : i32
    %c0_i32_1 = arith.constant 0 : i32
    return %c0_i32, %c0_i32_0 : i32, i32
  }
  func.func @transform_5(%arg0: i32) -> (i32, i32) {
    %c0_i32 = arith.constant 0 : i32
    %c0_i32_0 = arith.constant 0 : i32
    %c0_i32_1 = arith.constant 0 : i32
    return %c0_i32, %c0_i32_0 : i32, i32
  }
  func.func @transform_6(%arg0: i32) -> (i32, i32) {
    %c0_i32 = arith.constant 0 : i32
    %c0_i32_0 = arith.constant 0 : i32
    %c0_i32_1 = arith.constant 0 : i32
    return %c0_i32, %c0_i32_0 : i32, i32
  }
  func.func @transform_7(%arg0: i32) -> (i32, i32) {
    %c0_i32 = arith.constant 0 : i32
    %c0_i32_0 = arith.constant 0 : i32
    %c0_i32_1 = arith.constant 0 : i32
    return %c0_i32, %c0_i32_0 : i32, i32
  }
}

</mosaic_0001>

<bundles_post_ra>
// kernel: dqn_forward.1
= control target key start
LH: loop header
LB: loop body
LE: loop exit
PB: predicated region body
PF: predicated region fallthrough
CT: control target
= control target key end

     0   :  { %12 = vsyncpa [#allocation4], 0  ;;  %s7779_s0 = inlined_call_operand.vmem [shape: bf16[8,16384], index: 0, kind: input, shape index: {}]   ;;  %s7780_s1 = inlined_call_operand.hbm [shape: bf16[16384,128], index: 1, kind: input, shape index: {}]   ;;  %s7781_s2 = inlined_call_operand.hbm [shape: f32[1,128], index: 2, kind: input, shape index: {}]   ;;  %s7782_s3 = inlined_call_operand.hbm [shape: bf16[128,128], index: 3, kind: input, shape index: {}]   ;;  %s7783_s4 = inlined_call_operand.hbm [shape: f32[1,128], index: 4, kind: input, shape index: {}]   ;;  %s7784_s5 = inlined_call_operand.vmem [shape: bf16[128,6], index: 5, kind: input, shape index: {}]   ;;  %s7785_s6 = inlined_call_operand.hbm [shape: f32[1,6], index: 6, kind: input, shape index: {}]   ;;  %s7786_s7 = inlined_call_operand.vmem [shape: f32[8,6], index: 7, kind: output, shape index: {}]  }
   0x1   :  { %14 = vsyncpa [#allocation4 + $0x1], 0 }
   0x2   :  { %15 = vsyncpa [#allocation6], 0 }
   0x3   :  { %16 = vsyncpa [#allocation9], 0  ;;  %s7067_s24 = smov 0   ;;  %s7069_s25 = smov 0  }
   0x4   :  { %s7071_s26 = smov 0   ;;  %s7073_s27 = smov 0  }
   0x5 LB: > { %s7086_s28 = sadd.s32 4294967295, %s7018_s27   ;;  %p68_p0 = scmp.ne.s32.totalorder %s7010_s25, %s7006_s24  ;;  %s7018_s27 = sphi %s7073_s27, %s7794_s27   ;;  %s7014_s26 = sphi %s7071_s26, %s7793_s26   ;;  %s7010_s25 = sphi %s7069_s25, %s7792_s25   ;;  %s7006_s24 = sphi %s7067_s24, %s7791_s24  }
   0x6   : > { %p69_p1 = scmp.eq.s32.totalorder %s7086_s28, 0  ;;  %p4081_p2 = scmp.ge.s32.totalorder %s7018_s27, 1 }
   0x7   : > { %p205_p3 = scmp.lt.s32.totalorder %s7018_s27, 3  ;;  %p4082_p4 = scmp.ne.s32.totalorder %s7086_s28, 0 }
   0x8   : > { %p7095_p5 = por %p69_p1, %p68_p0  ;;  %s217_s9 = sshll.u32 %s7781_s2, 4  ;;  %s218_s9 = int_to_ptr.hbm [resolvable:$true] %s217_s9 }
   0x9   : > { %p7102_p6 = pnand %p4081_p2, %p205_p3  ;;  %s7020_s11 = smov [#allocation5]  }
   0xa   : > { %s219_s12 = sshll.u32 %s7020_s11, 4  ;;  %s243_s15 = sshll.u32 %s7783_s4, 4  ;;  %s220_s12 = int_to_ptr.vmem [resolvable:$true] %s219_s12  ;;  %s244_s15 = int_to_ptr.hbm [resolvable:$true] %s243_s15 }
   0xb   : > { %p6758_p7 = pneg %p7102_p6  ;;  %s228_s19 = sshll.u32 %s7782_s3, 4  ;;  %s229_s19 = int_to_ptr.hbm [resolvable:$true] %s228_s19 }
   0xc   : > { %s7021_s20 = smov [#allocation8]   ;;  %s7022_s22 = smov [#allocation7]  }
   0xd   : > { %p7113_p8 = pnand %p6758_p7, %p69_p1  ;;  %s245_s21 = sshll.u32 %s7021_s20, 4  ;;  %s246_s21 = int_to_ptr.vmem [resolvable:$true] %s245_s21 }
   0xe   : > { %s230_s23 = sshll.u32 %s7022_s22, 4  ;;  %s258_s8 = sshll.u32 %s7785_s6, 4  ;;  %s231_s23 = int_to_ptr.vmem [resolvable:$true] %s230_s23  ;;  %s259_s8 = int_to_ptr.hbm [resolvable:$true] %s258_s8 }
   0xf   : > { %6761 = dma.hbm_to_vmem [thread:$0]  (!%p7113_p8), %s218_s9, 16, %s220_s12, [#allocation6]  }
  0x10   : > { %6767 = dma.hbm_to_vmem [thread:$0]  (!%p7113_p8), %s244_s15, 16, %s246_s21, [#allocation9]  }
  0x11   : > { %s7023_s9 = smov 64   ;;  %s7024_s11 = smov 4  }
  0x12   : > { %6764 = dma.hbm_to_vmem [thread:$0]  (!%p7113_p8), %s229_s19, 1024, %s231_s23, [#allocation6], %s7023_s9, %s7023_s9, %s7024_s11  }
  0x13   : > { %s7025_s12 = smov [#allocation10]   ;;  %s7135_s14 = sadd.s32 1, %s7018_s27  }
  0x14   : > { %s260_s13 = sshll.u32 %s7025_s12, 4  ;;  %s55_s15 = sadd.s32 1, %s7014_s26  ;;  %s261_s13 = int_to_ptr.vmem [resolvable:$true] %s260_s13 }
  0x15   : > { %6770 = dma.hbm_to_vmem [thread:$0]  (!%p7113_p8), %s259_s8, 16, %s261_s13, [#allocation9]  }
  0x16   : > { %s52_s17 = ssub.s32 %s7018_s27, %s7135_s14  ;;  %p62_p9 = scmp.ne.s32.totalorder %s7014_s26, %s7010_s25 }
  0x17   : > { %p53_p10 = scmp.eq.s32.totalorder %s52_s17, 0  ;;  %p63_p11 = scmp.eq.s32.totalorder %s7018_s27, 0 }
  0x18   : > { %s280_s18 = sand.u32 1, %s7014_s26   ;;  %p6779_p13 = scmp.lt.s32.totalorder %s7018_s27, 2 }
  0x19   : > { %s7145_s20 = scalar_select %p53_p10, %s7014_s26, %s55_s15  }
  0x1a   : > { %p64_p12 = por %p63_p11, %p62_p9  ;;  %s4087_s19 = sshll.u32 %s280_s18, 12 }
  0x1b   : > { %s4102_s21 = sshll.u32 %s7018_s27, 12  ;;  %s284_s30 = scalar_lea.vmem [#allocation3], %s4087_s19 }
  0x1c   : > { %s289_s16 = scalar_lea.hbm %s7780_s1, %s4102_s21  ;;  %s292_s8 = sshll.u32 %s284_s30, 4  ;;  %s293_s8 = int_to_ptr.vmem [resolvable:$true] %s292_s8 }
  0x1d   : > { %s290_s24 = sshll.u32 %s289_s16, 4  ;;  %p7152_p0 = pnand %p6779_p13, %p64_p12  ;;  %s291_s24 = int_to_ptr.hbm [resolvable:$true] %s290_s24 }
  0x1e   : > { %s281_s13 = scalar_lea.sflag [#allocation4], %s280_s18  ;;  %s6946_s15 = sshra.s32 %s291_s24, 4  ;;  %s6947_s15 = int_to_ptr.hbm [resolvable:$true] %s6946_s15 }
  0x1f   : > { %s6948_s17 = scalar_lea.hbm %s6947_s15, 4096  ;;  %p6950_p3 = pneg %p7152_p0 }
  0x20   : > { %p6949_p2 = scmp.ne.s32.totalorder %s6947_s15, %s6948_s17  ;;  %s6953_s19 = scalar_lea.hbm %s7780_s1, 8192 }
  0x21   : > { %p6954_p9 = scmp.lt.s32.totalorder %s6947_s15, %s7780_s1  ;;  %p6955_p10 = scmp.lt.s32.totalorder %s6953_s19, %s6948_s17 }
  0x22   : > { %p6951_p7 = pnand %p6950_p3, %p6949_p2 }
  0x23   : > { %p6956_p11 = por %p6955_p10, %p6954_p9 }
  0x24   : > { %p6952_p8 = pneg %p6951_p7 }
  0x26   : > { %p6957_p12 = pnand %p6956_p11, %p6952_p8 }
  0x28   : > { %6960 = shalt.err (!%p6957_p12)
}
  0x29   : > { %6774 = dma.hbm_to_vmem [thread:$0]  (!%p7152_p0), %s291_s24, 65536, %s293_s8, %s281_s13, %s7023_s9, %s7023_s9, %s7024_s11  }
  0x2a   : > { %304 = sbr.rel (%p7102_p6) target bundleno = 1037 (0x40d), region = 48  ;;  %s306_s18 = sand.u32 (!%p7102_p6), 1, %s7010_s25  }
  0x2b   : > { %s4091_s16 = sshll.u32 (!%p7102_p6), %s306_s18, 12  ;;  %s307_s30 = scalar_lea.sflag (!%p7102_p6), [#allocation4], %s306_s18 }
  0x2c   : > { %s7172_s27 = scalar_lea.vmem (!%p7102_p6), [#allocation3], %s4091_s16 }
  0x2f   : > { %6993 = dma.done.wait (%p7095_p5), %s307_s30, 65536  }
  0x30   : > { %6995 = vsyncadd (%p7095_p5), %s307_s30, 4294901760 }
  0x31   : > { %6997 = dma.done.wait (%p69_p1), [#allocation6], 1040  }
  0x32   : > { %6999 = vsyncadd (%p69_p1), [#allocation6], 4294966256 }
  0x33   : > { %7001 = dma.done.wait (%p69_p1), [#allocation9], 32  }
  0x34   : > { %7003 = vsyncadd (%p69_p1), [#allocation9], 4294967264  ;;  %s4096_s10 = sshll.u32 %s7086_s28, 6 }
  0x35   : > { %p363_p6 = scmp.lt.s32.totalorder %s4096_s10, 127  ;;  %372 = sbr.rel (%p4082_p4) target bundleno = 60 (0x3c), region = 72 }
  0x37   : > { %s7796_s10 = smov (!%p363_p6, %s4096_s10), 127 }
  0x38   : > { %s4097_s9 = sshll.u32 %s7796_s10, 2 }
  0x39   : > { %s7190_s24 = scalar_lea.vmem %s7779_s0, %s4097_s9 }
  0x3a   : > { %v7026_v0 = vmov 0.0  }
  0x3b   : > { %373 = vst [vmem:[#allocation2] sm:$0xff] %v7026_v0 }
  0x3c PF: > { %v6221_v1 = vld [vmem:[%s7172_s27 + $0x38] sm:$0xff]   ;;  %v6220_v9 = vld [vmem:[%s7172_s27 + $0x30] sm:$0xff]   ;;  %v6219_v21 = vld [vmem:[%s7172_s27 + $0x28] sm:$0xff]   ;;  %p4099_p1 = scmp.ne.s32.totalorder %s7086_s28, 1 }
  0x3d   : > { %v6237_v2 = vld [vmem:[%s7172_s27 + $0xb8] sm:$0xff]   ;;  %v4134_v4 = vunpack.c.h.bf16 %v6221_v1  ;;  %v4133_v6 = vunpack.c.l.bf16 %v6221_v1  ;;  %v6236_v10 = vld [vmem:[%s7172_s27 + $0xb0] sm:$0xff]   ;;  %v4130_v16 = vunpack.c.h.bf16 %v6220_v9  ;;  %v6235_v22 = vld [vmem:[%s7172_s27 + $0xa8] sm:$0xff]   ;;  %v4129_v23 = vunpack.c.l.bf16 %v6220_v9 }
  0x3e   : > { %v6229_v3 = vld [vmem:[%s7172_s27 + $0x78] sm:$0xff]   ;;  %v4198_v5 = vunpack.c.h.bf16 %v6237_v2  ;;  %v4197_v11 = vunpack.c.l.bf16 %v6237_v2  ;;  %v6228_v14 = vld [vmem:[%s7172_s27 + $0x70] sm:$0xff]   ;;  %v4194_v17 = vunpack.c.h.bf16 %v6236_v10  ;;  %v4193_v24 = vunpack.c.l.bf16 %v6236_v10  ;;  %v6227_v25 = vld [vmem:[%s7172_s27 + $0x68] sm:$0xff]  }
  0x3f   : > { %v4166_v7 = vunpack.c.h.bf16 %v6229_v3  ;;  %v6245_v8 = vld [vmem:[%s7172_s27 + $0xf8] sm:$0xff]   ;;  %v4165_v13 = vunpack.c.l.bf16 %v6229_v3  ;;  %v6244_v15 = vld [vmem:[%s7172_s27 + $0xf0] sm:$0xff]   ;;  %2583 = vmatpush.msra.mxu0 %v4134_v4  ;;  %v4162_v19 = vunpack.c.h.bf16 %v6228_v14  ;;  %v6243_v26 = vld [vmem:[%s7172_s27 + $0xe8] sm:$0xff]   ;;  %v4161_v27 = vunpack.c.l.bf16 %v6228_v14 }
  0x40   : > { %v4230_v12 = vunpack.c.h.bf16 %v6245_v8  ;;  %2623 = vmatpush.msra.mxu2 %v4198_v5  ;;  %v4229_v18 = vunpack.c.l.bf16 %v6245_v8  ;;  %v4226_v20 = vunpack.c.h.bf16 %v6244_v15  ;;  %v4225_v28 = vunpack.c.l.bf16 %v6244_v15  ;;  %v6218_v33 = vld [vmem:[%s7172_s27 + $0x20] sm:$0xff]   ;;  %v6217_v45 = vld [vmem:[%s7172_s27 + $0x18] sm:$0xff]   ;;  %v6216_v57 = vld [vmem:[%s7172_s27 + $0x10] sm:$0xff]  }
  0x41   : > { %2603 = vmatpush.msra.mxu1 %v4166_v7  ;;  %2584 = vmatpush.msra.mxu0 %v4133_v6  ;;  %v4126_v29 = vunpack.c.h.bf16 %v6219_v21  ;;  %v4190_v30 = vunpack.c.h.bf16 %v6235_v22  ;;  %v4158_v31 = vunpack.c.h.bf16 %v6227_v25  ;;  %v4222_v32 = vunpack.c.h.bf16 %v6243_v26  ;;  %v6234_v34 = vld [vmem:[%s7172_s27 + $0xa0] sm:$0xff]   ;;  %v6233_v46 = vld [vmem:[%s7172_s27 + $0x98] sm:$0xff]   ;;  %v6232_v58 = vld [vmem:[%s7172_s27 + $0x90] sm:$0xff]  }
  0x42   : > { %2643 = vmatpush.msra.mxu3 %v4230_v12  ;;  %2624 = vmatpush.msra.mxu2 %v4197_v11  ;;  %v4125_v35 = vunpack.c.l.bf16 %v6219_v21  ;;  %v4189_v36 = vunpack.c.l.bf16 %v6235_v22  ;;  %v6226_v37 = vld [vmem:[%s7172_s27 + $0x60] sm:$0xff]   ;;  %v4157_v39 = vunpack.c.l.bf16 %v6227_v25  ;;  %v4221_v40 = vunpack.c.l.bf16 %v6243_v26  ;;  %v6225_v49 = vld [vmem:[%s7172_s27 + $0x58] sm:$0xff]   ;;  %v6224_v61 = vld [vmem:[%s7172_s27 + $0x50] sm:$0xff]  }
  0x43   : > { %2604 = vmatpush.msra.mxu1 %v4165_v13  ;;  %2585 = vmatpush.msra.mxu0 %v4130_v16  ;;  %v6242_v38 = vld [vmem:[%s7172_s27 + $0xe0] sm:$0xff]   ;;  %v4122_v41 = vunpack.c.h.bf16 %v6218_v33  ;;  %v4186_v42 = vunpack.c.h.bf16 %v6234_v34  ;;  %v4154_v43 = vunpack.c.h.bf16 %v6226_v37  ;;  %v4121_v47 = vunpack.c.l.bf16 %v6218_v33  ;;  %v6241_v50 = vld [vmem:[%s7172_s27 + $0xd8] sm:$0xff]   ;;  %v6240_v62 = vld [vmem:[%s7172_s27 + $0xd0] sm:$0xff]  }
  0x44   : > { %2644 = vmatpush.msra.mxu3 %v4229_v18  ;;  %2625 = vmatpush.msra.mxu2 %v4194_v17  ;;  %v4218_v44 = vunpack.c.h.bf16 %v6242_v38  ;;  %v4185_v48 = vunpack.c.l.bf16 %v6234_v34  ;;  %v4153_v51 = vunpack.c.l.bf16 %v6226_v37  ;;  %v4217_v52 = vunpack.c.l.bf16 %v6242_v38  ;;  %v6215_v5 = vld [vmem:[%s7172_s27 + $0x8] sm:$0xff]   ;;  %v4104_v17 = vld [vmem:[%s7172_s27] sm:$0xff]   ;;  %v6261_v33 = vld [vmem:[%s7172_s27 + $0x178] sm:$0xff]  }
  0x45   : > { %2605 = vmatpush.msra.mxu1 %v4162_v19  ;;  %2586 = vmatpush.msra.mxu0 %v4129_v23  ;;  %v4118_v53 = vunpack.c.h.bf16 %v6217_v45  ;;  %v4182_v54 = vunpack.c.h.bf16 %v6233_v46  ;;  %v4150_v55 = vunpack.c.h.bf16 %v6225_v49  ;;  %v4214_v56 = vunpack.c.h.bf16 %v6241_v50  ;;  %v6231_v6 = vld [vmem:[%s7172_s27 + $0x88] sm:$0xff]   ;;  %v6230_v18 = vld [vmem:[%s7172_s27 + $0x80] sm:$0xff]  }
  0x46   : > { %2645 = vmatpush.msra.mxu3 %v4226_v20  ;;  %2626 = vmatpush.msra.mxu2 %v4193_v24  ;;  %v4117_v59 = vunpack.c.l.bf16 %v6217_v45  ;;  %v4181_v60 = vunpack.c.l.bf16 %v6233_v46  ;;  %v4149_v63 = vunpack.c.l.bf16 %v6225_v49  ;;  %v4213_v0 = vunpack.c.l.bf16 %v6241_v50  ;;  %v6223_v9 = vld [vmem:[%s7172_s27 + $0x48] sm:$0xff]   ;;  %v6222_v21 = vld [vmem:[%s7172_s27 + $0x40] sm:$0xff]   ;;  %v6260_v45 = vld [vmem:[%s7172_s27 + $0x170] sm:$0xff]  }
  0x47   : > { %2606 = vmatpush.msra.mxu1 %v4161_v27  ;;  %2587 = vmatpush.msra.mxu0 %v4126_v29  ;;  %v4114_v1 = vunpack.c.h.bf16 %v6216_v57  ;;  %v4178_v2 = vunpack.c.h.bf16 %v6232_v58  ;;  %v4146_v3 = vunpack.c.h.bf16 %v6224_v61  ;;  %v4210_v4 = vunpack.c.h.bf16 %v6240_v62  ;;  %v6239_v10 = vld [vmem:[%s7172_s27 + $0xc8] sm:$0xff]   ;;  %v6238_v22 = vld [vmem:[%s7172_s27 + $0xc0] sm:$0xff]   ;;  %v6253_v27 = vld [vmem:[%s7172_s27 + $0x138] sm:$0xff]  }
  0x48   : > { %2646 = vmatpush.msra.mxu3 %v4225_v28  ;;  %2627 = vmatpush.msra.mxu2 %v4190_v30  ;;  %v4113_v7 = vunpack.c.l.bf16 %v6216_v57  ;;  %v4177_v8 = vunpack.c.l.bf16 %v6232_v58  ;;  %v4145_v11 = vunpack.c.l.bf16 %v6224_v61  ;;  %v4209_v12 = vunpack.c.l.bf16 %v6240_v62  ;;  %v6269_v28 = vld [vmem:[%s7172_s27 + $0x1b8] sm:$0xff]   ;;  %v6259_v57 = vld [vmem:[%s7172_s27 + $0x168] sm:$0xff]  }
  0x49   : > { %2607 = vmatpush.msra.mxu1 %v4158_v31  ;;  %2588 = vmatpush.msra.mxu0 %v4125_v35  ;;  %v4110_v13 = vunpack.c.h.bf16 %v6215_v5  ;;  %v4174_v14 = vunpack.c.h.bf16 %v6231_v6  ;;  %v4142_v15 = vunpack.c.h.bf16 %v6223_v9  ;;  %v4206_v16 = vunpack.c.h.bf16 %v6239_v10 }
  0x4a   : > { %2647 = vmatpush.msra.mxu3 %v4222_v32  ;;  %2628 = vmatpush.msra.mxu2 %v4189_v36  ;;  %v4109_v19 = vunpack.c.l.bf16 %v6215_v5  ;;  %v4173_v20 = vunpack.c.l.bf16 %v6231_v6  ;;  %v4141_v23 = vunpack.c.l.bf16 %v6223_v9  ;;  %v4205_v24 = vunpack.c.l.bf16 %v6239_v10  ;;  %v6277_v36 = vld [vmem:[%s7172_s27 + $0x1f8] sm:$0xff]   ;;  %v6258_v5 = vld [vmem:[%s7172_s27 + $0x160] sm:$0xff]  }
  0x4b   : > { %2608 = vmatpush.msra.mxu1 %v4157_v39  ;;  %2589 = vmatpush.msra.mxu0 %v4122_v41  ;;  %v4106_v25 = vunpack.c.h.bf16 %v4104_v17  ;;  %v4170_v26 = vunpack.c.h.bf16 %v6230_v18  ;;  %v4138_v29 = vunpack.c.h.bf16 %v6222_v21  ;;  %v4202_v30 = vunpack.c.h.bf16 %v6238_v22  ;;  %v6252_v39 = vld [vmem:[%s7172_s27 + $0x130] sm:$0xff]  }
  0x4c   : > { %2648 = vmatpush.msra.mxu3 %v4221_v40  ;;  %2629 = vmatpush.msra.mxu2 %v4186_v42  ;;  %v4105_v31 = vunpack.c.l.bf16 %v4104_v17  ;;  %v4169_v32 = vunpack.c.l.bf16 %v6230_v18  ;;  %v4262_v34 = vunpack.c.h.bf16 %v6253_v27  ;;  %v4326_v35 = vunpack.c.h.bf16 %v6269_v28  ;;  %v6268_v42 = vld [vmem:[%s7172_s27 + $0x1b0] sm:$0xff]   ;;  %v6257_v17 = vld [vmem:[%s7172_s27 + $0x158] sm:$0xff]  }
  0x4d   : > { %2609 = vmatpush.msra.mxu1 %v4154_v43  ;;  %2590 = vmatpush.msra.mxu0 %v4121_v47  ;;  %v4137_v37 = vunpack.c.l.bf16 %v6222_v21  ;;  %v4201_v38 = vunpack.c.l.bf16 %v6238_v22  ;;  %v4261_v40 = vunpack.c.l.bf16 %v6253_v27  ;;  %v4294_v41 = vunpack.c.h.bf16 %v6261_v33 }
  0x4e   : > { %2649 = vmatpush.msra.mxu3 %v4218_v44  ;;  %2630 = vmatpush.msra.mxu2 %v4185_v48  ;;  %v4325_v43 = vunpack.c.l.bf16 %v6269_v28  ;;  %v4358_v44 = vunpack.c.h.bf16 %v6277_v36  ;;  %v4258_v46 = vunpack.c.h.bf16 %v6252_v39  ;;  %v4293_v47 = vunpack.c.l.bf16 %v6261_v33  ;;  %v6276_v48 = vld [vmem:[%s7172_s27 + $0x1f0] sm:$0xff]  }
  0x4f   : > { %2610 = vmatpush.msra.mxu1 %v4153_v51  ;;  %2591 = vmatpush.msra.mxu0 %v4118_v53  ;;  %v4322_v49 = vunpack.c.h.bf16 %v6268_v42  ;;  %v4357_v50 = vunpack.c.l.bf16 %v6277_v36  ;;  %v6251_v51 = vld [vmem:[%s7172_s27 + $0x128] sm:$0xff]   ;;  %v4290_v53 = vunpack.c.h.bf16 %v6260_v45  ;;  %v4353_v62 = vunpack.c.l.bf16 %v6276_v48 }
  0x50   : > { %2650 = vmatpush.msra.mxu3 %v4217_v52  ;;  %2631 = vmatpush.msra.mxu2 %v4182_v54  ;;  %v4257_v52 = vunpack.c.l.bf16 %v6252_v39  ;;  %v6267_v54 = vld [vmem:[%s7172_s27 + $0x1a8] sm:$0xff]   ;;  %v4254_v58 = vunpack.c.h.bf16 %v6251_v51 }
  0x51   : > { %2611 = vmatpush.msra.mxu1 %v4150_v55  ;;  %2592 = vmatpush.msra.mxu0 %v4117_v59  ;;  %v4321_v55 = vunpack.c.l.bf16 %v6268_v42  ;;  %v4289_v59 = vunpack.c.l.bf16 %v6260_v45  ;;  %v4318_v61 = vunpack.c.h.bf16 %v6267_v54  ;;  %v375_v42 = vld [vmem:[%s7190_s24 + $0x8] sm:$0xff]  ;;  %v6271_v45 = vld [vmem:[%s7172_s27 + $0x1c8] sm:$0xff]  }
  0x52   : > { %2651 = vmatpush.msra.mxu3 %v4214_v56  ;;  %2632 = vmatpush.msra.mxu2 %v4181_v60  ;;  %v4354_v56 = vunpack.c.h.bf16 %v6276_v48  ;;  %v6275_v60 = vld [vmem:[%s7172_s27 + $0x1e8] sm:$0xff]   ;;  %v6246_v48 = vld [vmem:[%s7172_s27 + $0x100] sm:$0xff]  }
  0x53   : > { %2612 = vmatpush.msra.mxu1 %v4149_v63  ;;  %2593 = vmatpush.msra.mxu0 %v4114_v1  ;;  %v6250_v63 = vld [vmem:[%s7172_s27 + $0x120] sm:$0xff]   ;;  %v4286_v1 = vunpack.c.h.bf16 %v6259_v57  ;;  %v4349_v10 = vunpack.c.l.bf16 %v6275_v60 }
  0x54   : > { %2652 = vmatpush.msra.mxu3 %v4213_v0  ;;  %2633 = vmatpush.msra.mxu2 %v4178_v2  ;;  %v4253_v0 = vunpack.c.l.bf16 %v6251_v51  ;;  %v6266_v2 = vld [vmem:[%s7172_s27 + $0x1a0] sm:$0xff]   ;;  %v4250_v6 = vunpack.c.h.bf16 %v6250_v63 }
  0x55   : > { %2613 = vmatpush.msra.mxu1 %v4146_v3  ;;  %2594 = vmatpush.msra.mxu0 %v4113_v7  ;;  %v4317_v3 = vunpack.c.l.bf16 %v6267_v54  ;;  %v4285_v7 = vunpack.c.l.bf16 %v6259_v57  ;;  %v4314_v9 = vunpack.c.h.bf16 %v6266_v2 }
  0x56   : > { %2653 = vmatpush.msra.mxu3 %v4210_v4  ;;  %2634 = vmatpush.msra.mxu2 %v4177_v8  ;;  %v4350_v4 = vunpack.c.h.bf16 %v6275_v60  ;;  %v6274_v8 = vld [vmem:[%s7172_s27 + $0x1e0] sm:$0xff]  }
  0x57   : > { %2614 = vmatpush.msra.mxu1 %v4145_v11  ;;  %2595 = vmatpush.msra.mxu0 %v4110_v13  ;;  %v6249_v11 = vld [vmem:[%s7172_s27 + $0x118] sm:$0xff]   ;;  %v4282_v13 = vunpack.c.h.bf16 %v6258_v5  ;;  %v4345_v22 = vunpack.c.l.bf16 %v6274_v8 }
  0x58   : > { %2654 = vmatpush.msra.mxu3 %v4209_v12  ;;  %2635 = vmatpush.msra.mxu2 %v4174_v14  ;;  %v4249_v12 = vunpack.c.l.bf16 %v6250_v63  ;;  %v6265_v14 = vld [vmem:[%s7172_s27 + $0x198] sm:$0xff]   ;;  %v4246_v18 = vunpack.c.h.bf16 %v6249_v11  ;;  %v409_v63 = vunpack.c.h.bf16 %v375_v42 }
  0x59   : > { %2615 = vmatpush.msra.mxu1 %v4142_v15  ;;  %2596 = vmatpush.msra.mxu0 %v4109_v19  ;;  %v4313_v15 = vunpack.c.l.bf16 %v6266_v2  ;;  %v4281_v19 = vunpack.c.l.bf16 %v6258_v5  ;;  %v4310_v21 = vunpack.c.h.bf16 %v6265_v14  ;;  %v4309_v27 = vunpack.c.l.bf16 %v6265_v14  ;;  %v6285_v2 = vld [vmem:[%s7172_s27 + $0x238] sm:$0xff]  }
  0x5a   : > { %2655 = vmatpush.msra.mxu3 %v4206_v16  ;;  %2636 = vmatpush.msra.mxu2 %v4173_v20  ;;  %v4346_v16 = vunpack.c.h.bf16 %v6274_v8  ;;  %v6273_v20 = vld [vmem:[%s7172_s27 + $0x1d8] sm:$0xff]  }
  0x5b   : > { %2616 = vmatpush.msra.mxu1 %v4141_v23  ;;  %2597 = vmatpush.msra.mxu0 %v4106_v25  ;;  %v6248_v23 = vld [vmem:[%s7172_s27 + $0x110] sm:$0xff]   ;;  %v4278_v25 = vunpack.c.h.bf16 %v6257_v17  ;;  %v4342_v28 = vunpack.c.h.bf16 %v6273_v20  ;;  %v6301_v5 = vld [vmem:[%s7172_s27 + $0x2b8] sm:$0xff]  }
  0x5c   : > { %2656 = vmatpush.msra.mxu3 %v4205_v24  ;;  %2637 = vmatpush.msra.mxu2 %v4170_v26  ;;  %v4245_v24 = vunpack.c.l.bf16 %v6249_v11  ;;  %v6264_v26 = vld [vmem:[%s7172_s27 + $0x190] sm:$0xff]   ;;  %v4241_v36 = vunpack.c.l.bf16 %v6248_v23  ;;  %v6293_v11 = vld [vmem:[%s7172_s27 + $0x278] sm:$0xff]  }
  0x5d   : > { %2617 = vmatpush.msra.mxu1 %v4138_v29  ;;  %2598 = vmatpush.msra.mxu0 %v4105_v31  ;;  %v6256_v29 = vld [vmem:[%s7172_s27 + $0x150] sm:$0xff]   ;;  %v4277_v31 = vunpack.c.l.bf16 %v6257_v17  ;;  %v4306_v33 = vunpack.c.h.bf16 %v6264_v26  ;;  %v4305_v39 = vunpack.c.l.bf16 %v6264_v26 }
  0x5e   : > { %2657 = vmatpush.msra.mxu3 %v4202_v30  ;;  %2638 = vmatpush.msra.mxu2 %v4169_v32  ;;  %v4242_v30 = vunpack.c.h.bf16 %v6248_v23  ;;  %v6272_v32 = vld [vmem:[%s7172_s27 + $0x1d0] sm:$0xff]  }
  0x5f   : > { %2663 = vmatpush.msrb.mxu0 %v4262_v34  ;;  %2618 = vmatpush.msra.mxu1 %v4137_v37  ;;  %v4341_v34 = vunpack.c.l.bf16 %v6273_v20  ;;  %v4274_v37 = vunpack.c.h.bf16 %v6256_v29  ;;  %v4389_v20 = vunpack.c.l.bf16 %v6285_v2 }
  0x60   : > { %2703 = vmatpush.msrb.mxu2 %v4326_v35  ;;  %2658 = vmatpush.msra.mxu3 %v4201_v38  ;;  %v6247_v35 = vld [vmem:[%s7172_s27 + $0x108] sm:$0xff]  }
  0x61   : > { %2664 = vmatpush.msrb.mxu0 %v4261_v40  ;;  %2683 = vmatpush.msrb.mxu1 %v4294_v41  ;;  %v6263_v38 = vld [vmem:[%s7172_s27 + $0x188] sm:$0xff]   ;;  %v4338_v40 = vunpack.c.h.bf16 %v6272_v32 }
  0x62   : > { %2704 = vmatpush.msrb.mxu2 %v4325_v43  ;;  %2723 = vmatpush.msrb.mxu3 %v4358_v44  ;;  %v6255_v41 = vld [vmem:[%s7172_s27 + $0x148] sm:$0xff]   ;;  %v4238_v43 = vunpack.c.h.bf16 %v6247_v35  ;;  %v4273_v44 = vunpack.c.l.bf16 %v6256_v29  ;;  %v4301_v54 = vunpack.c.l.bf16 %v6263_v38 }
  0x63   : > { %2665 = vmatpush.msrb.mxu0 %v4258_v46  ;;  %2684 = vmatpush.msrb.mxu1 %v4293_v47  ;;  %v4302_v46 = vunpack.c.h.bf16 %v6263_v38  ;;  %v4337_v47 = vunpack.c.l.bf16 %v6272_v32  ;;  %v4270_v51 = vunpack.c.h.bf16 %v6255_v41  ;;  %v4269_v57 = vunpack.c.l.bf16 %v6255_v41  ;;  %v6308_v32 = vld [vmem:[%s7172_s27 + $0x2f0] sm:$0xff]  }
  0x64   : > { %2705 = vmatpush.msrb.mxu2 %v4322_v49  ;;  %2724 = vmatpush.msrb.mxu3 %v4357_v50  ;;  %v374_v49 = vld [vmem:[%s7190_s24] sm:$0xff]  ;;  %v4237_v50 = vunpack.c.l.bf16 %v6247_v35  ;;  %v4482_v41 = vunpack.c.h.bf16 %v6308_v32 }
  0x65   : > { %2666 = vmatpush.msrb.mxu0 %v4257_v52  ;;  %2685 = vmatpush.msrb.mxu1 %v4290_v53  ;;  %v6262_v52 = vld [vmem:[%s7172_s27 + $0x180] sm:$0xff]   ;;  %v408_v53 = vunpack.c.l.bf16 %v375_v42 }
  0x66   : > { %2706 = vmatpush.msrb.mxu2 %v4321_v55  ;;  %2725 = vmatpush.msrb.mxu3 %v4354_v56  ;;  %v4334_v55 = vunpack.c.h.bf16 %v6271_v45  ;;  %v4234_v56 = vunpack.c.h.bf16 %v6246_v48  ;;  %v4298_v60 = vunpack.c.h.bf16 %v6262_v52 }
  0x67   : > { %2667 = vmatpush.msrb.mxu0 %v4254_v58  ;;  %2686 = vmatpush.msrb.mxu1 %v4289_v59  ;;  %v6254_v58 = vld [vmem:[%s7172_s27 + $0x140] sm:$0xff]   ;;  %v406_v59 = vunpack.c.l.bf16 %v374_v49 }
  0x68   : > { %2707 = vmatpush.msrb.mxu2 %v4318_v61  ;;  %2726 = vmatpush.msrb.mxu3 %v4353_v62  ;;  %v4333_v61 = vunpack.c.l.bf16 %v6271_v45  ;;  %v6270_v62 = vld [vmem:[%s7172_s27 + $0x1c0] sm:$0xff]   ;;  %v4265_v14 = vunpack.c.l.bf16 %v6254_v58  ;;  %v6291_v45 = vld [vmem:[%s7172_s27 + $0x268] sm:$0xff]  }
  0x69   : > { %2668 = vmatpush.msrb.mxu0 %v4253_v0  ;;  %2687 = vmatpush.msrb.mxu1 %v4286_v1  ;;  %v472_v0 = vmul.f32 0.003921569, %v408_v53  ;;  %v4233_v1 = vunpack.c.l.bf16 %v6246_v48  ;;  %v470_v8 = vmul.f32 0.003921569, %v406_v59  ;;  %v6307_v48 = vld [vmem:[%s7172_s27 + $0x2e8] sm:$0xff]   ;;  %v4414_v53 = vunpack.c.h.bf16 %v6291_v45 }
  0x6a   : > { %2708 = vmatpush.msrb.mxu2 %v4317_v3  ;;  %2727 = vmatpush.msrb.mxu3 %v4350_v4  ;;  %v4266_v3 = vunpack.c.h.bf16 %v6254_v58  ;;  %v4297_v4 = vunpack.c.l.bf16 %v6262_v52  ;;  %v4413_v59 = vunpack.c.l.bf16 %v6291_v45 }
  0x6b   : > { %2669 = vmatpush.msrb.mxu0 %v4250_v6  ;;  %2688 = vmatpush.msrb.mxu1 %v4285_v7  ;;  %v407_v6 = vunpack.c.h.bf16 %v374_v49  ;;  %v4330_v7 = vunpack.c.h.bf16 %v6270_v62  ;;  %v4481_v49 = vunpack.c.l.bf16 %v6308_v32  ;;  %v6303_v32 = vld [vmem:[%s7172_s27 + $0x2c8] sm:$0xff]  }
  0x6c   : > { %2709 = vmatpush.msrb.mxu2 %v4314_v9  ;;  %2728 = vmatpush.msrb.mxu3 %v4349_v10  ;;  %v473_v9 = vmul.f32 0.003921569, %v409_v63  ;;  %v4390_v10 = vunpack.c.h.bf16 %v6285_v2  ;;  %v6281_v63 = vld [vmem:[%s7172_s27 + $0x218] sm:$0xff]  }
  0x6d   : > { %2670 = vmatpush.msrb.mxu0 %v4249_v12  ;;  %2689 = vmatpush.msrb.mxu1 %v4282_v13  ;;  %v377_v12 = vld [vmem:[%s7190_s24 + $0x18] sm:$0xff]  ;;  %v4454_v13 = vunpack.c.h.bf16 %v6301_v5  ;;  %v471_v17 = vmul.f32 0.003921569, %v407_v6  ;;  %v6297_v2 = vld [vmem:[%s7172_s27 + $0x298] sm:$0xff]   ;;  %v4374_v6 = vunpack.c.h.bf16 %v6281_v63 }
  0x6e   : > { %2710 = vmatpush.msrb.mxu2 %v4313_v15  ;;  %2729 = vmatpush.msrb.mxu3 %v4346_v16  ;;  %v6309_v15 = vld [vmem:[%s7172_s27 + $0x2f8] sm:$0xff]   ;;  %v4329_v16 = vunpack.c.l.bf16 %v6270_v62  ;;  %v412_v23 = vunpack.c.l.bf16 %v377_v12  ;;  %v4477_v62 = vunpack.c.l.bf16 %v6307_v48 }
  0x6f   : > { %2671 = vmatpush.msrb.mxu0 %v4246_v18  ;;  %2690 = vmatpush.msrb.mxu1 %v4281_v19  ;;  %v6284_v18 = vld [vmem:[%s7172_s27 + $0x230] sm:$0xff]   ;;  %v376_v19 = vld [vmem:[%s7190_s24 + $0x10] sm:$0xff] }
  0x70   : > { %2711 = vmatpush.msrb.mxu2 %v4310_v21  ;;  %2730 = vmatpush.msrb.mxu3 %v4345_v22  ;;  %v4422_v21 = vunpack.c.h.bf16 %v6293_v11  ;;  %v6300_v22 = vld [vmem:[%s7172_s27 + $0x2b0] sm:$0xff]   ;;  %v4386_v26 = vunpack.c.h.bf16 %v6284_v18  ;;  %v410_v29 = vunpack.c.l.bf16 %v376_v19  ;;  %v4385_v35 = vunpack.c.l.bf16 %v6284_v18 }
  0x71   : > { %2672 = vmatpush.msrb.mxu0 %v4245_v24  ;;  %2691 = vmatpush.msrb.mxu1 %v4278_v25  ;;  %v4453_v24 = vunpack.c.l.bf16 %v6301_v5  ;;  %v4486_v25 = vunpack.c.h.bf16 %v6309_v15  ;;  %v4449_v38 = vunpack.c.l.bf16 %v6300_v22  ;;  %v6289_v5 = vld [vmem:[%s7172_s27 + $0x258] sm:$0xff]  }
  0x72   : > { %2712 = vmatpush.msrb.mxu2 %v4309_v27  ;;  %2731 = vmatpush.msrb.mxu3 %v4342_v28  ;;  %v4421_v27 = vunpack.c.l.bf16 %v6293_v11  ;;  %v6292_v28 = vld [vmem:[%s7172_s27 + $0x270] sm:$0xff]   ;;  %v474_v42 = vmul.f32 0.003921569, %v410_v29  ;;  %v6287_v29 = vld [vmem:[%s7172_s27 + $0x248] sm:$0xff]  }
  0x73   : > { %2673 = vmatpush.msrb.mxu0 %v4242_v30  ;;  %2692 = vmatpush.msrb.mxu1 %v4277_v31  ;;  %v4450_v30 = vunpack.c.h.bf16 %v6300_v22  ;;  %v4485_v31 = vunpack.c.l.bf16 %v6309_v15  ;;  %v6280_v11 = vld [vmem:[%s7172_s27 + $0x210] sm:$0xff]   ;;  %v4437_v15 = vunpack.c.l.bf16 %v6297_v2  ;;  %v4397_v45 = vunpack.c.l.bf16 %v6287_v29 }
  0x74   : > { %2713 = vmatpush.msrb.mxu2 %v4306_v33  ;;  %2732 = vmatpush.msrb.mxu3 %v4341_v34  ;;  %v413_v33 = vunpack.c.h.bf16 %v377_v12  ;;  %v476_v34 = vmul.f32 0.003921569, %v412_v23  ;;  %v4373_v12 = vunpack.c.l.bf16 %v6281_v63  ;;  %v4370_v18 = vunpack.c.h.bf16 %v6280_v11  ;;  %v6279_v23 = vld [vmem:[%s7172_s27 + $0x208] sm:$0xff]   ;;  %v6325_v63 = vld [vmem:[%s7172_s27 + $0x378] sm:$0xff]  }
  0x75   : > { %2674 = vmatpush.msrb.mxu0 %v4241_v36  ;;  %2693 = vmatpush.msrb.mxu1 %v4274_v37  ;;  %v6283_v36 = vld [vmem:[%s7172_s27 + $0x228] sm:$0xff]   ;;  %v4418_v37 = vunpack.c.h.bf16 %v6292_v28 }
  0x76   : > { %2714 = vmatpush.msrb.mxu2 %v4305_v39  ;;  %2733 = vmatpush.msrb.mxu3 %v4338_v40  ;;  %v6299_v39 = vld [vmem:[%s7172_s27 + $0x2a8] sm:$0xff]   ;;  %v411_v40 = vunpack.c.h.bf16 %v376_v19  ;;  %v4381_v52 = vunpack.c.l.bf16 %v6283_v36  ;;  %v4405_v19 = vunpack.c.l.bf16 %v6289_v5 }
  0x77   : > { %2675 = vmatpush.msrb.mxu0 %v4238_v43  ;;  %2694 = vmatpush.msrb.mxu1 %v4273_v44  ;;  %v477_v43 = vmul.f32 0.003921569, %v413_v33  ;;  %v4382_v44 = vunpack.c.h.bf16 %v6283_v36  ;;  %v378_v36 = vld [vmem:[%s7190_s24 + $0x20] sm:$0xff] }
  0x78   : > { %2715 = vmatpush.msrb.mxu2 %v4302_v46  ;;  %2734 = vmatpush.msrb.mxu3 %v4337_v47  ;;  %v4417_v46 = vunpack.c.l.bf16 %v6292_v28  ;;  %v4446_v47 = vunpack.c.h.bf16 %v6299_v39 }
  0x79   : > { %2676 = vmatpush.msrb.mxu0 %v4237_v50  ;;  %2695 = vmatpush.msrb.mxu1 %v4270_v51  ;;  %v475_v50 = vmul.f32 0.003921569, %v411_v40  ;;  %v6282_v51 = vld [vmem:[%s7172_s27 + $0x220] sm:$0xff]  }
  0x7a   : > { %2716 = vmatpush.msrb.mxu2 %v4301_v54  ;;  %2735 = vmatpush.msrb.mxu3 %v4334_v55  ;;  %v6298_v54 = vld [vmem:[%s7172_s27 + $0x2a0] sm:$0xff]   ;;  %v4445_v55 = vunpack.c.l.bf16 %v6299_v39  ;;  %v4378_v58 = vunpack.c.h.bf16 %v6282_v51  ;;  %v4398_v39 = vunpack.c.h.bf16 %v6287_v29 }
  0x7b   : > { %2677 = vmatpush.msrb.mxu0 %v4234_v56  ;;  %2696 = vmatpush.msrb.mxu1 %v4269_v57  ;;  %v4478_v56 = vunpack.c.h.bf16 %v6307_v48  ;;  %v6290_v57 = vld [vmem:[%s7172_s27 + $0x260] sm:$0xff]  }
  0x7c   : > { %2717 = vmatpush.msrb.mxu2 %v4298_v60  ;;  %2736 = vmatpush.msrb.mxu3 %v4333_v61  ;;  %v6306_v60 = vld [vmem:[%s7172_s27 + $0x2e0] sm:$0xff]   ;;  %v4442_v61 = vunpack.c.h.bf16 %v6298_v54 }
  0x7d   : > { %2639 = vmatmul.f32.vlgmr.msra.gmra.mxu2 %v472_v0  ;;  %2678 = vmatpush.msrb.mxu0 %v4233_v1  ;;  %v4377_v0 = vunpack.c.l.bf16 %v6282_v51  ;;  %v4410_v1 = vunpack.c.h.bf16 %v6290_v57  ;;  %v6294_v40 = vld [vmem:[%s7172_s27 + $0x280] sm:$0xff]  }
  0x7e   : > { %2697 = vmatpush.msrb.mxu1 %v4266_v3  ;;  %2718 = vmatpush.msrb.mxu2 %v4297_v4  ;;  %v4441_v3 = vunpack.c.l.bf16 %v6298_v54  ;;  %v4474_v4 = vunpack.c.h.bf16 %v6306_v60  ;;  %v6333_v54 = vld [vmem:[%s7172_s27 + $0x3b8] sm:$0xff]   ;;  %v6314_v29 = vld [vmem:[%s7172_s27 + $0x320] sm:$0xff]  }
  0x7f   : > { %2737 = vmatpush.msrb.mxu3 %v4330_v7  ;;  %2599 = vmatmul.f32.vlgmr.msra.gmra.mxu0 %v470_v8  ;;  %v4409_v7 = vunpack.c.l.bf16 %v6290_v57  ;;  %v6305_v8 = vld [vmem:[%s7172_s27 + $0x2d8] sm:$0xff]   ;;  %v415_v57 = vunpack.c.h.bf16 %v378_v36 }
  0x80   : > { %2659 = vmatmul.f32.vlgmr.msra.gmra.mxu3 %v473_v9  ;;  %2743 = vmatpush.msra.mxu0 %v4390_v10  ;;  %v4438_v9 = vunpack.c.h.bf16 %v6297_v2  ;;  %v4473_v10 = vunpack.c.l.bf16 %v6306_v60  ;;  %v4469_v22 = vunpack.c.l.bf16 %v6305_v8  ;;  %v6341_v2 = vld [vmem:[%s7172_s27 + $0x3f8] sm:$0xff]  }
  0x81   : > { %2783 = vmatpush.msra.mxu2 %v4454_v13  ;;  %2698 = vmatpush.msrb.mxu1 %v4265_v14  ;;  %v4406_v13 = vunpack.c.h.bf16 %v6289_v5  ;;  %v6296_v14 = vld [vmem:[%s7172_s27 + $0x290] sm:$0xff]  }
  0x82   : > { %2738 = vmatpush.msrb.mxu3 %v4329_v16  ;;  %2619 = vmatmul.f32.vlgmr.msra.gmra.mxu1 %v471_v17  ;;  %v4470_v16 = vunpack.c.h.bf16 %v6305_v8  ;;  %v6288_v17 = vld [vmem:[%s7172_s27 + $0x250] sm:$0xff]  }
  0x83   : > { %2744 = vmatpush.msra.mxu0 %v4389_v20  ;;  %2763 = vmatpush.msra.mxu1 %v4422_v21  ;;  %v6304_v20 = vld [vmem:[%s7172_s27 + $0x2d0] sm:$0xff]   ;;  %v4434_v21 = vunpack.c.h.bf16 %v6296_v14 }
  0x84   : > { %2784 = vmatpush.msra.mxu2 %v4453_v24  ;;  %2803 = vmatpush.msra.mxu3 %v4486_v25  ;;  %v4369_v24 = vunpack.c.l.bf16 %v6280_v11  ;;  %v4402_v25 = vunpack.c.h.bf16 %v6288_v17  ;;  %v4466_v28 = vunpack.c.h.bf16 %v6304_v20  ;;  %v6316_v5 = vld [vmem:[%s7172_s27 + $0x330] sm:$0xff]  }
  0x85   : > { %2745 = vmatpush.msra.mxu0 %v4386_v26  ;;  %2764 = vmatpush.msra.mxu1 %v4421_v27  ;;  %v6295_v26 = vld [vmem:[%s7172_s27 + $0x288] sm:$0xff]   ;;  %v4433_v27 = vunpack.c.l.bf16 %v6296_v14  ;;  %v6332_v8 = vld [vmem:[%s7172_s27 + $0x3b0] sm:$0xff]  }
  0x86   : > { %2785 = vmatpush.msra.mxu2 %v4450_v30  ;;  %2804 = vmatpush.msra.mxu3 %v4485_v31  ;;  %v4366_v30 = vunpack.c.h.bf16 %v6279_v23  ;;  %v4401_v31 = vunpack.c.l.bf16 %v6288_v17  ;;  %v4430_v33 = vunpack.c.h.bf16 %v6295_v26  ;;  %v6324_v11 = vld [vmem:[%s7172_s27 + $0x370] sm:$0xff]   ;;  %v6315_v17 = vld [vmem:[%s7172_s27 + $0x328] sm:$0xff]  }
  0x87   : > { %2719 = vmatmul.f32.vlgmr.msrb.gmra.mxu2 %v476_v34  ;;  %2746 = vmatpush.msra.mxu0 %v4385_v35  ;;  %v4465_v34 = vunpack.c.l.bf16 %v6304_v20  ;;  %v6278_v35 = vld [vmem:[%s7172_s27 + $0x200] sm:$0xff]   ;;  %v6340_v14 = vld [vmem:[%s7172_s27 + $0x3f0] sm:$0xff]   ;;  %v6331_v20 = vld [vmem:[%s7172_s27 + $0x3a8] sm:$0xff]  }
  0x88   : > { %2765 = vmatpush.msra.mxu1 %v4418_v37  ;;  %2786 = vmatpush.msra.mxu2 %v4449_v38  ;;  %v379_v37 = vld [vmem:[%s7190_s24 + $0x28] sm:$0xff]  ;;  %v4365_v38 = vunpack.c.l.bf16 %v6279_v23  ;;  %v4361_v51 = vunpack.c.l.bf16 %v6278_v35  ;;  %v6323_v23 = vld [vmem:[%s7172_s27 + $0x368] sm:$0xff]  }
  0x89   : > { %2805 = vmatpush.msra.mxu3 %v4482_v41  ;;  %2679 = vmatmul.f32.vlgmr.msrb.gmra.mxu0 %v474_v42  ;;  %v4429_v41 = vunpack.c.l.bf16 %v6295_v26  ;;  %v4462_v42 = vunpack.c.h.bf16 %v6303_v32  ;;  %v416_v48 = vunpack.c.l.bf16 %v379_v37  ;;  %v6339_v26 = vld [vmem:[%s7172_s27 + $0x3e8] sm:$0xff]  }
  0x8a   : > { %2739 = vmatmul.f32.vlgmr.msrb.gmra.mxu3 %v477_v43  ;;  %2747 = vmatpush.msra.mxu0 %v4382_v44  ;;  %v6286_v43 = vld [vmem:[%s7172_s27 + $0x240] sm:$0xff]   ;;  %v4362_v44 = vunpack.c.h.bf16 %v6278_v35 }
  0x8b   : > { %2766 = vmatpush.msra.mxu1 %v4417_v46  ;;  %2787 = vmatpush.msra.mxu2 %v4446_v47  ;;  %v6302_v46 = vld [vmem:[%s7172_s27 + $0x2c0] sm:$0xff]   ;;  %v414_v47 = vunpack.c.l.bf16 %v378_v36  ;;  %v480_v60 = vmul.f32 0.003921569, %v416_v48  ;;  %v4506_v36 = vunpack.c.h.bf16 %v6314_v29 }
  0x8c   : > { %2806 = vmatpush.msra.mxu3 %v4481_v49  ;;  %2699 = vmatmul.f32.vlgmr.msrb.gmra.mxu1 %v475_v50  ;;  %v4426_v49 = vunpack.c.h.bf16 %v6294_v40  ;;  %v4461_v50 = vunpack.c.l.bf16 %v6303_v32  ;;  %v6330_v32 = vld [vmem:[%s7172_s27 + $0x3a0] sm:$0xff]  }
  0x8d   : > { %2748 = vmatpush.msra.mxu0 %v4381_v52  ;;  %2767 = vmatpush.msra.mxu1 %v4414_v53  ;;  %v4394_v52 = vunpack.c.h.bf16 %v6286_v43  ;;  %v6317_v53 = vld [vmem:[%s7172_s27 + $0x338] sm:$0xff]   ;;  %v6322_v35 = vld [vmem:[%s7172_s27 + $0x360] sm:$0xff]  }
  0x8e   : > { %2788 = vmatpush.msra.mxu2 %v4445_v55  ;;  %2807 = vmatpush.msra.mxu3 %v4478_v56  ;;  %v4425_v55 = vunpack.c.l.bf16 %v6294_v40  ;;  %v4458_v56 = vunpack.c.h.bf16 %v6302_v46  ;;  %v4605_v40 = vunpack.c.l.bf16 %v6339_v26 }
  0x8f   : > { %2749 = vmatpush.msra.mxu0 %v4378_v58  ;;  %2768 = vmatpush.msra.mxu1 %v4413_v59  ;;  %v417_v58 = vunpack.c.h.bf16 %v379_v37  ;;  %v478_v59 = vmul.f32 0.003921569, %v414_v47  ;;  %v4541_v37 = vunpack.c.l.bf16 %v6323_v23  ;;  %v6321_v47 = vld [vmem:[%s7172_s27 + $0x358] sm:$0xff]  }
  0x90   : > { %2789 = vmatpush.msra.mxu2 %v4442_v61  ;;  %2808 = vmatpush.msra.mxu3 %v4477_v62  ;;  %v4518_v61 = vunpack.c.h.bf16 %v6317_v53  ;;  %v4582_v62 = vunpack.c.h.bf16 %v6333_v54 }
  0x91   : > { %2750 = vmatpush.msra.mxu0 %v4377_v0  ;;  %2769 = vmatpush.msra.mxu1 %v4410_v1  ;;  %v4393_v0 = vunpack.c.l.bf16 %v6286_v43  ;;  %v4457_v1 = vunpack.c.l.bf16 %v6302_v46  ;;  %v4538_v43 = vunpack.c.h.bf16 %v6322_v35 }
  0x92   : > { %2790 = vmatpush.msra.mxu2 %v4441_v3  ;;  %2809 = vmatpush.msra.mxu3 %v4474_v4  ;;  %v479_v3 = vmul.f32 0.003921569, %v415_v57  ;;  %v481_v4 = vmul.f32 0.003921569, %v417_v58 }
  0x93   : > { %2751 = vmatpush.msra.mxu0 %v4374_v6  ;;  %2770 = vmatpush.msra.mxu1 %v4409_v7  ;;  %v4517_v6 = vunpack.c.l.bf16 %v6317_v53  ;;  %v4550_v7 = vunpack.c.h.bf16 %v6325_v63  ;;  %v6312_v53 = vld [vmem:[%s7172_s27 + $0x310] sm:$0xff]  }
  0x94   : > { %2791 = vmatpush.msra.mxu2 %v4438_v9  ;;  %2810 = vmatpush.msra.mxu3 %v4473_v10  ;;  %v4581_v9 = vunpack.c.l.bf16 %v6333_v54  ;;  %v4614_v10 = vunpack.c.h.bf16 %v6341_v2 }
  0x95   : > { %2752 = vmatpush.msra.mxu0 %v4373_v12  ;;  %2771 = vmatpush.msra.mxu1 %v4406_v13  ;;  %v4514_v12 = vunpack.c.h.bf16 %v6316_v5  ;;  %v4549_v13 = vunpack.c.l.bf16 %v6325_v63 }
  0x96   : > { %2792 = vmatpush.msra.mxu2 %v4437_v15  ;;  %2811 = vmatpush.msra.mxu3 %v4470_v16  ;;  %v4578_v15 = vunpack.c.h.bf16 %v6332_v8  ;;  %v4613_v16 = vunpack.c.l.bf16 %v6341_v2  ;;  %v4497_v2 = vunpack.c.l.bf16 %v6312_v53 }
  0x97   : > { %2753 = vmatpush.msra.mxu0 %v4370_v18  ;;  %2772 = vmatpush.msra.mxu1 %v4405_v19  ;;  %v4513_v18 = vunpack.c.l.bf16 %v6316_v5  ;;  %v4546_v19 = vunpack.c.h.bf16 %v6324_v11 }
  0x98   : > { %2793 = vmatpush.msra.mxu2 %v4434_v21  ;;  %2812 = vmatpush.msra.mxu3 %v4469_v22  ;;  %v4577_v21 = vunpack.c.l.bf16 %v6332_v8  ;;  %v4610_v22 = vunpack.c.h.bf16 %v6340_v14 }
  0x99   : > { %2754 = vmatpush.msra.mxu0 %v4369_v24  ;;  %2773 = vmatpush.msra.mxu1 %v4402_v25  ;;  %v4510_v24 = vunpack.c.h.bf16 %v6315_v17  ;;  %v4545_v25 = vunpack.c.l.bf16 %v6324_v11 }
  0x9a   : > { %2794 = vmatpush.msra.mxu2 %v4433_v27  ;;  %2813 = vmatpush.msra.mxu3 %v4466_v28  ;;  %v4574_v27 = vunpack.c.h.bf16 %v6331_v20  ;;  %v4609_v28 = vunpack.c.l.bf16 %v6340_v14  ;;  %v380_v14 = vld [vmem:[%s7190_s24 + $0x30] sm:$0xff] }
  0x9b   : > { %2755 = vmatpush.msra.mxu0 %v4366_v30  ;;  %2774 = vmatpush.msra.mxu1 %v4401_v31  ;;  %v4509_v30 = vunpack.c.l.bf16 %v6315_v17  ;;  %v4542_v31 = vunpack.c.h.bf16 %v6323_v23 }
  0x9c   : > { %2795 = vmatpush.msra.mxu2 %v4430_v33  ;;  %2814 = vmatpush.msra.mxu3 %v4465_v34  ;;  %v4573_v33 = vunpack.c.l.bf16 %v6331_v20  ;;  %v4606_v34 = vunpack.c.h.bf16 %v6339_v26 }
  0x9d   : > { %2756 = vmatpush.msra.mxu0 %v4365_v38  ;;  %2775 = vmatpush.msra.mxu1 %v4398_v39  ;;  %v6338_v38 = vld [vmem:[%s7172_s27 + $0x3e0] sm:$0xff]   ;;  %v4570_v39 = vunpack.c.h.bf16 %v6330_v32 }
  0x9e   : > { %2796 = vmatpush.msra.mxu2 %v4429_v41  ;;  %2815 = vmatpush.msra.mxu3 %v4462_v42  ;;  %v6313_v41 = vld [vmem:[%s7172_s27 + $0x318] sm:$0xff]   ;;  %v4505_v42 = vunpack.c.l.bf16 %v6314_v29  ;;  %v4602_v46 = vunpack.c.h.bf16 %v6338_v38 }
  0x9f   : > { %2757 = vmatpush.msra.mxu0 %v4362_v44  ;;  %2776 = vmatpush.msra.mxu1 %v4397_v45  ;;  %v6329_v44 = vld [vmem:[%s7172_s27 + $0x398] sm:$0xff]   ;;  %v4569_v45 = vunpack.c.l.bf16 %v6330_v32  ;;  %v4502_v48 = vunpack.c.h.bf16 %v6313_v41  ;;  %v4501_v54 = vunpack.c.l.bf16 %v6313_v41 }
  0xa0   : > { %2797 = vmatpush.msra.mxu2 %v4426_v49  ;;  %2816 = vmatpush.msra.mxu3 %v4461_v50  ;;  %v4537_v49 = vunpack.c.l.bf16 %v6322_v35  ;;  %v6337_v50 = vld [vmem:[%s7172_s27 + $0x3d8] sm:$0xff]   ;;  %v4565_v57 = vunpack.c.l.bf16 %v6329_v44  ;;  %v419_v35 = vunpack.c.h.bf16 %v380_v14 }
  0xa1   : > { %2758 = vmatpush.msra.mxu0 %v4361_v51  ;;  %2777 = vmatpush.msra.mxu1 %v4394_v52  ;;  %v4566_v51 = vunpack.c.h.bf16 %v6329_v44  ;;  %v4601_v52 = vunpack.c.l.bf16 %v6338_v38  ;;  %v4598_v58 = vunpack.c.h.bf16 %v6337_v50  ;;  %v6365_v32 = vld [vmem:[%s7172_s27 + $0x4b8] sm:$0xff]  }
  0xa2   : > { %2798 = vmatpush.msra.mxu2 %v4425_v55  ;;  %2817 = vmatpush.msra.mxu3 %v4458_v56  ;;  %v4534_v55 = vunpack.c.h.bf16 %v6321_v47  ;;  %v6328_v56 = vld [vmem:[%s7172_s27 + $0x390] sm:$0xff]   ;;  %v6357_v41 = vld [vmem:[%s7172_s27 + $0x478] sm:$0xff]  }
  0xa3   : > { %2759 = vmatmul.f32.vlgmr.msra.gmra.mxu0 %v478_v59  ;;  %2799 = vmatmul.f32.vlgmr.msra.gmra.mxu2 %v480_v60  ;;  %v6320_v59 = vld [vmem:[%s7172_s27 + $0x350] sm:$0xff]   ;;  %v4498_v60 = vunpack.c.h.bf16 %v6312_v53  ;;  %v4562_v63 = vunpack.c.h.bf16 %v6328_v56  ;;  %v4561_v5 = vunpack.c.l.bf16 %v6328_v56  ;;  %v6373_v44 = vld [vmem:[%s7172_s27 + $0x4f8] sm:$0xff]  }
  0xa4   : > { %2823 = vmatpush.msrb.mxu0 %v4518_v61  ;;  %2863 = vmatpush.msrb.mxu2 %v4582_v62  ;;  %v4533_v61 = vunpack.c.l.bf16 %v6321_v47  ;;  %v6336_v62 = vld [vmem:[%s7172_s27 + $0x3d0] sm:$0xff]  }
  0xa5   : > { %2778 = vmatpush.msra.mxu1 %v4393_v0  ;;  %2818 = vmatpush.msra.mxu3 %v4457_v1  ;;  %v4597_v0 = vunpack.c.l.bf16 %v6337_v50  ;;  %v6311_v1 = vld [vmem:[%s7172_s27 + $0x308] sm:$0xff]   ;;  %v6348_v47 = vld [vmem:[%s7172_s27 + $0x430] sm:$0xff]  }
  0xa6   : > { %2779 = vmatmul.f32.vlgmr.msra.gmra.mxu1 %v479_v3  ;;  %2819 = vmatmul.f32.vlgmr.msra.gmra.mxu3 %v481_v4  ;;  %v4530_v3 = vunpack.c.h.bf16 %v6320_v59  ;;  %v6327_v4 = vld [vmem:[%s7172_s27 + $0x388] sm:$0xff]   ;;  %v4494_v8 = vunpack.c.h.bf16 %v6311_v1  ;;  %v6364_v50 = vld [vmem:[%s7172_s27 + $0x4b0] sm:$0xff]  }
  0xa7   : > { %2824 = vmatpush.msrb.mxu0 %v4517_v6  ;;  %2843 = vmatpush.msrb.mxu1 %v4550_v7  ;;  %v4594_v6 = vunpack.c.h.bf16 %v6336_v62  ;;  %v6319_v7 = vld [vmem:[%s7172_s27 + $0x348] sm:$0xff]   ;;  %v4558_v11 = vunpack.c.h.bf16 %v6327_v4  ;;  %v6356_v53 = vld [vmem:[%s7172_s27 + $0x470] sm:$0xff]  }
  0xa8   : > { %2864 = vmatpush.msrb.mxu2 %v4581_v9  ;;  %2883 = vmatpush.msrb.mxu3 %v4614_v10  ;;  %v4529_v9 = vunpack.c.l.bf16 %v6320_v59  ;;  %v6335_v10 = vld [vmem:[%s7172_s27 + $0x3c8] sm:$0xff]   ;;  %v4526_v17 = vunpack.c.h.bf16 %v6319_v7  ;;  %v4525_v23 = vunpack.c.l.bf16 %v6319_v7  ;;  %v6372_v56 = vld [vmem:[%s7172_s27 + $0x4f0] sm:$0xff]   ;;  %v6346_v7 = vld [vmem:[%s7172_s27 + $0x420] sm:$0xff]  }
  0xa9   : > { %2825 = vmatpush.msrb.mxu0 %v4514_v12  ;;  %2844 = vmatpush.msrb.mxu1 %v4549_v13  ;;  %v4593_v12 = vunpack.c.l.bf16 %v6336_v62  ;;  %v6310_v13 = vld [vmem:[%s7172_s27 + $0x300] sm:$0xff]   ;;  %v4590_v20 = vunpack.c.h.bf16 %v6335_v10  ;;  %v6347_v59 = vld [vmem:[%s7172_s27 + $0x428] sm:$0xff]  }
  0xaa   : > { %2865 = vmatpush.msrb.mxu2 %v4578_v15  ;;  %2884 = vmatpush.msrb.mxu3 %v4613_v16  ;;  %v381_v15 = vld [vmem:[%s7190_s24 + $0x38] sm:$0xff]  ;;  %v4493_v16 = vunpack.c.l.bf16 %v6311_v1  ;;  %v4489_v29 = vunpack.c.l.bf16 %v6310_v13  ;;  %v6363_v62 = vld [vmem:[%s7172_s27 + $0x4a8] sm:$0xff]  }
  0xab   : > { %2826 = vmatpush.msrb.mxu0 %v4513_v18  ;;  %2845 = vmatpush.msrb.mxu1 %v4546_v19  ;;  %v6326_v18 = vld [vmem:[%s7172_s27 + $0x380] sm:$0xff]   ;;  %v4557_v19 = vunpack.c.l.bf16 %v6327_v4  ;;  %v420_v26 = vunpack.c.l.bf16 %v381_v15  ;;  %v6355_v1 = vld [vmem:[%s7172_s27 + $0x468] sm:$0xff]  }
  0xac   : > { %2866 = vmatpush.msrb.mxu2 %v4577_v21  ;;  %2885 = vmatpush.msrb.mxu3 %v4610_v22  ;;  %v6318_v21 = vld [vmem:[%s7172_s27 + $0x340] sm:$0xff]   ;;  %v4490_v22 = vunpack.c.h.bf16 %v6310_v13  ;;  %v6371_v4 = vld [vmem:[%s7172_s27 + $0x4e8] sm:$0xff]  }
  0xad   : > { %2827 = vmatpush.msrb.mxu0 %v4510_v24  ;;  %2846 = vmatpush.msrb.mxu1 %v4545_v25  ;;  %v6334_v24 = vld [vmem:[%s7172_s27 + $0x3c0] sm:$0xff]   ;;  %v418_v25 = vunpack.c.l.bf16 %v380_v14  ;;  %v484_v38 = vmul.f32 0.003921569, %v420_v26  ;;  %v4634_v14 = vunpack.c.h.bf16 %v6346_v7 }
  0xae   : > { %2867 = vmatpush.msrb.mxu2 %v4574_v27  ;;  %2886 = vmatpush.msrb.mxu3 %v4609_v28  ;;  %v4554_v27 = vunpack.c.h.bf16 %v6326_v18  ;;  %v4589_v28 = vunpack.c.l.bf16 %v6335_v10  ;;  %v6362_v10 = vld [vmem:[%s7172_s27 + $0x4a0] sm:$0xff]  }
  0xaf   : > { %2828 = vmatpush.msrb.mxu0 %v4509_v30  ;;  %2847 = vmatpush.msrb.mxu1 %v4542_v31  ;;  %v4522_v30 = vunpack.c.h.bf16 %v6318_v21  ;;  %v6349_v31 = vld [vmem:[%s7172_s27 + $0x438] sm:$0xff]   ;;  %v6354_v13 = vld [vmem:[%s7172_s27 + $0x460] sm:$0xff]  }
  0xb0   : > { %2868 = vmatpush.msrb.mxu2 %v4573_v33  ;;  %2887 = vmatpush.msrb.mxu3 %v4606_v34  ;;  %v4553_v33 = vunpack.c.l.bf16 %v6326_v18  ;;  %v4586_v34 = vunpack.c.h.bf16 %v6334_v24  ;;  %v4733_v18 = vunpack.c.l.bf16 %v6371_v4 }
  0xb1   : > { %2829 = vmatpush.msrb.mxu0 %v4506_v36  ;;  %2848 = vmatpush.msrb.mxu1 %v4541_v37  ;;  %v421_v36 = vunpack.c.h.bf16 %v381_v15  ;;  %v482_v37 = vmul.f32 0.003921569, %v418_v25  ;;  %v4669_v15 = vunpack.c.l.bf16 %v6355_v1  ;;  %v6353_v25 = vld [vmem:[%s7172_s27 + $0x458] sm:$0xff]  }
  0xb2   : > { %2869 = vmatpush.msrb.mxu2 %v4570_v39  ;;  %2888 = vmatpush.msrb.mxu3 %v4605_v40  ;;  %v4646_v39 = vunpack.c.h.bf16 %v6349_v31  ;;  %v4710_v40 = vunpack.c.h.bf16 %v6365_v32 }
  0xb3   : > { %2830 = vmatpush.msrb.mxu0 %v4505_v42  ;;  %2849 = vmatpush.msrb.mxu1 %v4538_v43  ;;  %v4521_v42 = vunpack.c.l.bf16 %v6318_v21  ;;  %v4585_v43 = vunpack.c.l.bf16 %v6334_v24  ;;  %v4666_v21 = vunpack.c.h.bf16 %v6354_v13 }
  0xb4   : > { %2870 = vmatpush.msrb.mxu2 %v4569_v45  ;;  %2889 = vmatpush.msrb.mxu3 %v4602_v46  ;;  %v483_v45 = vmul.f32 0.003921569, %v419_v35  ;;  %v485_v46 = vmul.f32 0.003921569, %v421_v36 }
  0xb5   : > { %2831 = vmatpush.msrb.mxu0 %v4502_v48  ;;  %2850 = vmatpush.msrb.mxu1 %v4537_v49  ;;  %v4645_v48 = vunpack.c.l.bf16 %v6349_v31  ;;  %v4678_v49 = vunpack.c.h.bf16 %v6357_v41  ;;  %v6344_v31 = vld [vmem:[%s7172_s27 + $0x410] sm:$0xff]  }
  0xb6   : > { %2871 = vmatpush.msrb.mxu2 %v4566_v51  ;;  %2890 = vmatpush.msrb.mxu3 %v4601_v52  ;;  %v4709_v51 = vunpack.c.l.bf16 %v6365_v32  ;;  %v4742_v52 = vunpack.c.h.bf16 %v6373_v44 }
  0xb7   : > { %2832 = vmatpush.msrb.mxu0 %v4501_v54  ;;  %2851 = vmatpush.msrb.mxu1 %v4534_v55  ;;  %v4642_v54 = vunpack.c.h.bf16 %v6348_v47  ;;  %v4677_v55 = vunpack.c.l.bf16 %v6357_v41 }
  0xb8   : > { %2872 = vmatpush.msrb.mxu2 %v4565_v57  ;;  %2891 = vmatpush.msrb.mxu3 %v4598_v58  ;;  %v4706_v57 = vunpack.c.h.bf16 %v6364_v50  ;;  %v4741_v58 = vunpack.c.l.bf16 %v6373_v44  ;;  %v4625_v44 = vunpack.c.l.bf16 %v6344_v31 }
  0xb9   : > { %2833 = vmatpush.msrb.mxu0 %v4498_v60  ;;  %2852 = vmatpush.msrb.mxu1 %v4533_v61  ;;  %v4641_v60 = vunpack.c.l.bf16 %v6348_v47  ;;  %v4674_v61 = vunpack.c.h.bf16 %v6356_v53 }
  0xba   : > { %2873 = vmatpush.msrb.mxu2 %v4562_v63  ;;  %2892 = vmatpush.msrb.mxu3 %v4597_v0  ;;  %v4705_v63 = vunpack.c.l.bf16 %v6364_v50  ;;  %v4738_v0 = vunpack.c.h.bf16 %v6372_v56 }
  0xbb   : > { %2834 = vmatpush.msrb.mxu0 %v4497_v2  ;;  %2853 = vmatpush.msrb.mxu1 %v4530_v3  ;;  %v4638_v2 = vunpack.c.h.bf16 %v6347_v59  ;;  %v4673_v3 = vunpack.c.l.bf16 %v6356_v53 }
  0xbc   : > { %2874 = vmatpush.msrb.mxu2 %v4561_v5  ;;  %2893 = vmatpush.msrb.mxu3 %v4594_v6  ;;  %v4702_v5 = vunpack.c.h.bf16 %v6363_v62  ;;  %v4737_v6 = vunpack.c.l.bf16 %v6372_v56  ;;  %v382_v56 = vld [vmem:[%s7190_s24 + $0x40] sm:$0xff] }
  0xbd   : > { %2835 = vmatpush.msrb.mxu0 %v4494_v8  ;;  %2854 = vmatpush.msrb.mxu1 %v4529_v9  ;;  %v4637_v8 = vunpack.c.l.bf16 %v6347_v59  ;;  %v4670_v9 = vunpack.c.h.bf16 %v6355_v1 }
  0xbe   : > { %2875 = vmatpush.msrb.mxu2 %v4558_v11  ;;  %2894 = vmatpush.msrb.mxu3 %v4593_v12  ;;  %v4701_v11 = vunpack.c.l.bf16 %v6363_v62  ;;  %v4734_v12 = vunpack.c.h.bf16 %v6371_v4 }
  0xbf   : > { %2836 = vmatpush.msrb.mxu0 %v4493_v16  ;;  %2855 = vmatpush.msrb.mxu1 %v4526_v17  ;;  %v6370_v16 = vld [vmem:[%s7172_s27 + $0x4e0] sm:$0xff]   ;;  %v4698_v17 = vunpack.c.h.bf16 %v6362_v10 }
  0xc0   : > { %2876 = vmatpush.msrb.mxu2 %v4557_v19  ;;  %2895 = vmatpush.msrb.mxu3 %v4590_v20  ;;  %v6345_v19 = vld [vmem:[%s7172_s27 + $0x418] sm:$0xff]   ;;  %v4633_v20 = vunpack.c.l.bf16 %v6346_v7  ;;  %v4730_v24 = vunpack.c.h.bf16 %v6370_v16 }
  0xc1   : > { %2837 = vmatpush.msrb.mxu0 %v4490_v22  ;;  %2856 = vmatpush.msrb.mxu1 %v4525_v23  ;;  %v6361_v22 = vld [vmem:[%s7172_s27 + $0x498] sm:$0xff]   ;;  %v4697_v23 = vunpack.c.l.bf16 %v6362_v10  ;;  %v4630_v26 = vunpack.c.h.bf16 %v6345_v19  ;;  %v4629_v32 = vunpack.c.l.bf16 %v6345_v19 }
  0xc2   : > { %2877 = vmatpush.msrb.mxu2 %v4554_v27  ;;  %2896 = vmatpush.msrb.mxu3 %v4589_v28  ;;  %v4665_v27 = vunpack.c.l.bf16 %v6354_v13  ;;  %v6369_v28 = vld [vmem:[%s7172_s27 + $0x4d8] sm:$0xff]   ;;  %v4693_v35 = vunpack.c.l.bf16 %v6361_v22  ;;  %v423_v13 = vunpack.c.h.bf16 %v382_v56 }
  0xc3   : > { %2838 = vmatpush.msrb.mxu0 %v4489_v29  ;;  %2857 = vmatpush.msrb.mxu1 %v4522_v30  ;;  %v4694_v29 = vunpack.c.h.bf16 %v6361_v22  ;;  %v4729_v30 = vunpack.c.l.bf16 %v6370_v16  ;;  %v4726_v36 = vunpack.c.h.bf16 %v6369_v28  ;;  %v6397_v10 = vld [vmem:[%s7172_s27 + $0x5b8] sm:$0xff]  }
  0xc4   : > { %2878 = vmatpush.msrb.mxu2 %v4553_v33  ;;  %2897 = vmatpush.msrb.mxu3 %v4586_v34  ;;  %v4662_v33 = vunpack.c.h.bf16 %v6353_v25  ;;  %v6360_v34 = vld [vmem:[%s7172_s27 + $0x490] sm:$0xff]   ;;  %v6389_v19 = vld [vmem:[%s7172_s27 + $0x578] sm:$0xff]  }
  0xc5   : > { %2839 = vmatmul.f32.vlgmr.msrb.gmra.mxu0 %v482_v37  ;;  %2879 = vmatmul.f32.vlgmr.msrb.gmra.mxu2 %v484_v38  ;;  %v6352_v37 = vld [vmem:[%s7172_s27 + $0x450] sm:$0xff]   ;;  %v4626_v38 = vunpack.c.h.bf16 %v6344_v31  ;;  %v4690_v41 = vunpack.c.h.bf16 %v6360_v34  ;;  %v4689_v47 = vunpack.c.l.bf16 %v6360_v34  ;;  %v6405_v22 = vld [vmem:[%s7172_s27 + $0x5f8] sm:$0xff]  }
  0xc6   : > { %2903 = vmatpush.msra.mxu0 %v4646_v39  ;;  %2943 = vmatpush.msra.mxu2 %v4710_v40  ;;  %v4661_v39 = vunpack.c.l.bf16 %v6353_v25  ;;  %v6368_v40 = vld [vmem:[%s7172_s27 + $0x4d0] sm:$0xff]  }
  0xc7   : > { %2858 = vmatpush.msrb.mxu1 %v4521_v42  ;;  %2898 = vmatpush.msrb.mxu3 %v4585_v43  ;;  %v4725_v42 = vunpack.c.l.bf16 %v6369_v28  ;;  %v6343_v43 = vld [vmem:[%s7172_s27 + $0x408] sm:$0xff]   ;;  %v6380_v25 = vld [vmem:[%s7172_s27 + $0x530] sm:$0xff]  }
  0xc8   : > { %2859 = vmatmul.f32.vlgmr.msrb.gmra.mxu1 %v483_v45  ;;  %2899 = vmatmul.f32.vlgmr.msrb.gmra.mxu3 %v485_v46  ;;  %v4658_v45 = vunpack.c.h.bf16 %v6352_v37  ;;  %v6359_v46 = vld [vmem:[%s7172_s27 + $0x488] sm:$0xff]   ;;  %v4622_v50 = vunpack.c.h.bf16 %v6343_v43  ;;  %v6396_v28 = vld [vmem:[%s7172_s27 + $0x5b0] sm:$0xff]  }
  0xc9   : > { %2904 = vmatpush.msra.mxu0 %v4645_v48  ;;  %2923 = vmatpush.msra.mxu1 %v4678_v49  ;;  %v4722_v48 = vunpack.c.h.bf16 %v6368_v40  ;;  %v6351_v49 = vld [vmem:[%s7172_s27 + $0x448] sm:$0xff]   ;;  %v4686_v53 = vunpack.c.h.bf16 %v6359_v46  ;;  %v6388_v31 = vld [vmem:[%s7172_s27 + $0x570] sm:$0xff]  }
  0xca   : > { %2944 = vmatpush.msra.mxu2 %v4709_v51  ;;  %2963 = vmatpush.msra.mxu3 %v4742_v52  ;;  %v4657_v51 = vunpack.c.l.bf16 %v6352_v37  ;;  %v6367_v52 = vld [vmem:[%s7172_s27 + $0x4c8] sm:$0xff]   ;;  %v4654_v59 = vunpack.c.h.bf16 %v6351_v49  ;;  %v4653_v1 = vunpack.c.l.bf16 %v6351_v49  ;;  %v6404_v34 = vld [vmem:[%s7172_s27 + $0x5f0] sm:$0xff]   ;;  %v6378_v49 = vld [vmem:[%s7172_s27 + $0x520] sm:$0xff]  }
  0xcb   : > { %2905 = vmatpush.msra.mxu0 %v4642_v54  ;;  %2924 = vmatpush.msra.mxu1 %v4677_v55  ;;  %v4721_v54 = vunpack.c.l.bf16 %v6368_v40  ;;  %v6342_v55 = vld [vmem:[%s7172_s27 + $0x400] sm:$0xff]   ;;  %v4718_v62 = vunpack.c.h.bf16 %v6367_v52  ;;  %v6379_v37 = vld [vmem:[%s7172_s27 + $0x528] sm:$0xff]  }
  0xcc   : > { %2945 = vmatpush.msra.mxu2 %v4706_v57  ;;  %2964 = vmatpush.msra.mxu3 %v4741_v58  ;;  %v383_v57 = vld [vmem:[%s7190_s24 + $0x48] sm:$0xff]  ;;  %v4621_v58 = vunpack.c.l.bf16 %v6343_v43  ;;  %v4617_v7 = vunpack.c.l.bf16 %v6342_v55  ;;  %v6395_v40 = vld [vmem:[%s7172_s27 + $0x5a8] sm:$0xff]  }
  0xcd   : > { %2906 = vmatpush.msra.mxu0 %v4641_v60  ;;  %2925 = vmatpush.msra.mxu1 %v4674_v61  ;;  %v6358_v60 = vld [vmem:[%s7172_s27 + $0x480] sm:$0xff]   ;;  %v4685_v61 = vunpack.c.l.bf16 %v6359_v46  ;;  %v424_v4 = vunpack.c.l.bf16 %v383_v57  ;;  %v6387_v43 = vld [vmem:[%s7172_s27 + $0x568] sm:$0xff]  }
  0xce   : > { %2946 = vmatpush.msra.mxu2 %v4705_v63  ;;  %2965 = vmatpush.msra.mxu3 %v4738_v0  ;;  %v6350_v63 = vld [vmem:[%s7172_s27 + $0x440] sm:$0xff]   ;;  %v4618_v0 = vunpack.c.h.bf16 %v6342_v55  ;;  %v6403_v46 = vld [vmem:[%s7172_s27 + $0x5e8] sm:$0xff]  }
  0xcf   : > { %2907 = vmatpush.msra.mxu0 %v4638_v2  ;;  %2926 = vmatpush.msra.mxu1 %v4673_v3  ;;  %v6366_v2 = vld [vmem:[%s7172_s27 + $0x4c0] sm:$0xff]   ;;  %v422_v3 = vunpack.c.l.bf16 %v382_v56  ;;  %v488_v16 = vmul.f32 0.003921569, %v424_v4  ;;  %v4762_v56 = vunpack.c.h.bf16 %v6378_v49 }
  0xd0   : > { %2947 = vmatpush.msra.mxu2 %v4702_v5  ;;  %2966 = vmatpush.msra.mxu3 %v4737_v6  ;;  %v4682_v5 = vunpack.c.h.bf16 %v6358_v60  ;;  %v4717_v6 = vunpack.c.l.bf16 %v6367_v52  ;;  %v6394_v52 = vld [vmem:[%s7172_s27 + $0x5a0] sm:$0xff]  }
  0xd1   : > { %2908 = vmatpush.msra.mxu0 %v4637_v8  ;;  %2927 = vmatpush.msra.mxu1 %v4670_v9  ;;  %v4650_v8 = vunpack.c.h.bf16 %v6350_v63  ;;  %v6381_v9 = vld [vmem:[%s7172_s27 + $0x538] sm:$0xff]   ;;  %v6386_v55 = vld [vmem:[%s7172_s27 + $0x560] sm:$0xff]  }
  0xd2   : > { %2948 = vmatpush.msra.mxu2 %v4701_v11  ;;  %2967 = vmatpush.msra.mxu3 %v4734_v12  ;;  %v4681_v11 = vunpack.c.l.bf16 %v6358_v60  ;;  %v4714_v12 = vunpack.c.h.bf16 %v6366_v2  ;;  %v4861_v60 = vunpack.c.l.bf16 %v6403_v46 }
  0xd3   : > { %2909 = vmatpush.msra.mxu0 %v4634_v14  ;;  %2928 = vmatpush.msra.mxu1 %v4669_v15  ;;  %v425_v14 = vunpack.c.h.bf16 %v383_v57  ;;  %v486_v15 = vmul.f32 0.003921569, %v422_v3  ;;  %v4797_v57 = vunpack.c.l.bf16 %v6387_v43  ;;  %v6385_v3 = vld [vmem:[%s7172_s27 + $0x558] sm:$0xff]  }
  0xd4   : > { %2949 = vmatpush.msra.mxu2 %v4698_v17  ;;  %2968 = vmatpush.msra.mxu3 %v4733_v18  ;;  %v4774_v17 = vunpack.c.h.bf16 %v6381_v9  ;;  %v4838_v18 = vunpack.c.h.bf16 %v6397_v10 }
  0xd5   : > { %2910 = vmatpush.msra.mxu0 %v4633_v20  ;;  %2929 = vmatpush.msra.mxu1 %v4666_v21  ;;  %v4649_v20 = vunpack.c.l.bf16 %v6350_v63  ;;  %v4713_v21 = vunpack.c.l.bf16 %v6366_v2  ;;  %v4794_v63 = vunpack.c.h.bf16 %v6386_v55 }
  0xd6   : > { %2950 = vmatpush.msra.mxu2 %v4697_v23  ;;  %2969 = vmatpush.msra.mxu3 %v4730_v24  ;;  %v487_v23 = vmul.f32 0.003921569, %v423_v13  ;;  %v489_v24 = vmul.f32 0.003921569, %v425_v14 }
  0xd7   : > { %2911 = vmatpush.msra.mxu0 %v4630_v26  ;;  %2930 = vmatpush.msra.mxu1 %v4665_v27  ;;  %v4773_v26 = vunpack.c.l.bf16 %v6381_v9  ;;  %v4806_v27 = vunpack.c.h.bf16 %v6389_v19  ;;  %v6376_v9 = vld [vmem:[%s7172_s27 + $0x510] sm:$0xff]  }
  0xd8   : > { %2951 = vmatpush.msra.mxu2 %v4694_v29  ;;  %2970 = vmatpush.msra.mxu3 %v4729_v30  ;;  %v4837_v29 = vunpack.c.l.bf16 %v6397_v10  ;;  %v4870_v30 = vunpack.c.h.bf16 %v6405_v22 }
  0xd9   : > { %2912 = vmatpush.msra.mxu0 %v4629_v32  ;;  %2931 = vmatpush.msra.mxu1 %v4662_v33  ;;  %v4770_v32 = vunpack.c.h.bf16 %v6380_v25  ;;  %v4805_v33 = vunpack.c.l.bf16 %v6389_v19 }
  0xda   : > { %2952 = vmatpush.msra.mxu2 %v4693_v35  ;;  %2971 = vmatpush.msra.mxu3 %v4726_v36  ;;  %v4834_v35 = vunpack.c.h.bf16 %v6396_v28  ;;  %v4869_v36 = vunpack.c.l.bf16 %v6405_v22  ;;  %v4753_v22 = vunpack.c.l.bf16 %v6376_v9 }
  0xdb   : > { %2913 = vmatpush.msra.mxu0 %v4626_v38  ;;  %2932 = vmatpush.msra.mxu1 %v4661_v39  ;;  %v4769_v38 = vunpack.c.l.bf16 %v6380_v25  ;;  %v4802_v39 = vunpack.c.h.bf16 %v6388_v31 }
  0xdc   : > { %2953 = vmatpush.msra.mxu2 %v4690_v41  ;;  %2972 = vmatpush.msra.mxu3 %v4725_v42  ;;  %v4833_v41 = vunpack.c.l.bf16 %v6396_v28  ;;  %v4866_v42 = vunpack.c.h.bf16 %v6404_v34 }
  0xdd   : > { %2914 = vmatpush.msra.mxu0 %v4625_v44  ;;  %2933 = vmatpush.msra.mxu1 %v4658_v45  ;;  %v4766_v44 = vunpack.c.h.bf16 %v6379_v37  ;;  %v4801_v45 = vunpack.c.l.bf16 %v6388_v31 }
  0xde   : > { %2954 = vmatpush.msra.mxu2 %v4689_v47  ;;  %2973 = vmatpush.msra.mxu3 %v4722_v48  ;;  %v4830_v47 = vunpack.c.h.bf16 %v6395_v40  ;;  %v4865_v48 = vunpack.c.l.bf16 %v6404_v34  ;;  %v384_v34 = vld [vmem:[%s7190_s24 + $0x50] sm:$0xff] }
  0xdf   : > { %2915 = vmatpush.msra.mxu0 %v4622_v50  ;;  %2934 = vmatpush.msra.mxu1 %v4657_v51  ;;  %v4765_v50 = vunpack.c.l.bf16 %v6379_v37  ;;  %v4798_v51 = vunpack.c.h.bf16 %v6387_v43 }
  0xe0   : > { %2955 = vmatpush.msra.mxu2 %v4686_v53  ;;  %2974 = vmatpush.msra.mxu3 %v4721_v54  ;;  %v4829_v53 = vunpack.c.l.bf16 %v6395_v40  ;;  %v4862_v54 = vunpack.c.h.bf16 %v6403_v46 }
  0xe1   : > { %2916 = vmatpush.msra.mxu0 %v4621_v58  ;;  %2935 = vmatpush.msra.mxu1 %v4654_v59  ;;  %v6402_v58 = vld [vmem:[%s7172_s27 + $0x5e0] sm:$0xff]   ;;  %v4826_v59 = vunpack.c.h.bf16 %v6394_v52 }
  0xe2   : > { %2956 = vmatpush.msra.mxu2 %v4685_v61  ;;  %2975 = vmatpush.msra.mxu3 %v4718_v62  ;;  %v6377_v61 = vld [vmem:[%s7172_s27 + $0x518] sm:$0xff]   ;;  %v4761_v62 = vunpack.c.l.bf16 %v6378_v49  ;;  %v4858_v2 = vunpack.c.h.bf16 %v6402_v58 }
  0xe3   : > { %2917 = vmatpush.msra.mxu0 %v4618_v0  ;;  %2936 = vmatpush.msra.mxu1 %v4653_v1  ;;  %v6393_v0 = vld [vmem:[%s7172_s27 + $0x598] sm:$0xff]   ;;  %v4825_v1 = vunpack.c.l.bf16 %v6394_v52  ;;  %v4758_v4 = vunpack.c.h.bf16 %v6377_v61  ;;  %v4757_v10 = vunpack.c.l.bf16 %v6377_v61 }
  0xe4   : > { %2957 = vmatpush.msra.mxu2 %v4682_v5  ;;  %2976 = vmatpush.msra.mxu3 %v4717_v6  ;;  %v4793_v5 = vunpack.c.l.bf16 %v6386_v55  ;;  %v6401_v6 = vld [vmem:[%s7172_s27 + $0x5d8] sm:$0xff]   ;;  %v4821_v13 = vunpack.c.l.bf16 %v6393_v0  ;;  %v427_v55 = vunpack.c.h.bf16 %v384_v34 }
  0xe5   : > { %2918 = vmatpush.msra.mxu0 %v4617_v7  ;;  %2937 = vmatpush.msra.mxu1 %v4650_v8  ;;  %v4822_v7 = vunpack.c.h.bf16 %v6393_v0  ;;  %v4857_v8 = vunpack.c.l.bf16 %v6402_v58  ;;  %v4854_v14 = vunpack.c.h.bf16 %v6401_v6  ;;  %v6429_v52 = vld [vmem:[%s7172_s27 + $0x6b8] sm:$0xff]  }
  0xe6   : > { %2958 = vmatpush.msra.mxu2 %v4681_v11  ;;  %2977 = vmatpush.msra.mxu3 %v4714_v12  ;;  %v4790_v11 = vunpack.c.h.bf16 %v6385_v3  ;;  %v6392_v12 = vld [vmem:[%s7172_s27 + $0x590] sm:$0xff]   ;;  %v6421_v61 = vld [vmem:[%s7172_s27 + $0x678] sm:$0xff]  }
  0xe7   : > { %2919 = vmatmul.f32.vlgmr.msra.gmra.mxu0 %v486_v15  ;;  %2959 = vmatmul.f32.vlgmr.msra.gmra.mxu2 %v488_v16  ;;  %v6384_v15 = vld [vmem:[%s7172_s27 + $0x550] sm:$0xff]   ;;  %v4754_v16 = vunpack.c.h.bf16 %v6376_v9  ;;  %v4818_v19 = vunpack.c.h.bf16 %v6392_v12  ;;  %v4817_v25 = vunpack.c.l.bf16 %v6392_v12  ;;  %v6437_v0 = vld [vmem:[%s7172_s27 + $0x6f8] sm:$0xff]  }
  0xe8   : > { %2983 = vmatpush.msrb.mxu0 %v4774_v17  ;;  %3023 = vmatpush.msrb.mxu2 %v4838_v18  ;;  %v4789_v17 = vunpack.c.l.bf16 %v6385_v3  ;;  %v6400_v18 = vld [vmem:[%s7172_s27 + $0x5d0] sm:$0xff]  }
  0xe9   : > { %2938 = vmatpush.msra.mxu1 %v4649_v20  ;;  %2978 = vmatpush.msra.mxu3 %v4713_v21  ;;  %v4853_v20 = vunpack.c.l.bf16 %v6401_v6  ;;  %v6375_v21 = vld [vmem:[%s7172_s27 + $0x508] sm:$0xff]   ;;  %v6412_v3 = vld [vmem:[%s7172_s27 + $0x630] sm:$0xff]  }
  0xea   : > { %2939 = vmatmul.f32.vlgmr.msra.gmra.mxu1 %v487_v23  ;;  %2979 = vmatmul.f32.vlgmr.msra.gmra.mxu3 %v489_v24  ;;  %v4786_v23 = vunpack.c.h.bf16 %v6384_v15  ;;  %v6391_v24 = vld [vmem:[%s7172_s27 + $0x588] sm:$0xff]   ;;  %v4750_v28 = vunpack.c.h.bf16 %v6375_v21  ;;  %v6428_v6 = vld [vmem:[%s7172_s27 + $0x6b0] sm:$0xff]  }
  0xeb   : > { %2984 = vmatpush.msrb.mxu0 %v4773_v26  ;;  %3003 = vmatpush.msrb.mxu1 %v4806_v27  ;;  %v4850_v26 = vunpack.c.h.bf16 %v6400_v18  ;;  %v6383_v27 = vld [vmem:[%s7172_s27 + $0x548] sm:$0xff]   ;;  %v4814_v31 = vunpack.c.h.bf16 %v6391_v24  ;;  %v6420_v9 = vld [vmem:[%s7172_s27 + $0x670] sm:$0xff]  }
  0xec   : > { %3024 = vmatpush.msrb.mxu2 %v4837_v29  ;;  %3043 = vmatpush.msrb.mxu3 %v4870_v30  ;;  %v4785_v29 = vunpack.c.l.bf16 %v6384_v15  ;;  %v6399_v30 = vld [vmem:[%s7172_s27 + $0x5c8] sm:$0xff]   ;;  %v4782_v37 = vunpack.c.h.bf16 %v6383_v27  ;;  %v4781_v43 = vunpack.c.l.bf16 %v6383_v27  ;;  %v6436_v12 = vld [vmem:[%s7172_s27 + $0x6f0] sm:$0xff]   ;;  %v6410_v27 = vld [vmem:[%s7172_s27 + $0x620] sm:$0xff]  }
  0xed   : > { %2985 = vmatpush.msrb.mxu0 %v4770_v32  ;;  %3004 = vmatpush.msrb.mxu1 %v4805_v33  ;;  %v4849_v32 = vunpack.c.l.bf16 %v6400_v18  ;;  %v6374_v33 = vld [vmem:[%s7172_s27 + $0x500] sm:$0xff]   ;;  %v4846_v40 = vunpack.c.h.bf16 %v6399_v30  ;;  %v6411_v15 = vld [vmem:[%s7172_s27 + $0x628] sm:$0xff]  }
  0xee   : > { %3025 = vmatpush.msrb.mxu2 %v4834_v35  ;;  %3044 = vmatpush.msrb.mxu3 %v4869_v36  ;;  %v385_v35 = vld [vmem:[%s7190_s24 + $0x58] sm:$0xff]  ;;  %v4749_v36 = vunpack.c.l.bf16 %v6375_v21  ;;  %v4745_v49 = vunpack.c.l.bf16 %v6374_v33  ;;  %v6427_v18 = vld [vmem:[%s7172_s27 + $0x6a8] sm:$0xff]  }
  0xef   : > { %2986 = vmatpush.msrb.mxu0 %v4769_v38  ;;  %3005 = vmatpush.msrb.mxu1 %v4802_v39  ;;  %v6390_v38 = vld [vmem:[%s7172_s27 + $0x580] sm:$0xff]   ;;  %v4813_v39 = vunpack.c.l.bf16 %v6391_v24  ;;  %v428_v46 = vunpack.c.l.bf16 %v385_v35  ;;  %v6419_v21 = vld [vmem:[%s7172_s27 + $0x668] sm:$0xff]  }
  0xf0   : > { %3026 = vmatpush.msrb.mxu2 %v4833_v41  ;;  %3045 = vmatpush.msrb.mxu3 %v4866_v42  ;;  %v6382_v41 = vld [vmem:[%s7172_s27 + $0x540] sm:$0xff]   ;;  %v4746_v42 = vunpack.c.h.bf16 %v6374_v33  ;;  %v6435_v24 = vld [vmem:[%s7172_s27 + $0x6e8] sm:$0xff]  }
  0xf1   : > { %2987 = vmatpush.msrb.mxu0 %v4766_v44  ;;  %3006 = vmatpush.msrb.mxu1 %v4801_v45  ;;  %v6398_v44 = vld [vmem:[%s7172_s27 + $0x5c0] sm:$0xff]   ;;  %v426_v45 = vunpack.c.l.bf16 %v384_v34  ;;  %v492_v58 = vmul.f32 0.003921569, %v428_v46  ;;  %v4890_v34 = vunpack.c.h.bf16 %v6410_v27 }
  0xf2   : > { %3027 = vmatpush.msrb.mxu2 %v4830_v47  ;;  %3046 = vmatpush.msrb.mxu3 %v4865_v48  ;;  %v4810_v47 = vunpack.c.h.bf16 %v6390_v38  ;;  %v4845_v48 = vunpack.c.l.bf16 %v6399_v30  ;;  %v6426_v30 = vld [vmem:[%s7172_s27 + $0x6a0] sm:$0xff]  }
  0xf3   : > { %2988 = vmatpush.msrb.mxu0 %v4765_v50  ;;  %3007 = vmatpush.msrb.mxu1 %v4798_v51  ;;  %v4778_v50 = vunpack.c.h.bf16 %v6382_v41  ;;  %v6413_v51 = vld [vmem:[%s7172_s27 + $0x638] sm:$0xff]   ;;  %v6418_v33 = vld [vmem:[%s7172_s27 + $0x660] sm:$0xff]  }
  0xf4   : > { %3028 = vmatpush.msrb.mxu2 %v4829_v53  ;;  %3047 = vmatpush.msrb.mxu3 %v4862_v54  ;;  %v4809_v53 = vunpack.c.l.bf16 %v6390_v38  ;;  %v4842_v54 = vunpack.c.h.bf16 %v6398_v44  ;;  %v4989_v38 = vunpack.c.l.bf16 %v6435_v24 }
  0xf5   : > { %2989 = vmatpush.msrb.mxu0 %v4762_v56  ;;  %3008 = vmatpush.msrb.mxu1 %v4797_v57  ;;  %v429_v56 = vunpack.c.h.bf16 %v385_v35  ;;  %v490_v57 = vmul.f32 0.003921569, %v426_v45  ;;  %v4925_v35 = vunpack.c.l.bf16 %v6419_v21  ;;  %v6417_v45 = vld [vmem:[%s7172_s27 + $0x658] sm:$0xff]  }
  0xf6   : > { %3029 = vmatpush.msrb.mxu2 %v4826_v59  ;;  %3048 = vmatpush.msrb.mxu3 %v4861_v60  ;;  %v4902_v59 = vunpack.c.h.bf16 %v6413_v51  ;;  %v4966_v60 = vunpack.c.h.bf16 %v6429_v52 }
  0xf7   : > { %2990 = vmatpush.msrb.mxu0 %v4761_v62  ;;  %3009 = vmatpush.msrb.mxu1 %v4794_v63  ;;  %v4777_v62 = vunpack.c.l.bf16 %v6382_v41  ;;  %v4841_v63 = vunpack.c.l.bf16 %v6398_v44  ;;  %v4922_v41 = vunpack.c.h.bf16 %v6418_v33 }
  0xf8   : > { %3030 = vmatpush.msrb.mxu2 %v4825_v1  ;;  %3049 = vmatpush.msrb.mxu3 %v4858_v2  ;;  %v491_v1 = vmul.f32 0.003921569, %v427_v55  ;;  %v493_v2 = vmul.f32 0.003921569, %v429_v56 }
  0xf9   : > { %2991 = vmatpush.msrb.mxu0 %v4758_v4  ;;  %3010 = vmatpush.msrb.mxu1 %v4793_v5  ;;  %v4901_v4 = vunpack.c.l.bf16 %v6413_v51  ;;  %v4934_v5 = vunpack.c.h.bf16 %v6421_v61  ;;  %v6408_v51 = vld [vmem:[%s7172_s27 + $0x610] sm:$0xff]  }
  0xfa   : > { %3031 = vmatpush.msrb.mxu2 %v4822_v7  ;;  %3050 = vmatpush.msrb.mxu3 %v4857_v8  ;;  %v4965_v7 = vunpack.c.l.bf16 %v6429_v52  ;;  %v4998_v8 = vunpack.c.h.bf16 %v6437_v0 }
  0xfb   : > { %2992 = vmatpush.msrb.mxu0 %v4757_v10  ;;  %3011 = vmatpush.msrb.mxu1 %v4790_v11  ;;  %v4898_v10 = vunpack.c.h.bf16 %v6412_v3  ;;  %v4933_v11 = vunpack.c.l.bf16 %v6421_v61 }
  0xfc   : > { %3032 = vmatpush.msrb.mxu2 %v4821_v13  ;;  %3051 = vmatpush.msrb.mxu3 %v4854_v14  ;;  %v4962_v13 = vunpack.c.h.bf16 %v6428_v6  ;;  %v4997_v14 = vunpack.c.l.bf16 %v6437_v0  ;;  %v4881_v0 = vunpack.c.l.bf16 %v6408_v51 }
  0xfd   : > { %2993 = vmatpush.msrb.mxu0 %v4754_v16  ;;  %3012 = vmatpush.msrb.mxu1 %v4789_v17  ;;  %v4897_v16 = vunpack.c.l.bf16 %v6412_v3  ;;  %v4930_v17 = vunpack.c.h.bf16 %v6420_v9 }
  0xfe   : > { %3033 = vmatpush.msrb.mxu2 %v4818_v19  ;;  %3052 = vmatpush.msrb.mxu3 %v4853_v20  ;;  %v4961_v19 = vunpack.c.l.bf16 %v6428_v6  ;;  %v4994_v20 = vunpack.c.h.bf16 %v6436_v12 }
  0xff   : > { %2994 = vmatpush.msrb.mxu0 %v4753_v22  ;;  %3013 = vmatpush.msrb.mxu1 %v4786_v23  ;;  %v4894_v22 = vunpack.c.h.bf16 %v6411_v15  ;;  %v4929_v23 = vunpack.c.l.bf16 %v6420_v9 }
 0x100   : > { %3034 = vmatpush.msrb.mxu2 %v4817_v25  ;;  %3053 = vmatpush.msrb.mxu3 %v4850_v26  ;;  %v4958_v25 = vunpack.c.h.bf16 %v6427_v18  ;;  %v4993_v26 = vunpack.c.l.bf16 %v6436_v12  ;;  %v386_v12 = vld [vmem:[%s7190_s24 + $0x60] sm:$0xff] }
 0x101   : > { %2995 = vmatpush.msrb.mxu0 %v4750_v28  ;;  %3014 = vmatpush.msrb.mxu1 %v4785_v29  ;;  %v4893_v28 = vunpack.c.l.bf16 %v6411_v15  ;;  %v4926_v29 = vunpack.c.h.bf16 %v6419_v21 }
 0x102   : > { %3035 = vmatpush.msrb.mxu2 %v4814_v31  ;;  %3054 = vmatpush.msrb.mxu3 %v4849_v32  ;;  %v4957_v31 = vunpack.c.l.bf16 %v6427_v18  ;;  %v4990_v32 = vunpack.c.h.bf16 %v6435_v24 }
 0x103   : > { %2996 = vmatpush.msrb.mxu0 %v4749_v36  ;;  %3015 = vmatpush.msrb.mxu1 %v4782_v37  ;;  %v6434_v36 = vld [vmem:[%s7172_s27 + $0x6e0] sm:$0xff]   ;;  %v4954_v37 = vunpack.c.h.bf16 %v6426_v30 }
 0x104   : > { %3036 = vmatpush.msrb.mxu2 %v4813_v39  ;;  %3055 = vmatpush.msrb.mxu3 %v4846_v40  ;;  %v6409_v39 = vld [vmem:[%s7172_s27 + $0x618] sm:$0xff]   ;;  %v4889_v40 = vunpack.c.l.bf16 %v6410_v27  ;;  %v4986_v44 = vunpack.c.h.bf16 %v6434_v36 }
 0x105   : > { %2997 = vmatpush.msrb.mxu0 %v4746_v42  ;;  %3016 = vmatpush.msrb.mxu1 %v4781_v43  ;;  %v6425_v42 = vld [vmem:[%s7172_s27 + $0x698] sm:$0xff]   ;;  %v4953_v43 = vunpack.c.l.bf16 %v6426_v30  ;;  %v4886_v46 = vunpack.c.h.bf16 %v6409_v39  ;;  %v4885_v52 = vunpack.c.l.bf16 %v6409_v39 }
 0x106   : > { %3037 = vmatpush.msrb.mxu2 %v4810_v47  ;;  %3056 = vmatpush.msrb.mxu3 %v4845_v48  ;;  %v4921_v47 = vunpack.c.l.bf16 %v6418_v33  ;;  %v6433_v48 = vld [vmem:[%s7172_s27 + $0x6d8] sm:$0xff]   ;;  %v4949_v55 = vunpack.c.l.bf16 %v6425_v42  ;;  %v431_v33 = vunpack.c.h.bf16 %v386_v12 }
 0x107   : > { %2998 = vmatpush.msrb.mxu0 %v4745_v49  ;;  %3017 = vmatpush.msrb.mxu1 %v4778_v50  ;;  %v4950_v49 = vunpack.c.h.bf16 %v6425_v42  ;;  %v4985_v50 = vunpack.c.l.bf16 %v6434_v36  ;;  %v4982_v56 = vunpack.c.h.bf16 %v6433_v48  ;;  %v6461_v30 = vld [vmem:[%s7172_s27 + $0x7b8] sm:$0xff]  }
 0x108   : > { %3038 = vmatpush.msrb.mxu2 %v4809_v53  ;;  %3057 = vmatpush.msrb.mxu3 %v4842_v54  ;;  %v4918_v53 = vunpack.c.h.bf16 %v6417_v45  ;;  %v6424_v54 = vld [vmem:[%s7172_s27 + $0x690] sm:$0xff]   ;;  %v6453_v39 = vld [vmem:[%s7172_s27 + $0x778] sm:$0xff]  }
 0x109   : > { %2999 = vmatmul.f32.vlgmr.msrb.gmra.mxu0 %v490_v57  ;;  %3039 = vmatmul.f32.vlgmr.msrb.gmra.mxu2 %v492_v58  ;;  %v6416_v57 = vld [vmem:[%s7172_s27 + $0x650] sm:$0xff]   ;;  %v4882_v58 = vunpack.c.h.bf16 %v6408_v51  ;;  %v4946_v61 = vunpack.c.h.bf16 %v6424_v54  ;;  %v4945_v3 = vunpack.c.l.bf16 %v6424_v54  ;;  %v6469_v42 = vld [vmem:[%s7172_s27 + $0x7f8] sm:$0xff]  }
 0x10a   : > { %3063 = vmatpush.msra.mxu0 %v4902_v59  ;;  %3103 = vmatpush.msra.mxu2 %v4966_v60  ;;  %v4917_v59 = vunpack.c.l.bf16 %v6417_v45  ;;  %v6432_v60 = vld [vmem:[%s7172_s27 + $0x6d0] sm:$0xff]  }
 0x10b   : > { %3018 = vmatpush.msrb.mxu1 %v4777_v62  ;;  %3058 = vmatpush.msrb.mxu3 %v4841_v63  ;;  %v4981_v62 = vunpack.c.l.bf16 %v6433_v48  ;;  %v6407_v63 = vld [vmem:[%s7172_s27 + $0x608] sm:$0xff]   ;;  %v6444_v45 = vld [vmem:[%s7172_s27 + $0x730] sm:$0xff]  }
 0x10c   : > { %3019 = vmatmul.f32.vlgmr.msrb.gmra.mxu1 %v491_v1  ;;  %3059 = vmatmul.f32.vlgmr.msrb.gmra.mxu3 %v493_v2  ;;  %v4914_v1 = vunpack.c.h.bf16 %v6416_v57  ;;  %v6423_v2 = vld [vmem:[%s7172_s27 + $0x688] sm:$0xff]   ;;  %v4878_v6 = vunpack.c.h.bf16 %v6407_v63  ;;  %v6460_v48 = vld [vmem:[%s7172_s27 + $0x7b0] sm:$0xff]  }
 0x10d   : > { %3064 = vmatpush.msra.mxu0 %v4901_v4  ;;  %3083 = vmatpush.msra.mxu1 %v4934_v5  ;;  %v4978_v4 = vunpack.c.h.bf16 %v6432_v60  ;;  %v6415_v5 = vld [vmem:[%s7172_s27 + $0x648] sm:$0xff]   ;;  %v4942_v9 = vunpack.c.h.bf16 %v6423_v2  ;;  %v6452_v51 = vld [vmem:[%s7172_s27 + $0x770] sm:$0xff]  }
 0x10e   : > { %3104 = vmatpush.msra.mxu2 %v4965_v7  ;;  %3123 = vmatpush.msra.mxu3 %v4998_v8  ;;  %v4913_v7 = vunpack.c.l.bf16 %v6416_v57  ;;  %v6431_v8 = vld [vmem:[%s7172_s27 + $0x6c8] sm:$0xff]   ;;  %v4910_v15 = vunpack.c.h.bf16 %v6415_v5  ;;  %v4909_v21 = vunpack.c.l.bf16 %v6415_v5  ;;  %v6468_v54 = vld [vmem:[%s7172_s27 + $0x7f0] sm:$0xff]   ;;  %v6442_v5 = vld [vmem:[%s7172_s27 + $0x720] sm:$0xff]  }
 0x10f   : > { %3065 = vmatpush.msra.mxu0 %v4898_v10  ;;  %3084 = vmatpush.msra.mxu1 %v4933_v11  ;;  %v4977_v10 = vunpack.c.l.bf16 %v6432_v60  ;;  %v6406_v11 = vld [vmem:[%s7172_s27 + $0x600] sm:$0xff]   ;;  %v4974_v18 = vunpack.c.h.bf16 %v6431_v8  ;;  %v6443_v57 = vld [vmem:[%s7172_s27 + $0x728] sm:$0xff]  }
 0x110   : > { %3105 = vmatpush.msra.mxu2 %v4962_v13  ;;  %3124 = vmatpush.msra.mxu3 %v4997_v14  ;;  %v387_v13 = vld [vmem:[%s7190_s24 + $0x68] sm:$0xff]  ;;  %v4877_v14 = vunpack.c.l.bf16 %v6407_v63  ;;  %v4873_v27 = vunpack.c.l.bf16 %v6406_v11  ;;  %v6459_v60 = vld [vmem:[%s7172_s27 + $0x7a8] sm:$0xff]  }
 0x111   : > { %3066 = vmatpush.msra.mxu0 %v4897_v16  ;;  %3085 = vmatpush.msra.mxu1 %v4930_v17  ;;  %v6422_v16 = vld [vmem:[%s7172_s27 + $0x680] sm:$0xff]   ;;  %v4941_v17 = vunpack.c.l.bf16 %v6423_v2  ;;  %v432_v24 = vunpack.c.l.bf16 %v387_v13  ;;  %v6451_v63 = vld [vmem:[%s7172_s27 + $0x768] sm:$0xff]  }
 0x112   : > { %3106 = vmatpush.msra.mxu2 %v4961_v19  ;;  %3125 = vmatpush.msra.mxu3 %v4994_v20  ;;  %v6414_v19 = vld [vmem:[%s7172_s27 + $0x640] sm:$0xff]   ;;  %v4874_v20 = vunpack.c.h.bf16 %v6406_v11  ;;  %v6467_v2 = vld [vmem:[%s7172_s27 + $0x7e8] sm:$0xff]  }
 0x113   : > { %3067 = vmatpush.msra.mxu0 %v4894_v22  ;;  %3086 = vmatpush.msra.mxu1 %v4929_v23  ;;  %v6430_v22 = vld [vmem:[%s7172_s27 + $0x6c0] sm:$0xff]   ;;  %v430_v23 = vunpack.c.l.bf16 %v386_v12  ;;  %v496_v36 = vmul.f32 0.003921569, %v432_v24  ;;  %v5018_v12 = vunpack.c.h.bf16 %v6442_v5 }
 0x114   : > { %3107 = vmatpush.msra.mxu2 %v4958_v25  ;;  %3126 = vmatpush.msra.mxu3 %v4993_v26  ;;  %v4938_v25 = vunpack.c.h.bf16 %v6422_v16  ;;  %v4973_v26 = vunpack.c.l.bf16 %v6431_v8  ;;  %v6458_v8 = vld [vmem:[%s7172_s27 + $0x7a0] sm:$0xff]  }
 0x115   : > { %3068 = vmatpush.msra.mxu0 %v4893_v28  ;;  %3087 = vmatpush.msra.mxu1 %v4926_v29  ;;  %v4906_v28 = vunpack.c.h.bf16 %v6414_v19  ;;  %v6445_v29 = vld [vmem:[%s7172_s27 + $0x738] sm:$0xff]   ;;  %v6450_v11 = vld [vmem:[%s7172_s27 + $0x760] sm:$0xff]  }
 0x116   : > { %3108 = vmatpush.msra.mxu2 %v4957_v31  ;;  %3127 = vmatpush.msra.mxu3 %v4990_v32  ;;  %v4937_v31 = vunpack.c.l.bf16 %v6422_v16  ;;  %v4970_v32 = vunpack.c.h.bf16 %v6430_v22  ;;  %v5117_v16 = vunpack.c.l.bf16 %v6467_v2 }
 0x117   : > { %3069 = vmatpush.msra.mxu0 %v4890_v34  ;;  %3088 = vmatpush.msra.mxu1 %v4925_v35  ;;  %v433_v34 = vunpack.c.h.bf16 %v387_v13  ;;  %v494_v35 = vmul.f32 0.003921569, %v430_v23  ;;  %v5053_v13 = vunpack.c.l.bf16 %v6451_v63  ;;  %v6449_v23 = vld [vmem:[%s7172_s27 + $0x758] sm:$0xff]  }
 0x118   : > { %3109 = vmatpush.msra.mxu2 %v4954_v37  ;;  %3128 = vmatpush.msra.mxu3 %v4989_v38  ;;  %v5030_v37 = vunpack.c.h.bf16 %v6445_v29  ;;  %v5094_v38 = vunpack.c.h.bf16 %v6461_v30 }
 0x119   : > { %3070 = vmatpush.msra.mxu0 %v4889_v40  ;;  %3089 = vmatpush.msra.mxu1 %v4922_v41  ;;  %v4905_v40 = vunpack.c.l.bf16 %v6414_v19  ;;  %v4969_v41 = vunpack.c.l.bf16 %v6430_v22  ;;  %v5050_v19 = vunpack.c.h.bf16 %v6450_v11 }
 0x11a   : > { %3110 = vmatpush.msra.mxu2 %v4953_v43  ;;  %3129 = vmatpush.msra.mxu3 %v4986_v44  ;;  %v495_v43 = vmul.f32 0.003921569, %v431_v33  ;;  %v497_v44 = vmul.f32 0.003921569, %v433_v34 }
 0x11b   : > { %3071 = vmatpush.msra.mxu0 %v4886_v46  ;;  %3090 = vmatpush.msra.mxu1 %v4921_v47  ;;  %v5029_v46 = vunpack.c.l.bf16 %v6445_v29  ;;  %v5062_v47 = vunpack.c.h.bf16 %v6453_v39  ;;  %v6440_v29 = vld [vmem:[%s7172_s27 + $0x710] sm:$0xff]  }
 0x11c   : > { %3111 = vmatpush.msra.mxu2 %v4950_v49  ;;  %3130 = vmatpush.msra.mxu3 %v4985_v50  ;;  %v5093_v49 = vunpack.c.l.bf16 %v6461_v30  ;;  %v5126_v50 = vunpack.c.h.bf16 %v6469_v42 }
 0x11d   : > { %3072 = vmatpush.msra.mxu0 %v4885_v52  ;;  %3091 = vmatpush.msra.mxu1 %v4918_v53  ;;  %v5026_v52 = vunpack.c.h.bf16 %v6444_v45  ;;  %v5061_v53 = vunpack.c.l.bf16 %v6453_v39 }
 0x11e   : > { %3112 = vmatpush.msra.mxu2 %v4949_v55  ;;  %3131 = vmatpush.msra.mxu3 %v4982_v56  ;;  %v5090_v55 = vunpack.c.h.bf16 %v6460_v48  ;;  %v5125_v56 = vunpack.c.l.bf16 %v6469_v42  ;;  %v5009_v42 = vunpack.c.l.bf16 %v6440_v29 }
 0x11f   : > { %3073 = vmatpush.msra.mxu0 %v4882_v58  ;;  %3092 = vmatpush.msra.mxu1 %v4917_v59  ;;  %v5025_v58 = vunpack.c.l.bf16 %v6444_v45  ;;  %v5058_v59 = vunpack.c.h.bf16 %v6452_v51 }
 0x120   : > { %3113 = vmatpush.msra.mxu2 %v4946_v61  ;;  %3132 = vmatpush.msra.mxu3 %v4981_v62  ;;  %v5089_v61 = vunpack.c.l.bf16 %v6460_v48  ;;  %v5122_v62 = vunpack.c.h.bf16 %v6468_v54 }
 0x121   : > { %3074 = vmatpush.msra.mxu0 %v4881_v0  ;;  %3093 = vmatpush.msra.mxu1 %v4914_v1  ;;  %v5022_v0 = vunpack.c.h.bf16 %v6443_v57  ;;  %v5057_v1 = vunpack.c.l.bf16 %v6452_v51 }
 0x122   : > { %3114 = vmatpush.msra.mxu2 %v4945_v3  ;;  %3133 = vmatpush.msra.mxu3 %v4978_v4  ;;  %v5086_v3 = vunpack.c.h.bf16 %v6459_v60  ;;  %v5121_v4 = vunpack.c.l.bf16 %v6468_v54  ;;  %v388_v54 = vld [vmem:[%s7190_s24 + $0x70] sm:$0xff] }
 0x123   : > { %3075 = vmatpush.msra.mxu0 %v4878_v6  ;;  %3094 = vmatpush.msra.mxu1 %v4913_v7  ;;  %v5021_v6 = vunpack.c.l.bf16 %v6443_v57  ;;  %v5054_v7 = vunpack.c.h.bf16 %v6451_v63 }
 0x124   : > { %3115 = vmatpush.msra.mxu2 %v4942_v9  ;;  %3134 = vmatpush.msra.mxu3 %v4977_v10  ;;  %v5085_v9 = vunpack.c.l.bf16 %v6459_v60  ;;  %v5118_v10 = vunpack.c.h.bf16 %v6467_v2 }
 0x125   : > { %3076 = vmatpush.msra.mxu0 %v4877_v14  ;;  %3095 = vmatpush.msra.mxu1 %v4910_v15  ;;  %v6466_v14 = vld [vmem:[%s7172_s27 + $0x7e0] sm:$0xff]   ;;  %v5082_v15 = vunpack.c.h.bf16 %v6458_v8 }
 0x126   : > { %3116 = vmatpush.msra.mxu2 %v4941_v17  ;;  %3135 = vmatpush.msra.mxu3 %v4974_v18  ;;  %v6441_v17 = vld [vmem:[%s7172_s27 + $0x718] sm:$0xff]   ;;  %v5017_v18 = vunpack.c.l.bf16 %v6442_v5  ;;  %v5114_v22 = vunpack.c.h.bf16 %v6466_v14 }
 0x127   : > { %3077 = vmatpush.msra.mxu0 %v4874_v20  ;;  %3096 = vmatpush.msra.mxu1 %v4909_v21  ;;  %v6457_v20 = vld [vmem:[%s7172_s27 + $0x798] sm:$0xff]   ;;  %v5081_v21 = vunpack.c.l.bf16 %v6458_v8  ;;  %v5014_v24 = vunpack.c.h.bf16 %v6441_v17  ;;  %v5013_v30 = vunpack.c.l.bf16 %v6441_v17 }
 0x128   : > { %3117 = vmatpush.msra.mxu2 %v4938_v25  ;;  %3136 = vmatpush.msra.mxu3 %v4973_v26  ;;  %v5049_v25 = vunpack.c.l.bf16 %v6450_v11  ;;  %v6465_v26 = vld [vmem:[%s7172_s27 + $0x7d8] sm:$0xff]   ;;  %v5077_v33 = vunpack.c.l.bf16 %v6457_v20  ;;  %v435_v11 = vunpack.c.h.bf16 %v388_v54 }
 0x129   : > { %3078 = vmatpush.msra.mxu0 %v4873_v27  ;;  %3097 = vmatpush.msra.mxu1 %v4906_v28  ;;  %v5078_v27 = vunpack.c.h.bf16 %v6457_v20  ;;  %v5113_v28 = vunpack.c.l.bf16 %v6466_v14  ;;  %v5110_v34 = vunpack.c.h.bf16 %v6465_v26  ;;  %v6493_v8 = vld [vmem:[%s7172_s27 + $0x8b8] sm:$0xff]  }
 0x12a   : > { %3118 = vmatpush.msra.mxu2 %v4937_v31  ;;  %3137 = vmatpush.msra.mxu3 %v4970_v32  ;;  %v5046_v31 = vunpack.c.h.bf16 %v6449_v23  ;;  %v6456_v32 = vld [vmem:[%s7172_s27 + $0x790] sm:$0xff]   ;;  %v6485_v17 = vld [vmem:[%s7172_s27 + $0x878] sm:$0xff]  }
 0x12b   : > { %3079 = vmatmul.f32.vlgmr.msra.gmra.mxu0 %v494_v35  ;;  %3119 = vmatmul.f32.vlgmr.msra.gmra.mxu2 %v496_v36  ;;  %v6448_v35 = vld [vmem:[%s7172_s27 + $0x750] sm:$0xff]   ;;  %v5010_v36 = vunpack.c.h.bf16 %v6440_v29  ;;  %v5074_v39 = vunpack.c.h.bf16 %v6456_v32  ;;  %v5073_v45 = vunpack.c.l.bf16 %v6456_v32  ;;  %v6501_v20 = vld [vmem:[%s7172_s27 + $0x8f8] sm:$0xff]  }
 0x12c   : > { %3143 = vmatpush.msrb.mxu0 %v5030_v37  ;;  %3183 = vmatpush.msrb.mxu2 %v5094_v38  ;;  %v5045_v37 = vunpack.c.l.bf16 %v6449_v23  ;;  %v6464_v38 = vld [vmem:[%s7172_s27 + $0x7d0] sm:$0xff]  }
 0x12d   : > { %3098 = vmatpush.msra.mxu1 %v4905_v40  ;;  %3138 = vmatpush.msra.mxu3 %v4969_v41  ;;  %v5109_v40 = vunpack.c.l.bf16 %v6465_v26  ;;  %v6439_v41 = vld [vmem:[%s7172_s27 + $0x708] sm:$0xff]   ;;  %v6476_v23 = vld [vmem:[%s7172_s27 + $0x830] sm:$0xff]  }
 0x12e   : > { %3099 = vmatmul.f32.vlgmr.msra.gmra.mxu1 %v495_v43  ;;  %3139 = vmatmul.f32.vlgmr.msra.gmra.mxu3 %v497_v44  ;;  %v5042_v43 = vunpack.c.h.bf16 %v6448_v35  ;;  %v6455_v44 = vld [vmem:[%s7172_s27 + $0x788] sm:$0xff]   ;;  %v5006_v48 = vunpack.c.h.bf16 %v6439_v41  ;;  %v6492_v26 = vld [vmem:[%s7172_s27 + $0x8b0] sm:$0xff]  }
 0x12f   : > { %3144 = vmatpush.msrb.mxu0 %v5029_v46  ;;  %3163 = vmatpush.msrb.mxu1 %v5062_v47  ;;  %v5106_v46 = vunpack.c.h.bf16 %v6464_v38  ;;  %v6447_v47 = vld [vmem:[%s7172_s27 + $0x748] sm:$0xff]   ;;  %v5070_v51 = vunpack.c.h.bf16 %v6455_v44  ;;  %v6484_v29 = vld [vmem:[%s7172_s27 + $0x870] sm:$0xff]  }
 0x130   : > { %3184 = vmatpush.msrb.mxu2 %v5093_v49  ;;  %3203 = vmatpush.msrb.mxu3 %v5126_v50  ;;  %v5041_v49 = vunpack.c.l.bf16 %v6448_v35  ;;  %v6463_v50 = vld [vmem:[%s7172_s27 + $0x7c8] sm:$0xff]   ;;  %v5038_v57 = vunpack.c.h.bf16 %v6447_v47  ;;  %v5037_v63 = vunpack.c.l.bf16 %v6447_v47  ;;  %v6500_v32 = vld [vmem:[%s7172_s27 + $0x8f0] sm:$0xff]   ;;  %v6474_v47 = vld [vmem:[%s7172_s27 + $0x820] sm:$0xff]  }
 0x131   : > { %3145 = vmatpush.msrb.mxu0 %v5026_v52  ;;  %3164 = vmatpush.msrb.mxu1 %v5061_v53  ;;  %v5105_v52 = vunpack.c.l.bf16 %v6464_v38  ;;  %v6438_v53 = vld [vmem:[%s7172_s27 + $0x700] sm:$0xff]   ;;  %v5102_v60 = vunpack.c.h.bf16 %v6463_v50  ;;  %v6475_v35 = vld [vmem:[%s7172_s27 + $0x828] sm:$0xff]  }
 0x132   : > { %3185 = vmatpush.msrb.mxu2 %v5090_v55  ;;  %3204 = vmatpush.msrb.mxu3 %v5125_v56  ;;  %v389_v55 = vld [vmem:[%s7190_s24 + $0x78] sm:$0xff]  ;;  %v5005_v56 = vunpack.c.l.bf16 %v6439_v41  ;;  %v5001_v5 = vunpack.c.l.bf16 %v6438_v53  ;;  %v6491_v38 = vld [vmem:[%s7172_s27 + $0x8a8] sm:$0xff]  }
 0x133   : > { %3146 = vmatpush.msrb.mxu0 %v5025_v58  ;;  %3165 = vmatpush.msrb.mxu1 %v5058_v59  ;;  %v6454_v58 = vld [vmem:[%s7172_s27 + $0x780] sm:$0xff]   ;;  %v5069_v59 = vunpack.c.l.bf16 %v6455_v44  ;;  %v436_v2 = vunpack.c.l.bf16 %v389_v55  ;;  %v6483_v41 = vld [vmem:[%s7172_s27 + $0x868] sm:$0xff]  }
 0x134   : > { %3186 = vmatpush.msrb.mxu2 %v5089_v61  ;;  %3205 = vmatpush.msrb.mxu3 %v5122_v62  ;;  %v6446_v61 = vld [vmem:[%s7172_s27 + $0x740] sm:$0xff]   ;;  %v5002_v62 = vunpack.c.h.bf16 %v6438_v53  ;;  %v6499_v44 = vld [vmem:[%s7172_s27 + $0x8e8] sm:$0xff]  }
 0x135   : > { %3147 = vmatpush.msrb.mxu0 %v5022_v0  ;;  %3166 = vmatpush.msrb.mxu1 %v5057_v1  ;;  %v6462_v0 = vld [vmem:[%s7172_s27 + $0x7c0] sm:$0xff]   ;;  %v434_v1 = vunpack.c.l.bf16 %v388_v54  ;;  %v500_v14 = vmul.f32 0.003921569, %v436_v2  ;;  %v5146_v54 = vunpack.c.h.bf16 %v6474_v47 }
 0x136   : > { %3187 = vmatpush.msrb.mxu2 %v5086_v3  ;;  %3206 = vmatpush.msrb.mxu3 %v5121_v4  ;;  %v5066_v3 = vunpack.c.h.bf16 %v6454_v58  ;;  %v5101_v4 = vunpack.c.l.bf16 %v6463_v50  ;;  %v6490_v50 = vld [vmem:[%s7172_s27 + $0x8a0] sm:$0xff]  }
 0x137   : > { %3148 = vmatpush.msrb.mxu0 %v5021_v6  ;;  %3167 = vmatpush.msrb.mxu1 %v5054_v7  ;;  %v5034_v6 = vunpack.c.h.bf16 %v6446_v61  ;;  %v6477_v7 = vld [vmem:[%s7172_s27 + $0x838] sm:$0xff]   ;;  %v6482_v53 = vld [vmem:[%s7172_s27 + $0x860] sm:$0xff]  }
 0x138   : > { %3188 = vmatpush.msrb.mxu2 %v5085_v9  ;;  %3207 = vmatpush.msrb.mxu3 %v5118_v10  ;;  %v5065_v9 = vunpack.c.l.bf16 %v6454_v58  ;;  %v5098_v10 = vunpack.c.h.bf16 %v6462_v0  ;;  %v5245_v58 = vunpack.c.l.bf16 %v6499_v44 }
 0x139   : > { %3149 = vmatpush.msrb.mxu0 %v5018_v12  ;;  %3168 = vmatpush.msrb.mxu1 %v5053_v13  ;;  %v437_v12 = vunpack.c.h.bf16 %v389_v55  ;;  %v498_v13 = vmul.f32 0.003921569, %v434_v1  ;;  %v5181_v55 = vunpack.c.l.bf16 %v6483_v41  ;;  %v6481_v1 = vld [vmem:[%s7172_s27 + $0x858] sm:$0xff]  }
 0x13a   : > { %3189 = vmatpush.msrb.mxu2 %v5082_v15  ;;  %3208 = vmatpush.msrb.mxu3 %v5117_v16  ;;  %v5158_v15 = vunpack.c.h.bf16 %v6477_v7  ;;  %v5222_v16 = vunpack.c.h.bf16 %v6493_v8 }
 0x13b   : > { %3150 = vmatpush.msrb.mxu0 %v5017_v18  ;;  %3169 = vmatpush.msrb.mxu1 %v5050_v19  ;;  %v5033_v18 = vunpack.c.l.bf16 %v6446_v61  ;;  %v5097_v19 = vunpack.c.l.bf16 %v6462_v0  ;;  %v5178_v61 = vunpack.c.h.bf16 %v6482_v53 }
 0x13c   : > { %3190 = vmatpush.msrb.mxu2 %v5081_v21  ;;  %3209 = vmatpush.msrb.mxu3 %v5114_v22  ;;  %v499_v21 = vmul.f32 0.003921569, %v435_v11  ;;  %v501_v22 = vmul.f32 0.003921569, %v437_v12 }
 0x13d   : > { %3151 = vmatpush.msrb.mxu0 %v5014_v24  ;;  %3170 = vmatpush.msrb.mxu1 %v5049_v25  ;;  %v5157_v24 = vunpack.c.l.bf16 %v6477_v7  ;;  %v5190_v25 = vunpack.c.h.bf16 %v6485_v17  ;;  %v6472_v7 = vld [vmem:[%s7172_s27 + $0x810] sm:$0xff]  }
 0x13e   : > { %3191 = vmatpush.msrb.mxu2 %v5078_v27  ;;  %3210 = vmatpush.msrb.mxu3 %v5113_v28  ;;  %v5221_v27 = vunpack.c.l.bf16 %v6493_v8  ;;  %v5254_v28 = vunpack.c.h.bf16 %v6501_v20 }
 0x13f   : > { %3152 = vmatpush.msrb.mxu0 %v5013_v30  ;;  %3171 = vmatpush.msrb.mxu1 %v5046_v31  ;;  %v5154_v30 = vunpack.c.h.bf16 %v6476_v23  ;;  %v5189_v31 = vunpack.c.l.bf16 %v6485_v17 }
 0x140   : > { %3192 = vmatpush.msrb.mxu2 %v5077_v33  ;;  %3211 = vmatpush.msrb.mxu3 %v5110_v34  ;;  %v5218_v33 = vunpack.c.h.bf16 %v6492_v26  ;;  %v5253_v34 = vunpack.c.l.bf16 %v6501_v20  ;;  %v5137_v20 = vunpack.c.l.bf16 %v6472_v7 }
 0x141   : > { %3153 = vmatpush.msrb.mxu0 %v5010_v36  ;;  %3172 = vmatpush.msrb.mxu1 %v5045_v37  ;;  %v5153_v36 = vunpack.c.l.bf16 %v6476_v23  ;;  %v5186_v37 = vunpack.c.h.bf16 %v6484_v29 }
 0x142   : > { %3193 = vmatpush.msrb.mxu2 %v5074_v39  ;;  %3212 = vmatpush.msrb.mxu3 %v5109_v40  ;;  %v5217_v39 = vunpack.c.l.bf16 %v6492_v26  ;;  %v5250_v40 = vunpack.c.h.bf16 %v6500_v32 }
 0x143   : > { %3154 = vmatpush.msrb.mxu0 %v5009_v42  ;;  %3173 = vmatpush.msrb.mxu1 %v5042_v43  ;;  %v5150_v42 = vunpack.c.h.bf16 %v6475_v35  ;;  %v5185_v43 = vunpack.c.l.bf16 %v6484_v29 }
 0x144   : > { %3194 = vmatpush.msrb.mxu2 %v5073_v45  ;;  %3213 = vmatpush.msrb.mxu3 %v5106_v46  ;;  %v5214_v45 = vunpack.c.h.bf16 %v6491_v38  ;;  %v5249_v46 = vunpack.c.l.bf16 %v6500_v32  ;;  %v390_v32 = vld [vmem:[%s7190_s24 + $0x80] sm:$0xff] }
 0x145   : > { %3155 = vmatpush.msrb.mxu0 %v5006_v48  ;;  %3174 = vmatpush.msrb.mxu1 %v5041_v49  ;;  %v5149_v48 = vunpack.c.l.bf16 %v6475_v35  ;;  %v5182_v49 = vunpack.c.h.bf16 %v6483_v41 }
 0x146   : > { %3195 = vmatpush.msrb.mxu2 %v5070_v51  ;;  %3214 = vmatpush.msrb.mxu3 %v5105_v52  ;;  %v5213_v51 = vunpack.c.l.bf16 %v6491_v38  ;;  %v5246_v52 = vunpack.c.h.bf16 %v6499_v44 }
 0x147   : > { %3156 = vmatpush.msrb.mxu0 %v5005_v56  ;;  %3175 = vmatpush.msrb.mxu1 %v5038_v57  ;;  %v6498_v56 = vld [vmem:[%s7172_s27 + $0x8e0] sm:$0xff]   ;;  %v5210_v57 = vunpack.c.h.bf16 %v6490_v50 }
 0x148   : > { %3196 = vmatpush.msrb.mxu2 %v5069_v59  ;;  %3215 = vmatpush.msrb.mxu3 %v5102_v60  ;;  %v6473_v59 = vld [vmem:[%s7172_s27 + $0x818] sm:$0xff]   ;;  %v5145_v60 = vunpack.c.l.bf16 %v6474_v47  ;;  %v5242_v0 = vunpack.c.h.bf16 %v6498_v56 }
 0x149   : > { %3157 = vmatpush.msrb.mxu0 %v5002_v62  ;;  %3176 = vmatpush.msrb.mxu1 %v5037_v63  ;;  %v6489_v62 = vld [vmem:[%s7172_s27 + $0x898] sm:$0xff]   ;;  %v5209_v63 = vunpack.c.l.bf16 %v6490_v50  ;;  %v5142_v2 = vunpack.c.h.bf16 %v6473_v59  ;;  %v5141_v8 = vunpack.c.l.bf16 %v6473_v59 }
 0x14a   : > { %3197 = vmatpush.msrb.mxu2 %v5066_v3  ;;  %3216 = vmatpush.msrb.mxu3 %v5101_v4  ;;  %v5177_v3 = vunpack.c.l.bf16 %v6482_v53  ;;  %v6497_v4 = vld [vmem:[%s7172_s27 + $0x8d8] sm:$0xff]   ;;  %v5205_v11 = vunpack.c.l.bf16 %v6489_v62  ;;  %v439_v53 = vunpack.c.h.bf16 %v390_v32 }
 0x14b   : > { %3158 = vmatpush.msrb.mxu0 %v5001_v5  ;;  %3177 = vmatpush.msrb.mxu1 %v5034_v6  ;;  %v5206_v5 = vunpack.c.h.bf16 %v6489_v62  ;;  %v5241_v6 = vunpack.c.l.bf16 %v6498_v56  ;;  %v5238_v12 = vunpack.c.h.bf16 %v6497_v4  ;;  %v6525_v50 = vld [vmem:[%s7172_s27 + $0x9b8] sm:$0xff]  }
 0x14c   : > { %3198 = vmatpush.msrb.mxu2 %v5065_v9  ;;  %3217 = vmatpush.msrb.mxu3 %v5098_v10  ;;  %v5174_v9 = vunpack.c.h.bf16 %v6481_v1  ;;  %v6488_v10 = vld [vmem:[%s7172_s27 + $0x890] sm:$0xff]   ;;  %v6517_v59 = vld [vmem:[%s7172_s27 + $0x978] sm:$0xff]  }
 0x14d   : > { %3159 = vmatmul.f32.vlgmr.msrb.gmra.mxu0 %v498_v13  ;;  %3199 = vmatmul.f32.vlgmr.msrb.gmra.mxu2 %v500_v14  ;;  %v6480_v13 = vld [vmem:[%s7172_s27 + $0x850] sm:$0xff]   ;;  %v5138_v14 = vunpack.c.h.bf16 %v6472_v7  ;;  %v5202_v17 = vunpack.c.h.bf16 %v6488_v10  ;;  %v5201_v23 = vunpack.c.l.bf16 %v6488_v10  ;;  %v6533_v62 = vld [vmem:[%s7172_s27 + $0x9f8] sm:$0xff]  }
 0x14e   : > { %3223 = vmatpush.msra.mxu0 %v5158_v15  ;;  %3263 = vmatpush.msra.mxu2 %v5222_v16  ;;  %v5173_v15 = vunpack.c.l.bf16 %v6481_v1  ;;  %v6496_v16 = vld [vmem:[%s7172_s27 + $0x8d0] sm:$0xff]  }
 0x14f   : > { %3178 = vmatpush.msrb.mxu1 %v5033_v18  ;;  %3218 = vmatpush.msrb.mxu3 %v5097_v19  ;;  %v5237_v18 = vunpack.c.l.bf16 %v6497_v4  ;;  %v6471_v19 = vld [vmem:[%s7172_s27 + $0x808] sm:$0xff]   ;;  %v6508_v1 = vld [vmem:[%s7172_s27 + $0x930] sm:$0xff]  }
 0x150   : > { %3179 = vmatmul.f32.vlgmr.msrb.gmra.mxu1 %v499_v21  ;;  %3219 = vmatmul.f32.vlgmr.msrb.gmra.mxu3 %v501_v22  ;;  %v5170_v21 = vunpack.c.h.bf16 %v6480_v13  ;;  %v6487_v22 = vld [vmem:[%s7172_s27 + $0x888] sm:$0xff]   ;;  %v5134_v26 = vunpack.c.h.bf16 %v6471_v19  ;;  %v6524_v4 = vld [vmem:[%s7172_s27 + $0x9b0] sm:$0xff]  }
 0x151   : > { %3224 = vmatpush.msra.mxu0 %v5157_v24  ;;  %3243 = vmatpush.msra.mxu1 %v5190_v25  ;;  %v5234_v24 = vunpack.c.h.bf16 %v6496_v16  ;;  %v6479_v25 = vld [vmem:[%s7172_s27 + $0x848] sm:$0xff]   ;;  %v5198_v29 = vunpack.c.h.bf16 %v6487_v22  ;;  %v6516_v7 = vld [vmem:[%s7172_s27 + $0x970] sm:$0xff]  }
 0x152   : > { %3264 = vmatpush.msra.mxu2 %v5221_v27  ;;  %3283 = vmatpush.msra.mxu3 %v5254_v28  ;;  %v5169_v27 = vunpack.c.l.bf16 %v6480_v13  ;;  %v6495_v28 = vld [vmem:[%s7172_s27 + $0x8c8] sm:$0xff]   ;;  %v5166_v35 = vunpack.c.h.bf16 %v6479_v25  ;;  %v5165_v41 = vunpack.c.l.bf16 %v6479_v25  ;;  %v6532_v10 = vld [vmem:[%s7172_s27 + $0x9f0] sm:$0xff]   ;;  %v6506_v25 = vld [vmem:[%s7172_s27 + $0x920] sm:$0xff]  }
 0x153   : > { %3225 = vmatpush.msra.mxu0 %v5154_v30  ;;  %3244 = vmatpush.msra.mxu1 %v5189_v31  ;;  %v5233_v30 = vunpack.c.l.bf16 %v6496_v16  ;;  %v6470_v31 = vld [vmem:[%s7172_s27 + $0x800] sm:$0xff]   ;;  %v5230_v38 = vunpack.c.h.bf16 %v6495_v28  ;;  %v6507_v13 = vld [vmem:[%s7172_s27 + $0x928] sm:$0xff]  }
 0x154   : > { %3265 = vmatpush.msra.mxu2 %v5218_v33  ;;  %3284 = vmatpush.msra.mxu3 %v5253_v34  ;;  %v391_v33 = vld [vmem:[%s7190_s24 + $0x88] sm:$0xff]  ;;  %v5133_v34 = vunpack.c.l.bf16 %v6471_v19  ;;  %v5129_v47 = vunpack.c.l.bf16 %v6470_v31  ;;  %v6523_v16 = vld [vmem:[%s7172_s27 + $0x9a8] sm:$0xff]  }
 0x155   : > { %3226 = vmatpush.msra.mxu0 %v5153_v36  ;;  %3245 = vmatpush.msra.mxu1 %v5186_v37  ;;  %v6486_v36 = vld [vmem:[%s7172_s27 + $0x880] sm:$0xff]   ;;  %v5197_v37 = vunpack.c.l.bf16 %v6487_v22  ;;  %v440_v44 = vunpack.c.l.bf16 %v391_v33  ;;  %v6515_v19 = vld [vmem:[%s7172_s27 + $0x968] sm:$0xff]  }
 0x156   : > { %3266 = vmatpush.msra.mxu2 %v5217_v39  ;;  %3285 = vmatpush.msra.mxu3 %v5250_v40  ;;  %v6478_v39 = vld [vmem:[%s7172_s27 + $0x840] sm:$0xff]   ;;  %v5130_v40 = vunpack.c.h.bf16 %v6470_v31  ;;  %v6531_v22 = vld [vmem:[%s7172_s27 + $0x9e8] sm:$0xff]  }
 0x157   : > { %3227 = vmatpush.msra.mxu0 %v5150_v42  ;;  %3246 = vmatpush.msra.mxu1 %v5185_v43  ;;  %v6494_v42 = vld [vmem:[%s7172_s27 + $0x8c0] sm:$0xff]   ;;  %v438_v43 = vunpack.c.l.bf16 %v390_v32  ;;  %v504_v56 = vmul.f32 0.003921569, %v440_v44  ;;  %v5274_v32 = vunpack.c.h.bf16 %v6506_v25 }
 0x158   : > { %3267 = vmatpush.msra.mxu2 %v5214_v45  ;;  %3286 = vmatpush.msra.mxu3 %v5249_v46  ;;  %v5194_v45 = vunpack.c.h.bf16 %v6486_v36  ;;  %v5229_v46 = vunpack.c.l.bf16 %v6495_v28  ;;  %v6522_v28 = vld [vmem:[%s7172_s27 + $0x9a0] sm:$0xff]  }
 0x159   : > { %3228 = vmatpush.msra.mxu0 %v5149_v48  ;;  %3247 = vmatpush.msra.mxu1 %v5182_v49  ;;  %v5162_v48 = vunpack.c.h.bf16 %v6478_v39  ;;  %v6509_v49 = vld [vmem:[%s7172_s27 + $0x938] sm:$0xff]   ;;  %v6514_v31 = vld [vmem:[%s7172_s27 + $0x960] sm:$0xff]  }
 0x15a   : > { %3268 = vmatpush.msra.mxu2 %v5213_v51  ;;  %3287 = vmatpush.msra.mxu3 %v5246_v52  ;;  %v5193_v51 = vunpack.c.l.bf16 %v6486_v36  ;;  %v5226_v52 = vunpack.c.h.bf16 %v6494_v42  ;;  %v5373_v36 = vunpack.c.l.bf16 %v6531_v22 }
 0x15b   : > { %3229 = vmatpush.msra.mxu0 %v5146_v54  ;;  %3248 = vmatpush.msra.mxu1 %v5181_v55  ;;  %v441_v54 = vunpack.c.h.bf16 %v391_v33  ;;  %v502_v55 = vmul.f32 0.003921569, %v438_v43  ;;  %v5309_v33 = vunpack.c.l.bf16 %v6515_v19  ;;  %v6513_v43 = vld [vmem:[%s7172_s27 + $0x958] sm:$0xff]  }
 0x15c   : > { %3269 = vmatpush.msra.mxu2 %v5210_v57  ;;  %3288 = vmatpush.msra.mxu3 %v5245_v58  ;;  %v5286_v57 = vunpack.c.h.bf16 %v6509_v49  ;;  %v5350_v58 = vunpack.c.h.bf16 %v6525_v50 }
 0x15d   : > { %3230 = vmatpush.msra.mxu0 %v5145_v60  ;;  %3249 = vmatpush.msra.mxu1 %v5178_v61  ;;  %v5161_v60 = vunpack.c.l.bf16 %v6478_v39  ;;  %v5225_v61 = vunpack.c.l.bf16 %v6494_v42  ;;  %v5306_v39 = vunpack.c.h.bf16 %v6514_v31 }
 0x15e   : > { %3270 = vmatpush.msra.mxu2 %v5209_v63  ;;  %3289 = vmatpush.msra.mxu3 %v5242_v0  ;;  %v503_v63 = vmul.f32 0.003921569, %v439_v53  ;;  %v505_v0 = vmul.f32 0.003921569, %v441_v54 }
 0x15f   : > { %3231 = vmatpush.msra.mxu0 %v5142_v2  ;;  %3250 = vmatpush.msra.mxu1 %v5177_v3  ;;  %v5285_v2 = vunpack.c.l.bf16 %v6509_v49  ;;  %v5318_v3 = vunpack.c.h.bf16 %v6517_v59  ;;  %v6504_v49 = vld [vmem:[%s7172_s27 + $0x910] sm:$0xff]  }
 0x160   : > { %3271 = vmatpush.msra.mxu2 %v5206_v5  ;;  %3290 = vmatpush.msra.mxu3 %v5241_v6  ;;  %v5349_v5 = vunpack.c.l.bf16 %v6525_v50  ;;  %v5382_v6 = vunpack.c.h.bf16 %v6533_v62 }
 0x161   : > { %3232 = vmatpush.msra.mxu0 %v5141_v8  ;;  %3251 = vmatpush.msra.mxu1 %v5174_v9  ;;  %v5282_v8 = vunpack.c.h.bf16 %v6508_v1  ;;  %v5317_v9 = vunpack.c.l.bf16 %v6517_v59 }
 0x162   : > { %3272 = vmatpush.msra.mxu2 %v5205_v11  ;;  %3291 = vmatpush.msra.mxu3 %v5238_v12  ;;  %v5346_v11 = vunpack.c.h.bf16 %v6524_v4  ;;  %v5381_v12 = vunpack.c.l.bf16 %v6533_v62  ;;  %v5265_v62 = vunpack.c.l.bf16 %v6504_v49 }
 0x163   : > { %3233 = vmatpush.msra.mxu0 %v5138_v14  ;;  %3252 = vmatpush.msra.mxu1 %v5173_v15  ;;  %v5281_v14 = vunpack.c.l.bf16 %v6508_v1  ;;  %v5314_v15 = vunpack.c.h.bf16 %v6516_v7 }
 0x164   : > { %3273 = vmatpush.msra.mxu2 %v5202_v17  ;;  %3292 = vmatpush.msra.mxu3 %v5237_v18  ;;  %v5345_v17 = vunpack.c.l.bf16 %v6524_v4  ;;  %v5378_v18 = vunpack.c.h.bf16 %v6532_v10 }
 0x165   : > { %3234 = vmatpush.msra.mxu0 %v5137_v20  ;;  %3253 = vmatpush.msra.mxu1 %v5170_v21  ;;  %v5278_v20 = vunpack.c.h.bf16 %v6507_v13  ;;  %v5313_v21 = vunpack.c.l.bf16 %v6516_v7 }
 0x166   : > { %3274 = vmatpush.msra.mxu2 %v5201_v23  ;;  %3293 = vmatpush.msra.mxu3 %v5234_v24  ;;  %v5342_v23 = vunpack.c.h.bf16 %v6523_v16  ;;  %v5377_v24 = vunpack.c.l.bf16 %v6532_v10  ;;  %v392_v10 = vld [vmem:[%s7190_s24 + $0x90] sm:$0xff] }
 0x167   : > { %3235 = vmatpush.msra.mxu0 %v5134_v26  ;;  %3254 = vmatpush.msra.mxu1 %v5169_v27  ;;  %v5277_v26 = vunpack.c.l.bf16 %v6507_v13  ;;  %v5310_v27 = vunpack.c.h.bf16 %v6515_v19 }
 0x168   : > { %3275 = vmatpush.msra.mxu2 %v5198_v29  ;;  %3294 = vmatpush.msra.mxu3 %v5233_v30  ;;  %v5341_v29 = vunpack.c.l.bf16 %v6523_v16  ;;  %v5374_v30 = vunpack.c.h.bf16 %v6531_v22 }
 0x169   : > { %3236 = vmatpush.msra.mxu0 %v5133_v34  ;;  %3255 = vmatpush.msra.mxu1 %v5166_v35  ;;  %v6530_v34 = vld [vmem:[%s7172_s27 + $0x9e0] sm:$0xff]   ;;  %v5338_v35 = vunpack.c.h.bf16 %v6522_v28 }
 0x16a   : > { %3276 = vmatpush.msra.mxu2 %v5197_v37  ;;  %3295 = vmatpush.msra.mxu3 %v5230_v38  ;;  %v6505_v37 = vld [vmem:[%s7172_s27 + $0x918] sm:$0xff]   ;;  %v5273_v38 = vunpack.c.l.bf16 %v6506_v25  ;;  %v5370_v42 = vunpack.c.h.bf16 %v6530_v34 }
 0x16b   : > { %3237 = vmatpush.msra.mxu0 %v5130_v40  ;;  %3256 = vmatpush.msra.mxu1 %v5165_v41  ;;  %v6521_v40 = vld [vmem:[%s7172_s27 + $0x998] sm:$0xff]   ;;  %v5337_v41 = vunpack.c.l.bf16 %v6522_v28  ;;  %v5270_v44 = vunpack.c.h.bf16 %v6505_v37  ;;  %v5269_v50 = vunpack.c.l.bf16 %v6505_v37 }
 0x16c   : > { %3277 = vmatpush.msra.mxu2 %v5194_v45  ;;  %3296 = vmatpush.msra.mxu3 %v5229_v46  ;;  %v5305_v45 = vunpack.c.l.bf16 %v6514_v31  ;;  %v6529_v46 = vld [vmem:[%s7172_s27 + $0x9d8] sm:$0xff]   ;;  %v5333_v53 = vunpack.c.l.bf16 %v6521_v40  ;;  %v443_v31 = vunpack.c.h.bf16 %v392_v10 }
 0x16d   : > { %3238 = vmatpush.msra.mxu0 %v5129_v47  ;;  %3257 = vmatpush.msra.mxu1 %v5162_v48  ;;  %v5334_v47 = vunpack.c.h.bf16 %v6521_v40  ;;  %v5369_v48 = vunpack.c.l.bf16 %v6530_v34  ;;  %v5366_v54 = vunpack.c.h.bf16 %v6529_v46  ;;  %v6557_v28 = vld [vmem:[%s7172_s27 + $0xab8] sm:$0xff]  }
 0x16e   : > { %3278 = vmatpush.msra.mxu2 %v5193_v51  ;;  %3297 = vmatpush.msra.mxu3 %v5226_v52  ;;  %v5302_v51 = vunpack.c.h.bf16 %v6513_v43  ;;  %v6520_v52 = vld [vmem:[%s7172_s27 + $0x990] sm:$0xff]   ;;  %v6549_v37 = vld [vmem:[%s7172_s27 + $0xa78] sm:$0xff]  }
 0x16f   : > { %3239 = vmatmul.f32.vlgmr.msra.gmra.mxu0 %v502_v55  ;;  %3279 = vmatmul.f32.vlgmr.msra.gmra.mxu2 %v504_v56  ;;  %v6512_v55 = vld [vmem:[%s7172_s27 + $0x950] sm:$0xff]   ;;  %v5266_v56 = vunpack.c.h.bf16 %v6504_v49  ;;  %v5330_v59 = vunpack.c.h.bf16 %v6520_v52  ;;  %v5329_v1 = vunpack.c.l.bf16 %v6520_v52  ;;  %v6565_v40 = vld [vmem:[%s7172_s27 + $0xaf8] sm:$0xff]  }
 0x170   : > { %3303 = vmatpush.msrb.mxu0 %v5286_v57  ;;  %3343 = vmatpush.msrb.mxu2 %v5350_v58  ;;  %v5301_v57 = vunpack.c.l.bf16 %v6513_v43  ;;  %v6528_v58 = vld [vmem:[%s7172_s27 + $0x9d0] sm:$0xff]  }
 0x171   : > { %3258 = vmatpush.msra.mxu1 %v5161_v60  ;;  %3298 = vmatpush.msra.mxu3 %v5225_v61  ;;  %v5365_v60 = vunpack.c.l.bf16 %v6529_v46  ;;  %v6503_v61 = vld [vmem:[%s7172_s27 + $0x908] sm:$0xff]   ;;  %v6540_v43 = vld [vmem:[%s7172_s27 + $0xa30] sm:$0xff]  }
 0x172   : > { %3259 = vmatmul.f32.vlgmr.msra.gmra.mxu1 %v503_v63  ;;  %3299 = vmatmul.f32.vlgmr.msra.gmra.mxu3 %v505_v0  ;;  %v5298_v63 = vunpack.c.h.bf16 %v6512_v55  ;;  %v6519_v0 = vld [vmem:[%s7172_s27 + $0x988] sm:$0xff]   ;;  %v5262_v4 = vunpack.c.h.bf16 %v6503_v61  ;;  %v6556_v46 = vld [vmem:[%s7172_s27 + $0xab0] sm:$0xff]  }
 0x173   : > { %3304 = vmatpush.msrb.mxu0 %v5285_v2  ;;  %3323 = vmatpush.msrb.mxu1 %v5318_v3  ;;  %v5362_v2 = vunpack.c.h.bf16 %v6528_v58  ;;  %v6511_v3 = vld [vmem:[%s7172_s27 + $0x948] sm:$0xff]   ;;  %v5326_v7 = vunpack.c.h.bf16 %v6519_v0  ;;  %v6548_v49 = vld [vmem:[%s7172_s27 + $0xa70] sm:$0xff]  }
 0x174   : > { %3344 = vmatpush.msrb.mxu2 %v5349_v5  ;;  %3363 = vmatpush.msrb.mxu3 %v5382_v6  ;;  %v5297_v5 = vunpack.c.l.bf16 %v6512_v55  ;;  %v6527_v6 = vld [vmem:[%s7172_s27 + $0x9c8] sm:$0xff]   ;;  %v5294_v13 = vunpack.c.h.bf16 %v6511_v3  ;;  %v5293_v19 = vunpack.c.l.bf16 %v6511_v3  ;;  %v6564_v52 = vld [vmem:[%s7172_s27 + $0xaf0] sm:$0xff]   ;;  %v6538_v3 = vld [vmem:[%s7172_s27 + $0xa20] sm:$0xff]  }
 0x175   : > { %3305 = vmatpush.msrb.mxu0 %v5282_v8  ;;  %3324 = vmatpush.msrb.mxu1 %v5317_v9  ;;  %v5361_v8 = vunpack.c.l.bf16 %v6528_v58  ;;  %v6502_v9 = vld [vmem:[%s7172_s27 + $0x900] sm:$0xff]   ;;  %v5358_v16 = vunpack.c.h.bf16 %v6527_v6  ;;  %v6539_v55 = vld [vmem:[%s7172_s27 + $0xa28] sm:$0xff]  }
 0x176   : > { %3345 = vmatpush.msrb.mxu2 %v5346_v11  ;;  %3364 = vmatpush.msrb.mxu3 %v5381_v12  ;;  %v393_v11 = vld [vmem:[%s7190_s24 + $0x98] sm:$0xff]  ;;  %v5261_v12 = vunpack.c.l.bf16 %v6503_v61  ;;  %v5257_v25 = vunpack.c.l.bf16 %v6502_v9  ;;  %v6555_v58 = vld [vmem:[%s7172_s27 + $0xaa8] sm:$0xff]  }
 0x177   : > { %3306 = vmatpush.msrb.mxu0 %v5281_v14  ;;  %3325 = vmatpush.msrb.mxu1 %v5314_v15  ;;  %v6518_v14 = vld [vmem:[%s7172_s27 + $0x980] sm:$0xff]   ;;  %v5325_v15 = vunpack.c.l.bf16 %v6519_v0  ;;  %v444_v22 = vunpack.c.l.bf16 %v393_v11  ;;  %v6547_v61 = vld [vmem:[%s7172_s27 + $0xa68] sm:$0xff]  }
 0x178   : > { %3346 = vmatpush.msrb.mxu2 %v5345_v17  ;;  %3365 = vmatpush.msrb.mxu3 %v5378_v18  ;;  %v6510_v17 = vld [vmem:[%s7172_s27 + $0x940] sm:$0xff]   ;;  %v5258_v18 = vunpack.c.h.bf16 %v6502_v9  ;;  %v6563_v0 = vld [vmem:[%s7172_s27 + $0xae8] sm:$0xff]  }
 0x179   : > { %3307 = vmatpush.msrb.mxu0 %v5278_v20  ;;  %3326 = vmatpush.msrb.mxu1 %v5313_v21  ;;  %v6526_v20 = vld [vmem:[%s7172_s27 + $0x9c0] sm:$0xff]   ;;  %v442_v21 = vunpack.c.l.bf16 %v392_v10  ;;  %v508_v34 = vmul.f32 0.003921569, %v444_v22  ;;  %v5402_v10 = vunpack.c.h.bf16 %v6538_v3 }
 0x17a   : > { %3347 = vmatpush.msrb.mxu2 %v5342_v23  ;;  %3366 = vmatpush.msrb.mxu3 %v5377_v24  ;;  %v5322_v23 = vunpack.c.h.bf16 %v6518_v14  ;;  %v5357_v24 = vunpack.c.l.bf16 %v6527_v6  ;;  %v6554_v6 = vld [vmem:[%s7172_s27 + $0xaa0] sm:$0xff]  }
 0x17b   : > { %3308 = vmatpush.msrb.mxu0 %v5277_v26  ;;  %3327 = vmatpush.msrb.mxu1 %v5310_v27  ;;  %v5290_v26 = vunpack.c.h.bf16 %v6510_v17  ;;  %v6541_v27 = vld [vmem:[%s7172_s27 + $0xa38] sm:$0xff]   ;;  %v6546_v9 = vld [vmem:[%s7172_s27 + $0xa60] sm:$0xff]  }
 0x17c   : > { %3348 = vmatpush.msrb.mxu2 %v5341_v29  ;;  %3367 = vmatpush.msrb.mxu3 %v5374_v30  ;;  %v5321_v29 = vunpack.c.l.bf16 %v6518_v14  ;;  %v5354_v30 = vunpack.c.h.bf16 %v6526_v20  ;;  %v5501_v14 = vunpack.c.l.bf16 %v6563_v0 }
 0x17d   : > { %3309 = vmatpush.msrb.mxu0 %v5274_v32  ;;  %3328 = vmatpush.msrb.mxu1 %v5309_v33  ;;  %v445_v32 = vunpack.c.h.bf16 %v393_v11  ;;  %v506_v33 = vmul.f32 0.003921569, %v442_v21  ;;  %v5437_v11 = vunpack.c.l.bf16 %v6547_v61  ;;  %v6545_v21 = vld [vmem:[%s7172_s27 + $0xa58] sm:$0xff]  }
 0x17e   : > { %3349 = vmatpush.msrb.mxu2 %v5338_v35  ;;  %3368 = vmatpush.msrb.mxu3 %v5373_v36  ;;  %v5414_v35 = vunpack.c.h.bf16 %v6541_v27  ;;  %v5478_v36 = vunpack.c.h.bf16 %v6557_v28 }
 0x17f   : > { %3310 = vmatpush.msrb.mxu0 %v5273_v38  ;;  %3329 = vmatpush.msrb.mxu1 %v5306_v39  ;;  %v5289_v38 = vunpack.c.l.bf16 %v6510_v17  ;;  %v5353_v39 = vunpack.c.l.bf16 %v6526_v20  ;;  %v5434_v17 = vunpack.c.h.bf16 %v6546_v9 }
 0x180   : > { %3350 = vmatpush.msrb.mxu2 %v5337_v41  ;;  %3369 = vmatpush.msrb.mxu3 %v5370_v42  ;;  %v507_v41 = vmul.f32 0.003921569, %v443_v31  ;;  %v509_v42 = vmul.f32 0.003921569, %v445_v32 }
 0x181   : > { %3311 = vmatpush.msrb.mxu0 %v5270_v44  ;;  %3330 = vmatpush.msrb.mxu1 %v5305_v45  ;;  %v5413_v44 = vunpack.c.l.bf16 %v6541_v27  ;;  %v5446_v45 = vunpack.c.h.bf16 %v6549_v37  ;;  %v6536_v27 = vld [vmem:[%s7172_s27 + $0xa10] sm:$0xff]  }
 0x182   : > { %3351 = vmatpush.msrb.mxu2 %v5334_v47  ;;  %3370 = vmatpush.msrb.mxu3 %v5369_v48  ;;  %v5477_v47 = vunpack.c.l.bf16 %v6557_v28  ;;  %v5510_v48 = vunpack.c.h.bf16 %v6565_v40 }
 0x183   : > { %3312 = vmatpush.msrb.mxu0 %v5269_v50  ;;  %3331 = vmatpush.msrb.mxu1 %v5302_v51  ;;  %v5410_v50 = vunpack.c.h.bf16 %v6540_v43  ;;  %v5445_v51 = vunpack.c.l.bf16 %v6549_v37 }
 0x184   : > { %3352 = vmatpush.msrb.mxu2 %v5333_v53  ;;  %3371 = vmatpush.msrb.mxu3 %v5366_v54  ;;  %v5474_v53 = vunpack.c.h.bf16 %v6556_v46  ;;  %v5509_v54 = vunpack.c.l.bf16 %v6565_v40  ;;  %v5393_v40 = vunpack.c.l.bf16 %v6536_v27 }
 0x185   : > { %3313 = vmatpush.msrb.mxu0 %v5266_v56  ;;  %3332 = vmatpush.msrb.mxu1 %v5301_v57  ;;  %v5409_v56 = vunpack.c.l.bf16 %v6540_v43  ;;  %v5442_v57 = vunpack.c.h.bf16 %v6548_v49 }
 0x186   : > { %3353 = vmatpush.msrb.mxu2 %v5330_v59  ;;  %3372 = vmatpush.msrb.mxu3 %v5365_v60  ;;  %v5473_v59 = vunpack.c.l.bf16 %v6556_v46  ;;  %v5506_v60 = vunpack.c.h.bf16 %v6564_v52 }
 0x187   : > { %3314 = vmatpush.msrb.mxu0 %v5265_v62  ;;  %3333 = vmatpush.msrb.mxu1 %v5298_v63  ;;  %v5406_v62 = vunpack.c.h.bf16 %v6539_v55  ;;  %v5441_v63 = vunpack.c.l.bf16 %v6548_v49 }
 0x188   : > { %3354 = vmatpush.msrb.mxu2 %v5329_v1  ;;  %3373 = vmatpush.msrb.mxu3 %v5362_v2  ;;  %v5470_v1 = vunpack.c.h.bf16 %v6555_v58  ;;  %v5505_v2 = vunpack.c.l.bf16 %v6564_v52  ;;  %v394_v52 = vld [vmem:[%s7190_s24 + $0xa0] sm:$0xff] }
 0x189   : > { %3315 = vmatpush.msrb.mxu0 %v5262_v4  ;;  %3334 = vmatpush.msrb.mxu1 %v5297_v5  ;;  %v5405_v4 = vunpack.c.l.bf16 %v6539_v55  ;;  %v5438_v5 = vunpack.c.h.bf16 %v6547_v61 }
 0x18a   : > { %3355 = vmatpush.msrb.mxu2 %v5326_v7  ;;  %3374 = vmatpush.msrb.mxu3 %v5361_v8  ;;  %v5469_v7 = vunpack.c.l.bf16 %v6555_v58  ;;  %v5502_v8 = vunpack.c.h.bf16 %v6563_v0 }
 0x18b   : > { %3316 = vmatpush.msrb.mxu0 %v5261_v12  ;;  %3335 = vmatpush.msrb.mxu1 %v5294_v13  ;;  %v6562_v12 = vld [vmem:[%s7172_s27 + $0xae0] sm:$0xff]   ;;  %v5466_v13 = vunpack.c.h.bf16 %v6554_v6 }
 0x18c   : > { %3356 = vmatpush.msrb.mxu2 %v5325_v15  ;;  %3375 = vmatpush.msrb.mxu3 %v5358_v16  ;;  %v6537_v15 = vld [vmem:[%s7172_s27 + $0xa18] sm:$0xff]   ;;  %v5401_v16 = vunpack.c.l.bf16 %v6538_v3  ;;  %v5498_v20 = vunpack.c.h.bf16 %v6562_v12 }
 0x18d   : > { %3317 = vmatpush.msrb.mxu0 %v5258_v18  ;;  %3336 = vmatpush.msrb.mxu1 %v5293_v19  ;;  %v6553_v18 = vld [vmem:[%s7172_s27 + $0xa98] sm:$0xff]   ;;  %v5465_v19 = vunpack.c.l.bf16 %v6554_v6  ;;  %v5398_v22 = vunpack.c.h.bf16 %v6537_v15  ;;  %v5397_v28 = vunpack.c.l.bf16 %v6537_v15 }
 0x18e   : > { %3357 = vmatpush.msrb.mxu2 %v5322_v23  ;;  %3376 = vmatpush.msrb.mxu3 %v5357_v24  ;;  %v5433_v23 = vunpack.c.l.bf16 %v6546_v9  ;;  %v6561_v24 = vld [vmem:[%s7172_s27 + $0xad8] sm:$0xff]   ;;  %v5461_v31 = vunpack.c.l.bf16 %v6553_v18  ;;  %v447_v9 = vunpack.c.h.bf16 %v394_v52 }
 0x18f   : > { %3318 = vmatpush.msrb.mxu0 %v5257_v25  ;;  %3337 = vmatpush.msrb.mxu1 %v5290_v26  ;;  %v5462_v25 = vunpack.c.h.bf16 %v6553_v18  ;;  %v5497_v26 = vunpack.c.l.bf16 %v6562_v12  ;;  %v5494_v32 = vunpack.c.h.bf16 %v6561_v24  ;;  %v6589_v6 = vld [vmem:[%s7172_s27 + $0xbb8] sm:$0xff]  }
 0x190   : > { %3358 = vmatpush.msrb.mxu2 %v5321_v29  ;;  %3377 = vmatpush.msrb.mxu3 %v5354_v30  ;;  %v5430_v29 = vunpack.c.h.bf16 %v6545_v21  ;;  %v6552_v30 = vld [vmem:[%s7172_s27 + $0xa90] sm:$0xff]   ;;  %v6581_v15 = vld [vmem:[%s7172_s27 + $0xb78] sm:$0xff]  }
 0x191   : > { %3319 = vmatmul.f32.vlgmr.msrb.gmra.mxu0 %v506_v33  ;;  %3359 = vmatmul.f32.vlgmr.msrb.gmra.mxu2 %v508_v34  ;;  %v6544_v33 = vld [vmem:[%s7172_s27 + $0xa50] sm:$0xff]   ;;  %v5394_v34 = vunpack.c.h.bf16 %v6536_v27  ;;  %v5458_v37 = vunpack.c.h.bf16 %v6552_v30  ;;  %v5457_v43 = vunpack.c.l.bf16 %v6552_v30  ;;  %v6597_v18 = vld [vmem:[%s7172_s27 + $0xbf8] sm:$0xff]  }
 0x192   : > { %3383 = vmatpush.msra.mxu0 %v5414_v35  ;;  %3423 = vmatpush.msra.mxu2 %v5478_v36  ;;  %v5429_v35 = vunpack.c.l.bf16 %v6545_v21  ;;  %v6560_v36 = vld [vmem:[%s7172_s27 + $0xad0] sm:$0xff]  }
 0x193   : > { %3338 = vmatpush.msrb.mxu1 %v5289_v38  ;;  %3378 = vmatpush.msrb.mxu3 %v5353_v39  ;;  %v5493_v38 = vunpack.c.l.bf16 %v6561_v24  ;;  %v6535_v39 = vld [vmem:[%s7172_s27 + $0xa08] sm:$0xff]   ;;  %v6572_v21 = vld [vmem:[%s7172_s27 + $0xb30] sm:$0xff]  }
 0x194   : > { %3339 = vmatmul.f32.vlgmr.msrb.gmra.mxu1 %v507_v41  ;;  %3379 = vmatmul.f32.vlgmr.msrb.gmra.mxu3 %v509_v42  ;;  %v5426_v41 = vunpack.c.h.bf16 %v6544_v33  ;;  %v6551_v42 = vld [vmem:[%s7172_s27 + $0xa88] sm:$0xff]   ;;  %v5390_v46 = vunpack.c.h.bf16 %v6535_v39  ;;  %v6588_v24 = vld [vmem:[%s7172_s27 + $0xbb0] sm:$0xff]  }
 0x195   : > { %3384 = vmatpush.msra.mxu0 %v5413_v44  ;;  %3403 = vmatpush.msra.mxu1 %v5446_v45  ;;  %v5490_v44 = vunpack.c.h.bf16 %v6560_v36  ;;  %v6543_v45 = vld [vmem:[%s7172_s27 + $0xa48] sm:$0xff]   ;;  %v5454_v49 = vunpack.c.h.bf16 %v6551_v42  ;;  %v6580_v27 = vld [vmem:[%s7172_s27 + $0xb70] sm:$0xff]  }
 0x196   : > { %3424 = vmatpush.msra.mxu2 %v5477_v47  ;;  %3443 = vmatpush.msra.mxu3 %v5510_v48  ;;  %v5425_v47 = vunpack.c.l.bf16 %v6544_v33  ;;  %v6559_v48 = vld [vmem:[%s7172_s27 + $0xac8] sm:$0xff]   ;;  %v5422_v55 = vunpack.c.h.bf16 %v6543_v45  ;;  %v5421_v61 = vunpack.c.l.bf16 %v6543_v45  ;;  %v6596_v30 = vld [vmem:[%s7172_s27 + $0xbf0] sm:$0xff]   ;;  %v6570_v45 = vld [vmem:[%s7172_s27 + $0xb20] sm:$0xff]  }
 0x197   : > { %3385 = vmatpush.msra.mxu0 %v5410_v50  ;;  %3404 = vmatpush.msra.mxu1 %v5445_v51  ;;  %v5489_v50 = vunpack.c.l.bf16 %v6560_v36  ;;  %v6534_v51 = vld [vmem:[%s7172_s27 + $0xa00] sm:$0xff]   ;;  %v5486_v58 = vunpack.c.h.bf16 %v6559_v48  ;;  %v6571_v33 = vld [vmem:[%s7172_s27 + $0xb28] sm:$0xff]  }
 0x198   : > { %3425 = vmatpush.msra.mxu2 %v5474_v53  ;;  %3444 = vmatpush.msra.mxu3 %v5509_v54  ;;  %v395_v53 = vld [vmem:[%s7190_s24 + $0xa8] sm:$0xff]  ;;  %v5389_v54 = vunpack.c.l.bf16 %v6535_v39  ;;  %v5385_v3 = vunpack.c.l.bf16 %v6534_v51  ;;  %v6587_v36 = vld [vmem:[%s7172_s27 + $0xba8] sm:$0xff]  }
 0x199   : > { %3386 = vmatpush.msra.mxu0 %v5409_v56  ;;  %3405 = vmatpush.msra.mxu1 %v5442_v57  ;;  %v6550_v56 = vld [vmem:[%s7172_s27 + $0xa80] sm:$0xff]   ;;  %v5453_v57 = vunpack.c.l.bf16 %v6551_v42  ;;  %v448_v0 = vunpack.c.l.bf16 %v395_v53  ;;  %v6579_v39 = vld [vmem:[%s7172_s27 + $0xb68] sm:$0xff]  }
 0x19a   : > { %3426 = vmatpush.msra.mxu2 %v5473_v59  ;;  %3445 = vmatpush.msra.mxu3 %v5506_v60  ;;  %v6542_v59 = vld [vmem:[%s7172_s27 + $0xa40] sm:$0xff]   ;;  %v5386_v60 = vunpack.c.h.bf16 %v6534_v51  ;;  %v6595_v42 = vld [vmem:[%s7172_s27 + $0xbe8] sm:$0xff]  }
 0x19b   : > { %3387 = vmatpush.msra.mxu0 %v5406_v62  ;;  %3406 = vmatpush.msra.mxu1 %v5441_v63  ;;  %v6558_v62 = vld [vmem:[%s7172_s27 + $0xac0] sm:$0xff]   ;;  %v446_v63 = vunpack.c.l.bf16 %v394_v52  ;;  %v512_v12 = vmul.f32 0.003921569, %v448_v0  ;;  %v5530_v52 = vunpack.c.h.bf16 %v6570_v45 }
 0x19c   : > { %3427 = vmatpush.msra.mxu2 %v5470_v1  ;;  %3446 = vmatpush.msra.mxu3 %v5505_v2  ;;  %v5450_v1 = vunpack.c.h.bf16 %v6550_v56  ;;  %v5485_v2 = vunpack.c.l.bf16 %v6559_v48  ;;  %v6586_v48 = vld [vmem:[%s7172_s27 + $0xba0] sm:$0xff]  }
 0x19d   : > { %3388 = vmatpush.msra.mxu0 %v5405_v4  ;;  %3407 = vmatpush.msra.mxu1 %v5438_v5  ;;  %v5418_v4 = vunpack.c.h.bf16 %v6542_v59  ;;  %v6573_v5 = vld [vmem:[%s7172_s27 + $0xb38] sm:$0xff]   ;;  %v6578_v51 = vld [vmem:[%s7172_s27 + $0xb60] sm:$0xff]  }
 0x19e   : > { %3428 = vmatpush.msra.mxu2 %v5469_v7  ;;  %3447 = vmatpush.msra.mxu3 %v5502_v8  ;;  %v5449_v7 = vunpack.c.l.bf16 %v6550_v56  ;;  %v5482_v8 = vunpack.c.h.bf16 %v6558_v62  ;;  %v5629_v56 = vunpack.c.l.bf16 %v6595_v42 }
 0x19f   : > { %3389 = vmatpush.msra.mxu0 %v5402_v10  ;;  %3408 = vmatpush.msra.mxu1 %v5437_v11  ;;  %v449_v10 = vunpack.c.h.bf16 %v395_v53  ;;  %v510_v11 = vmul.f32 0.003921569, %v446_v63  ;;  %v5565_v53 = vunpack.c.l.bf16 %v6579_v39  ;;  %v6577_v63 = vld [vmem:[%s7172_s27 + $0xb58] sm:$0xff]  }
 0x1a0   : > { %3429 = vmatpush.msra.mxu2 %v5466_v13  ;;  %3448 = vmatpush.msra.mxu3 %v5501_v14  ;;  %v5542_v13 = vunpack.c.h.bf16 %v6573_v5  ;;  %v5606_v14 = vunpack.c.h.bf16 %v6589_v6 }
 0x1a1   : > { %3390 = vmatpush.msra.mxu0 %v5401_v16  ;;  %3409 = vmatpush.msra.mxu1 %v5434_v17  ;;  %v5417_v16 = vunpack.c.l.bf16 %v6542_v59  ;;  %v5481_v17 = vunpack.c.l.bf16 %v6558_v62  ;;  %v5562_v59 = vunpack.c.h.bf16 %v6578_v51 }
 0x1a2   : > { %3430 = vmatpush.msra.mxu2 %v5465_v19  ;;  %3449 = vmatpush.msra.mxu3 %v5498_v20  ;;  %v511_v19 = vmul.f32 0.003921569, %v447_v9  ;;  %v513_v20 = vmul.f32 0.003921569, %v449_v10 }
 0x1a3   : > { %3391 = vmatpush.msra.mxu0 %v5398_v22  ;;  %3410 = vmatpush.msra.mxu1 %v5433_v23  ;;  %v5541_v22 = vunpack.c.l.bf16 %v6573_v5  ;;  %v5574_v23 = vunpack.c.h.bf16 %v6581_v15  ;;  %v6568_v5 = vld [vmem:[%s7172_s27 + $0xb10] sm:$0xff]  }
 0x1a4   : > { %3431 = vmatpush.msra.mxu2 %v5462_v25  ;;  %3450 = vmatpush.msra.mxu3 %v5497_v26  ;;  %v5605_v25 = vunpack.c.l.bf16 %v6589_v6  ;;  %v5638_v26 = vunpack.c.h.bf16 %v6597_v18 }
 0x1a5   : > { %3392 = vmatpush.msra.mxu0 %v5397_v28  ;;  %3411 = vmatpush.msra.mxu1 %v5430_v29  ;;  %v5538_v28 = vunpack.c.h.bf16 %v6572_v21  ;;  %v5573_v29 = vunpack.c.l.bf16 %v6581_v15 }
 0x1a6   : > { %3432 = vmatpush.msra.mxu2 %v5461_v31  ;;  %3451 = vmatpush.msra.mxu3 %v5494_v32  ;;  %v5602_v31 = vunpack.c.h.bf16 %v6588_v24  ;;  %v5637_v32 = vunpack.c.l.bf16 %v6597_v18  ;;  %v5521_v18 = vunpack.c.l.bf16 %v6568_v5 }
 0x1a7   : > { %3393 = vmatpush.msra.mxu0 %v5394_v34  ;;  %3412 = vmatpush.msra.mxu1 %v5429_v35  ;;  %v5537_v34 = vunpack.c.l.bf16 %v6572_v21  ;;  %v5570_v35 = vunpack.c.h.bf16 %v6580_v27 }
 0x1a8   : > { %3433 = vmatpush.msra.mxu2 %v5458_v37  ;;  %3452 = vmatpush.msra.mxu3 %v5493_v38  ;;  %v5601_v37 = vunpack.c.l.bf16 %v6588_v24  ;;  %v5634_v38 = vunpack.c.h.bf16 %v6596_v30 }
 0x1a9   : > { %3394 = vmatpush.msra.mxu0 %v5393_v40  ;;  %3413 = vmatpush.msra.mxu1 %v5426_v41  ;;  %v5534_v40 = vunpack.c.h.bf16 %v6571_v33  ;;  %v5569_v41 = vunpack.c.l.bf16 %v6580_v27 }
 0x1aa   : > { %3434 = vmatpush.msra.mxu2 %v5457_v43  ;;  %3453 = vmatpush.msra.mxu3 %v5490_v44  ;;  %v5598_v43 = vunpack.c.h.bf16 %v6587_v36  ;;  %v5633_v44 = vunpack.c.l.bf16 %v6596_v30  ;;  %v396_v30 = vld [vmem:[%s7190_s24 + $0xb0] sm:$0xff] }
 0x1ab   : > { %3395 = vmatpush.msra.mxu0 %v5390_v46  ;;  %3414 = vmatpush.msra.mxu1 %v5425_v47  ;;  %v5533_v46 = vunpack.c.l.bf16 %v6571_v33  ;;  %v5566_v47 = vunpack.c.h.bf16 %v6579_v39 }
 0x1ac   : > { %3435 = vmatpush.msra.mxu2 %v5454_v49  ;;  %3454 = vmatpush.msra.mxu3 %v5489_v50  ;;  %v5597_v49 = vunpack.c.l.bf16 %v6587_v36  ;;  %v5630_v50 = vunpack.c.h.bf16 %v6595_v42 }
 0x1ad   : > { %3396 = vmatpush.msra.mxu0 %v5389_v54  ;;  %3415 = vmatpush.msra.mxu1 %v5422_v55  ;;  %v6594_v54 = vld [vmem:[%s7172_s27 + $0xbe0] sm:$0xff]   ;;  %v5594_v55 = vunpack.c.h.bf16 %v6586_v48 }
 0x1ae   : > { %3436 = vmatpush.msra.mxu2 %v5453_v57  ;;  %3455 = vmatpush.msra.mxu3 %v5486_v58  ;;  %v6569_v57 = vld [vmem:[%s7172_s27 + $0xb18] sm:$0xff]   ;;  %v5529_v58 = vunpack.c.l.bf16 %v6570_v45  ;;  %v5626_v62 = vunpack.c.h.bf16 %v6594_v54 }
 0x1af   : > { %3397 = vmatpush.msra.mxu0 %v5386_v60  ;;  %3416 = vmatpush.msra.mxu1 %v5421_v61  ;;  %v6585_v60 = vld [vmem:[%s7172_s27 + $0xb98] sm:$0xff]   ;;  %v5593_v61 = vunpack.c.l.bf16 %v6586_v48  ;;  %v5526_v0 = vunpack.c.h.bf16 %v6569_v57  ;;  %v5525_v6 = vunpack.c.l.bf16 %v6569_v57 }
 0x1b0   : > { %3437 = vmatpush.msra.mxu2 %v5450_v1  ;;  %3456 = vmatpush.msra.mxu3 %v5485_v2  ;;  %v5561_v1 = vunpack.c.l.bf16 %v6578_v51  ;;  %v6593_v2 = vld [vmem:[%s7172_s27 + $0xbd8] sm:$0xff]   ;;  %v5589_v9 = vunpack.c.l.bf16 %v6585_v60  ;;  %v451_v51 = vunpack.c.h.bf16 %v396_v30 }
 0x1b1   : > { %3398 = vmatpush.msra.mxu0 %v5385_v3  ;;  %3417 = vmatpush.msra.mxu1 %v5418_v4  ;;  %v5590_v3 = vunpack.c.h.bf16 %v6585_v60  ;;  %v5625_v4 = vunpack.c.l.bf16 %v6594_v54  ;;  %v5622_v10 = vunpack.c.h.bf16 %v6593_v2  ;;  %v6621_v48 = vld [vmem:[%s7172_s27 + $0xcb8] sm:$0xff]  }
 0x1b2   : > { %3438 = vmatpush.msra.mxu2 %v5449_v7  ;;  %3457 = vmatpush.msra.mxu3 %v5482_v8  ;;  %v5558_v7 = vunpack.c.h.bf16 %v6577_v63  ;;  %v6584_v8 = vld [vmem:[%s7172_s27 + $0xb90] sm:$0xff]   ;;  %v6613_v57 = vld [vmem:[%s7172_s27 + $0xc78] sm:$0xff]  }
 0x1b3   : > { %3399 = vmatmul.f32.vlgmr.msra.gmra.mxu0 %v510_v11  ;;  %3439 = vmatmul.f32.vlgmr.msra.gmra.mxu2 %v512_v12  ;;  %v6576_v11 = vld [vmem:[%s7172_s27 + $0xb50] sm:$0xff]   ;;  %v5522_v12 = vunpack.c.h.bf16 %v6568_v5  ;;  %v5586_v15 = vunpack.c.h.bf16 %v6584_v8  ;;  %v5585_v21 = vunpack.c.l.bf16 %v6584_v8  ;;  %v6629_v60 = vld [vmem:[%s7172_s27 + $0xcf8] sm:$0xff]  }
 0x1b4   : > { %3463 = vmatpush.msrb.mxu0 %v5542_v13  ;;  %3503 = vmatpush.msrb.mxu2 %v5606_v14  ;;  %v5557_v13 = vunpack.c.l.bf16 %v6577_v63  ;;  %v6592_v14 = vld [vmem:[%s7172_s27 + $0xbd0] sm:$0xff]  }
 0x1b5   : > { %3418 = vmatpush.msra.mxu1 %v5417_v16  ;;  %3458 = vmatpush.msra.mxu3 %v5481_v17  ;;  %v5621_v16 = vunpack.c.l.bf16 %v6593_v2  ;;  %v6567_v17 = vld [vmem:[%s7172_s27 + $0xb08] sm:$0xff]   ;;  %v6604_v63 = vld [vmem:[%s7172_s27 + $0xc30] sm:$0xff]  }
 0x1b6   : > { %3419 = vmatmul.f32.vlgmr.msra.gmra.mxu1 %v511_v19  ;;  %3459 = vmatmul.f32.vlgmr.msra.gmra.mxu3 %v513_v20  ;;  %v5554_v19 = vunpack.c.h.bf16 %v6576_v11  ;;  %v6583_v20 = vld [vmem:[%s7172_s27 + $0xb88] sm:$0xff]   ;;  %v5518_v24 = vunpack.c.h.bf16 %v6567_v17  ;;  %v6620_v2 = vld [vmem:[%s7172_s27 + $0xcb0] sm:$0xff]  }
 0x1b7   : > { %3464 = vmatpush.msrb.mxu0 %v5541_v22  ;;  %3483 = vmatpush.msrb.mxu1 %v5574_v23  ;;  %v5618_v22 = vunpack.c.h.bf16 %v6592_v14  ;;  %v6575_v23 = vld [vmem:[%s7172_s27 + $0xb48] sm:$0xff]   ;;  %v5582_v27 = vunpack.c.h.bf16 %v6583_v20  ;;  %v6612_v5 = vld [vmem:[%s7172_s27 + $0xc70] sm:$0xff]  }
 0x1b8   : > { %3504 = vmatpush.msrb.mxu2 %v5605_v25  ;;  %3523 = vmatpush.msrb.mxu3 %v5638_v26  ;;  %v5553_v25 = vunpack.c.l.bf16 %v6576_v11  ;;  %v6591_v26 = vld [vmem:[%s7172_s27 + $0xbc8] sm:$0xff]   ;;  %v5550_v33 = vunpack.c.h.bf16 %v6575_v23  ;;  %v5549_v39 = vunpack.c.l.bf16 %v6575_v23  ;;  %v6628_v8 = vld [vmem:[%s7172_s27 + $0xcf0] sm:$0xff]   ;;  %v6602_v23 = vld [vmem:[%s7172_s27 + $0xc20] sm:$0xff]  }
 0x1b9   : > { %3465 = vmatpush.msrb.mxu0 %v5538_v28  ;;  %3484 = vmatpush.msrb.mxu1 %v5573_v29  ;;  %v5617_v28 = vunpack.c.l.bf16 %v6592_v14  ;;  %v6566_v29 = vld [vmem:[%s7172_s27 + $0xb00] sm:$0xff]   ;;  %v5614_v36 = vunpack.c.h.bf16 %v6591_v26  ;;  %v6603_v11 = vld [vmem:[%s7172_s27 + $0xc28] sm:$0xff]  }
 0x1ba   : > { %3505 = vmatpush.msrb.mxu2 %v5602_v31  ;;  %3524 = vmatpush.msrb.mxu3 %v5637_v32  ;;  %v397_v31 = vld [vmem:[%s7190_s24 + $0xb8] sm:$0xff]  ;;  %v5517_v32 = vunpack.c.l.bf16 %v6567_v17  ;;  %v5513_v45 = vunpack.c.l.bf16 %v6566_v29  ;;  %v6619_v14 = vld [vmem:[%s7172_s27 + $0xca8] sm:$0xff]  }
 0x1bb   : > { %3466 = vmatpush.msrb.mxu0 %v5537_v34  ;;  %3485 = vmatpush.msrb.mxu1 %v5570_v35  ;;  %v6582_v34 = vld [vmem:[%s7172_s27 + $0xb80] sm:$0xff]   ;;  %v5581_v35 = vunpack.c.l.bf16 %v6583_v20  ;;  %v452_v42 = vunpack.c.l.bf16 %v397_v31  ;;  %v6611_v17 = vld [vmem:[%s7172_s27 + $0xc68] sm:$0xff]  }
 0x1bc   : > { %3506 = vmatpush.msrb.mxu2 %v5601_v37  ;;  %3525 = vmatpush.msrb.mxu3 %v5634_v38  ;;  %v6574_v37 = vld [vmem:[%s7172_s27 + $0xb40] sm:$0xff]   ;;  %v5514_v38 = vunpack.c.h.bf16 %v6566_v29  ;;  %v6627_v20 = vld [vmem:[%s7172_s27 + $0xce8] sm:$0xff]  }
 0x1bd   : > { %3467 = vmatpush.msrb.mxu0 %v5534_v40  ;;  %3486 = vmatpush.msrb.mxu1 %v5569_v41  ;;  %v6590_v40 = vld [vmem:[%s7172_s27 + $0xbc0] sm:$0xff]   ;;  %v450_v41 = vunpack.c.l.bf16 %v396_v30  ;;  %v516_v54 = vmul.f32 0.003921569, %v452_v42  ;;  %v5658_v30 = vunpack.c.h.bf16 %v6602_v23 }
 0x1be   : > { %3507 = vmatpush.msrb.mxu2 %v5598_v43  ;;  %3526 = vmatpush.msrb.mxu3 %v5633_v44  ;;  %v5578_v43 = vunpack.c.h.bf16 %v6582_v34  ;;  %v5613_v44 = vunpack.c.l.bf16 %v6591_v26  ;;  %v6618_v26 = vld [vmem:[%s7172_s27 + $0xca0] sm:$0xff]  }
 0x1bf   : > { %3468 = vmatpush.msrb.mxu0 %v5533_v46  ;;  %3487 = vmatpush.msrb.mxu1 %v5566_v47  ;;  %v5546_v46 = vunpack.c.h.bf16 %v6574_v37  ;;  %v6605_v47 = vld [vmem:[%s7172_s27 + $0xc38] sm:$0xff]   ;;  %v6610_v29 = vld [vmem:[%s7172_s27 + $0xc60] sm:$0xff]  }
 0x1c0   : > { %3508 = vmatpush.msrb.mxu2 %v5597_v49  ;;  %3527 = vmatpush.msrb.mxu3 %v5630_v50  ;;  %v5577_v49 = vunpack.c.l.bf16 %v6582_v34  ;;  %v5610_v50 = vunpack.c.h.bf16 %v6590_v40  ;;  %v5757_v34 = vunpack.c.l.bf16 %v6627_v20 }
 0x1c1   : > { %3469 = vmatpush.msrb.mxu0 %v5530_v52  ;;  %3488 = vmatpush.msrb.mxu1 %v5565_v53  ;;  %v453_v52 = vunpack.c.h.bf16 %v397_v31  ;;  %v514_v53 = vmul.f32 0.003921569, %v450_v41  ;;  %v5693_v31 = vunpack.c.l.bf16 %v6611_v17  ;;  %v6609_v41 = vld [vmem:[%s7172_s27 + $0xc58] sm:$0xff]  }
 0x1c2   : > { %3509 = vmatpush.msrb.mxu2 %v5594_v55  ;;  %3528 = vmatpush.msrb.mxu3 %v5629_v56  ;;  %v5670_v55 = vunpack.c.h.bf16 %v6605_v47  ;;  %v5734_v56 = vunpack.c.h.bf16 %v6621_v48 }
 0x1c3   : > { %3470 = vmatpush.msrb.mxu0 %v5529_v58  ;;  %3489 = vmatpush.msrb.mxu1 %v5562_v59  ;;  %v5545_v58 = vunpack.c.l.bf16 %v6574_v37  ;;  %v5609_v59 = vunpack.c.l.bf16 %v6590_v40  ;;  %v5690_v37 = vunpack.c.h.bf16 %v6610_v29 }
 0x1c4   : > { %3510 = vmatpush.msrb.mxu2 %v5593_v61  ;;  %3529 = vmatpush.msrb.mxu3 %v5626_v62  ;;  %v515_v61 = vmul.f32 0.003921569, %v451_v51  ;;  %v517_v62 = vmul.f32 0.003921569, %v453_v52 }
 0x1c5   : > { %3471 = vmatpush.msrb.mxu0 %v5526_v0  ;;  %3490 = vmatpush.msrb.mxu1 %v5561_v1  ;;  %v5669_v0 = vunpack.c.l.bf16 %v6605_v47  ;;  %v5702_v1 = vunpack.c.h.bf16 %v6613_v57  ;;  %v6600_v47 = vld [vmem:[%s7172_s27 + $0xc10] sm:$0xff]  }
 0x1c6   : > { %3511 = vmatpush.msrb.mxu2 %v5590_v3  ;;  %3530 = vmatpush.msrb.mxu3 %v5625_v4  ;;  %v5733_v3 = vunpack.c.l.bf16 %v6621_v48  ;;  %v5766_v4 = vunpack.c.h.bf16 %v6629_v60 }
 0x1c7   : > { %3472 = vmatpush.msrb.mxu0 %v5525_v6  ;;  %3491 = vmatpush.msrb.mxu1 %v5558_v7  ;;  %v5666_v6 = vunpack.c.h.bf16 %v6604_v63  ;;  %v5701_v7 = vunpack.c.l.bf16 %v6613_v57 }
 0x1c8   : > { %3512 = vmatpush.msrb.mxu2 %v5589_v9  ;;  %3531 = vmatpush.msrb.mxu3 %v5622_v10  ;;  %v5730_v9 = vunpack.c.h.bf16 %v6620_v2  ;;  %v5765_v10 = vunpack.c.l.bf16 %v6629_v60  ;;  %v5649_v60 = vunpack.c.l.bf16 %v6600_v47 }
 0x1c9   : > { %3473 = vmatpush.msrb.mxu0 %v5522_v12  ;;  %3492 = vmatpush.msrb.mxu1 %v5557_v13  ;;  %v5665_v12 = vunpack.c.l.bf16 %v6604_v63  ;;  %v5698_v13 = vunpack.c.h.bf16 %v6612_v5 }
 0x1ca   : > { %3513 = vmatpush.msrb.mxu2 %v5586_v15  ;;  %3532 = vmatpush.msrb.mxu3 %v5621_v16  ;;  %v5729_v15 = vunpack.c.l.bf16 %v6620_v2  ;;  %v5762_v16 = vunpack.c.h.bf16 %v6628_v8 }
 0x1cb   : > { %3474 = vmatpush.msrb.mxu0 %v5521_v18  ;;  %3493 = vmatpush.msrb.mxu1 %v5554_v19  ;;  %v5662_v18 = vunpack.c.h.bf16 %v6603_v11  ;;  %v5697_v19 = vunpack.c.l.bf16 %v6612_v5 }
 0x1cc   : > { %3514 = vmatpush.msrb.mxu2 %v5585_v21  ;;  %3533 = vmatpush.msrb.mxu3 %v5618_v22  ;;  %v5726_v21 = vunpack.c.h.bf16 %v6619_v14  ;;  %v5761_v22 = vunpack.c.l.bf16 %v6628_v8  ;;  %v398_v8 = vld [vmem:[%s7190_s24 + $0xc0] sm:$0xff] }
 0x1cd   : > { %3475 = vmatpush.msrb.mxu0 %v5518_v24  ;;  %3494 = vmatpush.msrb.mxu1 %v5553_v25  ;;  %v5661_v24 = vunpack.c.l.bf16 %v6603_v11  ;;  %v5694_v25 = vunpack.c.h.bf16 %v6611_v17 }
 0x1ce   : > { %3515 = vmatpush.msrb.mxu2 %v5582_v27  ;;  %3534 = vmatpush.msrb.mxu3 %v5617_v28  ;;  %v5725_v27 = vunpack.c.l.bf16 %v6619_v14  ;;  %v5758_v28 = vunpack.c.h.bf16 %v6627_v20 }
 0x1cf   : > { %3476 = vmatpush.msrb.mxu0 %v5517_v32  ;;  %3495 = vmatpush.msrb.mxu1 %v5550_v33  ;;  %v6626_v32 = vld [vmem:[%s7172_s27 + $0xce0] sm:$0xff]   ;;  %v5722_v33 = vunpack.c.h.bf16 %v6618_v26 }
 0x1d0   : > { %3516 = vmatpush.msrb.mxu2 %v5581_v35  ;;  %3535 = vmatpush.msrb.mxu3 %v5614_v36  ;;  %v6601_v35 = vld [vmem:[%s7172_s27 + $0xc18] sm:$0xff]   ;;  %v5657_v36 = vunpack.c.l.bf16 %v6602_v23  ;;  %v5754_v40 = vunpack.c.h.bf16 %v6626_v32 }
 0x1d1   : > { %3477 = vmatpush.msrb.mxu0 %v5514_v38  ;;  %3496 = vmatpush.msrb.mxu1 %v5549_v39  ;;  %v6617_v38 = vld [vmem:[%s7172_s27 + $0xc98] sm:$0xff]   ;;  %v5721_v39 = vunpack.c.l.bf16 %v6618_v26  ;;  %v5654_v42 = vunpack.c.h.bf16 %v6601_v35  ;;  %v5653_v48 = vunpack.c.l.bf16 %v6601_v35 }
 0x1d2   : > { %3517 = vmatpush.msrb.mxu2 %v5578_v43  ;;  %3536 = vmatpush.msrb.mxu3 %v5613_v44  ;;  %v5689_v43 = vunpack.c.l.bf16 %v6610_v29  ;;  %v6625_v44 = vld [vmem:[%s7172_s27 + $0xcd8] sm:$0xff]   ;;  %v5717_v51 = vunpack.c.l.bf16 %v6617_v38  ;;  %v455_v29 = vunpack.c.h.bf16 %v398_v8 }
 0x1d3   : > { %3478 = vmatpush.msrb.mxu0 %v5513_v45  ;;  %3497 = vmatpush.msrb.mxu1 %v5546_v46  ;;  %v5718_v45 = vunpack.c.h.bf16 %v6617_v38  ;;  %v5753_v46 = vunpack.c.l.bf16 %v6626_v32  ;;  %v5750_v52 = vunpack.c.h.bf16 %v6625_v44  ;;  %v6653_v26 = vld [vmem:[%s7172_s27 + $0xdb8] sm:$0xff]  }
 0x1d4   : > { %3518 = vmatpush.msrb.mxu2 %v5577_v49  ;;  %3537 = vmatpush.msrb.mxu3 %v5610_v50  ;;  %v5686_v49 = vunpack.c.h.bf16 %v6609_v41  ;;  %v6616_v50 = vld [vmem:[%s7172_s27 + $0xc90] sm:$0xff]   ;;  %v6645_v35 = vld [vmem:[%s7172_s27 + $0xd78] sm:$0xff]  }
 0x1d5   : > { %3479 = vmatmul.f32.vlgmr.msrb.gmra.mxu0 %v514_v53  ;;  %3519 = vmatmul.f32.vlgmr.msrb.gmra.mxu2 %v516_v54  ;;  %v6608_v53 = vld [vmem:[%s7172_s27 + $0xc50] sm:$0xff]   ;;  %v5650_v54 = vunpack.c.h.bf16 %v6600_v47  ;;  %v5714_v57 = vunpack.c.h.bf16 %v6616_v50  ;;  %v5713_v63 = vunpack.c.l.bf16 %v6616_v50  ;;  %v6661_v38 = vld [vmem:[%s7172_s27 + $0xdf8] sm:$0xff]  }
 0x1d6   : > { %3543 = vmatpush.msra.mxu0 %v5670_v55  ;;  %3583 = vmatpush.msra.mxu2 %v5734_v56  ;;  %v5685_v55 = vunpack.c.l.bf16 %v6609_v41  ;;  %v6624_v56 = vld [vmem:[%s7172_s27 + $0xcd0] sm:$0xff]  }
 0x1d7   : > { %3498 = vmatpush.msrb.mxu1 %v5545_v58  ;;  %3538 = vmatpush.msrb.mxu3 %v5609_v59  ;;  %v5749_v58 = vunpack.c.l.bf16 %v6625_v44  ;;  %v6599_v59 = vld [vmem:[%s7172_s27 + $0xc08] sm:$0xff]   ;;  %v6636_v41 = vld [vmem:[%s7172_s27 + $0xd30] sm:$0xff]  }
 0x1d8   : > { %3499 = vmatmul.f32.vlgmr.msrb.gmra.mxu1 %v515_v61  ;;  %3539 = vmatmul.f32.vlgmr.msrb.gmra.mxu3 %v517_v62  ;;  %v5682_v61 = vunpack.c.h.bf16 %v6608_v53  ;;  %v6615_v62 = vld [vmem:[%s7172_s27 + $0xc88] sm:$0xff]   ;;  %v5646_v2 = vunpack.c.h.bf16 %v6599_v59  ;;  %v6652_v44 = vld [vmem:[%s7172_s27 + $0xdb0] sm:$0xff]  }
 0x1d9   : > { %3544 = vmatpush.msra.mxu0 %v5669_v0  ;;  %3563 = vmatpush.msra.mxu1 %v5702_v1  ;;  %v5746_v0 = vunpack.c.h.bf16 %v6624_v56  ;;  %v6607_v1 = vld [vmem:[%s7172_s27 + $0xc48] sm:$0xff]   ;;  %v5710_v5 = vunpack.c.h.bf16 %v6615_v62  ;;  %v6644_v47 = vld [vmem:[%s7172_s27 + $0xd70] sm:$0xff]  }
 0x1da   : > { %3584 = vmatpush.msra.mxu2 %v5733_v3  ;;  %3603 = vmatpush.msra.mxu3 %v5766_v4  ;;  %v5681_v3 = vunpack.c.l.bf16 %v6608_v53  ;;  %v6623_v4 = vld [vmem:[%s7172_s27 + $0xcc8] sm:$0xff]   ;;  %v5678_v11 = vunpack.c.h.bf16 %v6607_v1  ;;  %v5677_v17 = vunpack.c.l.bf16 %v6607_v1  ;;  %v6660_v50 = vld [vmem:[%s7172_s27 + $0xdf0] sm:$0xff]   ;;  %v6634_v1 = vld [vmem:[%s7172_s27 + $0xd20] sm:$0xff]  }
 0x1db   : > { %3545 = vmatpush.msra.mxu0 %v5666_v6  ;;  %3564 = vmatpush.msra.mxu1 %v5701_v7  ;;  %v5745_v6 = vunpack.c.l.bf16 %v6624_v56  ;;  %v6598_v7 = vld [vmem:[%s7172_s27 + $0xc00] sm:$0xff]   ;;  %v5742_v14 = vunpack.c.h.bf16 %v6623_v4  ;;  %v6635_v53 = vld [vmem:[%s7172_s27 + $0xd28] sm:$0xff]  }
 0x1dc   : > { %3585 = vmatpush.msra.mxu2 %v5730_v9  ;;  %3604 = vmatpush.msra.mxu3 %v5765_v10  ;;  %v399_v9 = vld [vmem:[%s7190_s24 + $0xc8] sm:$0xff]  ;;  %v5645_v10 = vunpack.c.l.bf16 %v6599_v59  ;;  %v5641_v23 = vunpack.c.l.bf16 %v6598_v7  ;;  %v6651_v56 = vld [vmem:[%s7172_s27 + $0xda8] sm:$0xff]  }
 0x1dd   : > { %3546 = vmatpush.msra.mxu0 %v5665_v12  ;;  %3565 = vmatpush.msra.mxu1 %v5698_v13  ;;  %v6614_v12 = vld [vmem:[%s7172_s27 + $0xc80] sm:$0xff]   ;;  %v5709_v13 = vunpack.c.l.bf16 %v6615_v62  ;;  %v456_v20 = vunpack.c.l.bf16 %v399_v9  ;;  %v6643_v59 = vld [vmem:[%s7172_s27 + $0xd68] sm:$0xff]  }
 0x1de   : > { %3586 = vmatpush.msra.mxu2 %v5729_v15  ;;  %3605 = vmatpush.msra.mxu3 %v5762_v16  ;;  %v6606_v15 = vld [vmem:[%s7172_s27 + $0xc40] sm:$0xff]   ;;  %v5642_v16 = vunpack.c.h.bf16 %v6598_v7  ;;  %v6659_v62 = vld [vmem:[%s7172_s27 + $0xde8] sm:$0xff]  }
 0x1df   : > { %3547 = vmatpush.msra.mxu0 %v5662_v18  ;;  %3566 = vmatpush.msra.mxu1 %v5697_v19  ;;  %v6622_v18 = vld [vmem:[%s7172_s27 + $0xcc0] sm:$0xff]   ;;  %v454_v19 = vunpack.c.l.bf16 %v398_v8  ;;  %v520_v32 = vmul.f32 0.003921569, %v456_v20  ;;  %v5786_v8 = vunpack.c.h.bf16 %v6634_v1 }
 0x1e0   : > { %3587 = vmatpush.msra.mxu2 %v5726_v21  ;;  %3606 = vmatpush.msra.mxu3 %v5761_v22  ;;  %v5706_v21 = vunpack.c.h.bf16 %v6614_v12  ;;  %v5741_v22 = vunpack.c.l.bf16 %v6623_v4  ;;  %v6650_v4 = vld [vmem:[%s7172_s27 + $0xda0] sm:$0xff]  }
 0x1e1   : > { %3548 = vmatpush.msra.mxu0 %v5661_v24  ;;  %3567 = vmatpush.msra.mxu1 %v5694_v25  ;;  %v5674_v24 = vunpack.c.h.bf16 %v6606_v15  ;;  %v6637_v25 = vld [vmem:[%s7172_s27 + $0xd38] sm:$0xff]   ;;  %v6642_v7 = vld [vmem:[%s7172_s27 + $0xd60] sm:$0xff]  }
 0x1e2   : > { %3588 = vmatpush.msra.mxu2 %v5725_v27  ;;  %3607 = vmatpush.msra.mxu3 %v5758_v28  ;;  %v5705_v27 = vunpack.c.l.bf16 %v6614_v12  ;;  %v5738_v28 = vunpack.c.h.bf16 %v6622_v18  ;;  %v5885_v12 = vunpack.c.l.bf16 %v6659_v62 }
 0x1e3   : > { %3549 = vmatpush.msra.mxu0 %v5658_v30  ;;  %3568 = vmatpush.msra.mxu1 %v5693_v31  ;;  %v457_v30 = vunpack.c.h.bf16 %v399_v9  ;;  %v518_v31 = vmul.f32 0.003921569, %v454_v19  ;;  %v5821_v9 = vunpack.c.l.bf16 %v6643_v59  ;;  %v6641_v19 = vld [vmem:[%s7172_s27 + $0xd58] sm:$0xff]  }
 0x1e4   : > { %3589 = vmatpush.msra.mxu2 %v5722_v33  ;;  %3608 = vmatpush.msra.mxu3 %v5757_v34  ;;  %v5798_v33 = vunpack.c.h.bf16 %v6637_v25  ;;  %v5862_v34 = vunpack.c.h.bf16 %v6653_v26 }
 0x1e5   : > { %3550 = vmatpush.msra.mxu0 %v5657_v36  ;;  %3569 = vmatpush.msra.mxu1 %v5690_v37  ;;  %v5673_v36 = vunpack.c.l.bf16 %v6606_v15  ;;  %v5737_v37 = vunpack.c.l.bf16 %v6622_v18  ;;  %v5818_v15 = vunpack.c.h.bf16 %v6642_v7 }
 0x1e6   : > { %3590 = vmatpush.msra.mxu2 %v5721_v39  ;;  %3609 = vmatpush.msra.mxu3 %v5754_v40  ;;  %v519_v39 = vmul.f32 0.003921569, %v455_v29  ;;  %v521_v40 = vmul.f32 0.003921569, %v457_v30 }
 0x1e7   : > { %3551 = vmatpush.msra.mxu0 %v5654_v42  ;;  %3570 = vmatpush.msra.mxu1 %v5689_v43  ;;  %v5797_v42 = vunpack.c.l.bf16 %v6637_v25  ;;  %v5830_v43 = vunpack.c.h.bf16 %v6645_v35  ;;  %v6632_v25 = vld [vmem:[%s7172_s27 + $0xd10] sm:$0xff]  }
 0x1e8   : > { %3591 = vmatpush.msra.mxu2 %v5718_v45  ;;  %3610 = vmatpush.msra.mxu3 %v5753_v46  ;;  %v5861_v45 = vunpack.c.l.bf16 %v6653_v26  ;;  %v5894_v46 = vunpack.c.h.bf16 %v6661_v38 }
 0x1e9   : > { %3552 = vmatpush.msra.mxu0 %v5653_v48  ;;  %3571 = vmatpush.msra.mxu1 %v5686_v49  ;;  %v5794_v48 = vunpack.c.h.bf16 %v6636_v41  ;;  %v5829_v49 = vunpack.c.l.bf16 %v6645_v35 }
 0x1ea   : > { %3592 = vmatpush.msra.mxu2 %v5717_v51  ;;  %3611 = vmatpush.msra.mxu3 %v5750_v52  ;;  %v5858_v51 = vunpack.c.h.bf16 %v6652_v44  ;;  %v5893_v52 = vunpack.c.l.bf16 %v6661_v38  ;;  %v5777_v38 = vunpack.c.l.bf16 %v6632_v25 }
 0x1eb   : > { %3553 = vmatpush.msra.mxu0 %v5650_v54  ;;  %3572 = vmatpush.msra.mxu1 %v5685_v55  ;;  %v5793_v54 = vunpack.c.l.bf16 %v6636_v41  ;;  %v5826_v55 = vunpack.c.h.bf16 %v6644_v47 }
 0x1ec   : > { %3593 = vmatpush.msra.mxu2 %v5714_v57  ;;  %3612 = vmatpush.msra.mxu3 %v5749_v58  ;;  %v5857_v57 = vunpack.c.l.bf16 %v6652_v44  ;;  %v5890_v58 = vunpack.c.h.bf16 %v6660_v50 }
 0x1ed   : > { %3554 = vmatpush.msra.mxu0 %v5649_v60  ;;  %3573 = vmatpush.msra.mxu1 %v5682_v61  ;;  %v5790_v60 = vunpack.c.h.bf16 %v6635_v53  ;;  %v5825_v61 = vunpack.c.l.bf16 %v6644_v47 }
 0x1ee   : > { %3594 = vmatpush.msra.mxu2 %v5713_v63  ;;  %3613 = vmatpush.msra.mxu3 %v5746_v0  ;;  %v5854_v63 = vunpack.c.h.bf16 %v6651_v56  ;;  %v5889_v0 = vunpack.c.l.bf16 %v6660_v50  ;;  %v400_v50 = vld [vmem:[%s7190_s24 + $0xd0] sm:$0xff] }
 0x1ef   : > { %3555 = vmatpush.msra.mxu0 %v5646_v2  ;;  %3574 = vmatpush.msra.mxu1 %v5681_v3  ;;  %v5789_v2 = vunpack.c.l.bf16 %v6635_v53  ;;  %v5822_v3 = vunpack.c.h.bf16 %v6643_v59 }
 0x1f0   : > { %3595 = vmatpush.msra.mxu2 %v5710_v5  ;;  %3614 = vmatpush.msra.mxu3 %v5745_v6  ;;  %v5853_v5 = vunpack.c.l.bf16 %v6651_v56  ;;  %v5886_v6 = vunpack.c.h.bf16 %v6659_v62 }
 0x1f1   : > { %3556 = vmatpush.msra.mxu0 %v5645_v10  ;;  %3575 = vmatpush.msra.mxu1 %v5678_v11  ;;  %v6658_v10 = vld [vmem:[%s7172_s27 + $0xde0] sm:$0xff]   ;;  %v5850_v11 = vunpack.c.h.bf16 %v6650_v4 }
 0x1f2   : > { %3596 = vmatpush.msra.mxu2 %v5709_v13  ;;  %3615 = vmatpush.msra.mxu3 %v5742_v14  ;;  %v6633_v13 = vld [vmem:[%s7172_s27 + $0xd18] sm:$0xff]   ;;  %v5785_v14 = vunpack.c.l.bf16 %v6634_v1  ;;  %v5882_v18 = vunpack.c.h.bf16 %v6658_v10 }
 0x1f3   : > { %3557 = vmatpush.msra.mxu0 %v5642_v16  ;;  %3576 = vmatpush.msra.mxu1 %v5677_v17  ;;  %v6649_v16 = vld [vmem:[%s7172_s27 + $0xd98] sm:$0xff]   ;;  %v5849_v17 = vunpack.c.l.bf16 %v6650_v4  ;;  %v5782_v20 = vunpack.c.h.bf16 %v6633_v13  ;;  %v5781_v26 = vunpack.c.l.bf16 %v6633_v13 }
 0x1f4   : > { %3597 = vmatpush.msra.mxu2 %v5706_v21  ;;  %3616 = vmatpush.msra.mxu3 %v5741_v22  ;;  %v5817_v21 = vunpack.c.l.bf16 %v6642_v7  ;;  %v6657_v22 = vld [vmem:[%s7172_s27 + $0xdd8] sm:$0xff]   ;;  %v5845_v29 = vunpack.c.l.bf16 %v6649_v16  ;;  %v459_v7 = vunpack.c.h.bf16 %v400_v50 }
 0x1f5   : > { %3558 = vmatpush.msra.mxu0 %v5641_v23  ;;  %3577 = vmatpush.msra.mxu1 %v5674_v24  ;;  %v5846_v23 = vunpack.c.h.bf16 %v6649_v16  ;;  %v5881_v24 = vunpack.c.l.bf16 %v6658_v10  ;;  %v5878_v30 = vunpack.c.h.bf16 %v6657_v22  ;;  %v6685_v4 = vld [vmem:[%s7172_s27 + $0xeb8] sm:$0xff]  }
 0x1f6   : > { %3598 = vmatpush.msra.mxu2 %v5705_v27  ;;  %3617 = vmatpush.msra.mxu3 %v5738_v28  ;;  %v5814_v27 = vunpack.c.h.bf16 %v6641_v19  ;;  %v6648_v28 = vld [vmem:[%s7172_s27 + $0xd90] sm:$0xff]   ;;  %v6677_v13 = vld [vmem:[%s7172_s27 + $0xe78] sm:$0xff]  }
 0x1f7   : > { %3559 = vmatmul.f32.vlgmr.msra.gmra.mxu0 %v518_v31  ;;  %3599 = vmatmul.f32.vlgmr.msra.gmra.mxu2 %v520_v32  ;;  %v6640_v31 = vld [vmem:[%s7172_s27 + $0xd50] sm:$0xff]   ;;  %v5778_v32 = vunpack.c.h.bf16 %v6632_v25  ;;  %v5842_v35 = vunpack.c.h.bf16 %v6648_v28  ;;  %v5841_v41 = vunpack.c.l.bf16 %v6648_v28  ;;  %v6693_v16 = vld [vmem:[%s7172_s27 + $0xef8] sm:$0xff]  }
 0x1f8   : > { %3623 = vmatpush.msrb.mxu0 %v5798_v33  ;;  %3663 = vmatpush.msrb.mxu2 %v5862_v34  ;;  %v5813_v33 = vunpack.c.l.bf16 %v6641_v19  ;;  %v6656_v34 = vld [vmem:[%s7172_s27 + $0xdd0] sm:$0xff]  }
 0x1f9   : > { %3578 = vmatpush.msra.mxu1 %v5673_v36  ;;  %3618 = vmatpush.msra.mxu3 %v5737_v37  ;;  %v5877_v36 = vunpack.c.l.bf16 %v6657_v22  ;;  %v6631_v37 = vld [vmem:[%s7172_s27 + $0xd08] sm:$0xff]   ;;  %v6668_v19 = vld [vmem:[%s7172_s27 + $0xe30] sm:$0xff]  }
 0x1fa   : > { %3579 = vmatmul.f32.vlgmr.msra.gmra.mxu1 %v519_v39  ;;  %3619 = vmatmul.f32.vlgmr.msra.gmra.mxu3 %v521_v40  ;;  %v5810_v39 = vunpack.c.h.bf16 %v6640_v31  ;;  %v6647_v40 = vld [vmem:[%s7172_s27 + $0xd88] sm:$0xff]   ;;  %v5774_v44 = vunpack.c.h.bf16 %v6631_v37  ;;  %v6684_v22 = vld [vmem:[%s7172_s27 + $0xeb0] sm:$0xff]  }
 0x1fb   : > { %3624 = vmatpush.msrb.mxu0 %v5797_v42  ;;  %3643 = vmatpush.msrb.mxu1 %v5830_v43  ;;  %v5874_v42 = vunpack.c.h.bf16 %v6656_v34  ;;  %v6639_v43 = vld [vmem:[%s7172_s27 + $0xd48] sm:$0xff]   ;;  %v5838_v47 = vunpack.c.h.bf16 %v6647_v40  ;;  %v6676_v25 = vld [vmem:[%s7172_s27 + $0xe70] sm:$0xff]  }
 0x1fc   : > { %3664 = vmatpush.msrb.mxu2 %v5861_v45  ;;  %3683 = vmatpush.msrb.mxu3 %v5894_v46  ;;  %v5809_v45 = vunpack.c.l.bf16 %v6640_v31  ;;  %v6655_v46 = vld [vmem:[%s7172_s27 + $0xdc8] sm:$0xff]   ;;  %v5806_v53 = vunpack.c.h.bf16 %v6639_v43  ;;  %v5805_v59 = vunpack.c.l.bf16 %v6639_v43  ;;  %v6692_v28 = vld [vmem:[%s7172_s27 + $0xef0] sm:$0xff]   ;;  %v6666_v43 = vld [vmem:[%s7172_s27 + $0xe20] sm:$0xff]  }
 0x1fd   : > { %3625 = vmatpush.msrb.mxu0 %v5794_v48  ;;  %3644 = vmatpush.msrb.mxu1 %v5829_v49  ;;  %v5873_v48 = vunpack.c.l.bf16 %v6656_v34  ;;  %v6630_v49 = vld [vmem:[%s7172_s27 + $0xd00] sm:$0xff]   ;;  %v5870_v56 = vunpack.c.h.bf16 %v6655_v46  ;;  %v6667_v31 = vld [vmem:[%s7172_s27 + $0xe28] sm:$0xff]  }
 0x1fe   : > { %3665 = vmatpush.msrb.mxu2 %v5858_v51  ;;  %3684 = vmatpush.msrb.mxu3 %v5893_v52  ;;  %v401_v51 = vld [vmem:[%s7190_s24 + $0xd8] sm:$0xff]  ;;  %v5773_v52 = vunpack.c.l.bf16 %v6631_v37  ;;  %v5769_v1 = vunpack.c.l.bf16 %v6630_v49  ;;  %v6683_v34 = vld [vmem:[%s7172_s27 + $0xea8] sm:$0xff]  }
 0x1ff   : > { %3626 = vmatpush.msrb.mxu0 %v5793_v54  ;;  %3645 = vmatpush.msrb.mxu1 %v5826_v55  ;;  %v6646_v54 = vld [vmem:[%s7172_s27 + $0xd80] sm:$0xff]   ;;  %v5837_v55 = vunpack.c.l.bf16 %v6647_v40  ;;  %v460_v62 = vunpack.c.l.bf16 %v401_v51  ;;  %v6675_v37 = vld [vmem:[%s7172_s27 + $0xe68] sm:$0xff]  }
 0x200   : > { %3666 = vmatpush.msrb.mxu2 %v5857_v57  ;;  %3685 = vmatpush.msrb.mxu3 %v5890_v58  ;;  %v6638_v57 = vld [vmem:[%s7172_s27 + $0xd40] sm:$0xff]   ;;  %v5770_v58 = vunpack.c.h.bf16 %v6630_v49  ;;  %v6691_v40 = vld [vmem:[%s7172_s27 + $0xee8] sm:$0xff]  }
 0x201   : > { %3627 = vmatpush.msrb.mxu0 %v5790_v60  ;;  %3646 = vmatpush.msrb.mxu1 %v5825_v61  ;;  %v6654_v60 = vld [vmem:[%s7172_s27 + $0xdc0] sm:$0xff]   ;;  %v458_v61 = vunpack.c.l.bf16 %v400_v50  ;;  %v524_v10 = vmul.f32 0.003921569, %v460_v62  ;;  %v6014_v49 = vunpack.c.h.bf16 %v6691_v40  ;;  %v6681_v62 = vld [vmem:[%s7172_s27 + $0xe98] sm:$0xff]  }
 0x202   : > { %3667 = vmatpush.msrb.mxu2 %v5854_v63  ;;  %3686 = vmatpush.msrb.mxu3 %v5889_v0  ;;  %v5834_v63 = vunpack.c.h.bf16 %v6646_v54  ;;  %v5869_v0 = vunpack.c.l.bf16 %v6655_v46  ;;  %v5950_v46 = vunpack.c.h.bf16 %v6675_v37  ;;  %v6674_v50 = vld [vmem:[%s7172_s27 + $0xe60] sm:$0xff]  }
 0x203   : > { %3628 = vmatpush.msrb.mxu0 %v5789_v2  ;;  %3647 = vmatpush.msrb.mxu1 %v5822_v3  ;;  %v5802_v2 = vunpack.c.h.bf16 %v6638_v57  ;;  %v6669_v3 = vld [vmem:[%s7172_s27 + $0xe38] sm:$0xff]  }
 0x204   : > { %3668 = vmatpush.msrb.mxu2 %v5853_v5  ;;  %3687 = vmatpush.msrb.mxu3 %v5886_v6  ;;  %v5833_v5 = vunpack.c.l.bf16 %v6646_v54  ;;  %v5866_v6 = vunpack.c.h.bf16 %v6654_v60  ;;  %v6690_v54 = vld [vmem:[%s7172_s27 + $0xee0] sm:$0xff]  }
 0x205   : > { %3629 = vmatpush.msrb.mxu0 %v5786_v8  ;;  %3648 = vmatpush.msrb.mxu1 %v5821_v9  ;;  %v461_v8 = vunpack.c.h.bf16 %v401_v51  ;;  %v522_v9 = vmul.f32 0.003921569, %v458_v61  ;;  %v2600_v51 = vpop.f32.mrf.mxu0  ;;  %v5946_v61 = vunpack.c.h.bf16 %v6674_v50 }
 0x206   : > { %3669 = vmatpush.msrb.mxu2 %v5850_v11  ;;  %3688 = vmatpush.msrb.mxu3 %v5885_v12  ;;  %v5926_v11 = vunpack.c.h.bf16 %v6669_v3  ;;  %v5990_v12 = vunpack.c.h.bf16 %v6685_v4 }
 0x207   : > { %3630 = vmatpush.msrb.mxu0 %v5785_v14  ;;  %3649 = vmatpush.msrb.mxu1 %v5818_v15  ;;  %v5801_v14 = vunpack.c.l.bf16 %v6638_v57  ;;  %v5865_v15 = vunpack.c.l.bf16 %v6654_v60  ;;  %v6013_v57 = vunpack.c.l.bf16 %v6691_v40  ;;  %v5913_v60 = vunpack.c.l.bf16 %v6666_v43 }
 0x208   : > { %3670 = vmatpush.msrb.mxu2 %v5849_v17  ;;  %3689 = vmatpush.msrb.mxu3 %v5882_v18  ;;  %v523_v17 = vmul.f32 0.003921569, %v459_v7  ;;  %v525_v18 = vmul.f32 0.003921569, %v461_v8  ;;  %v6009_v7 = vunpack.c.l.bf16 %v6690_v54  ;;  %v6664_v8 = vld [vmem:[%s7172_s27 + $0xe10] sm:$0xff]  }
 0x209   : > { %3631 = vmatpush.msrb.mxu0 %v5782_v20  ;;  %3650 = vmatpush.msrb.mxu1 %v5817_v21  ;;  %v5925_v20 = vunpack.c.l.bf16 %v6669_v3  ;;  %v5958_v21 = vunpack.c.h.bf16 %v6677_v13  ;;  %v5945_v3 = vunpack.c.l.bf16 %v6674_v50 }
 0x20a   : > { %3671 = vmatpush.msrb.mxu2 %v5846_v23  ;;  %3690 = vmatpush.msrb.mxu3 %v5881_v24  ;;  %v5989_v23 = vunpack.c.l.bf16 %v6685_v4  ;;  %v6022_v24 = vunpack.c.h.bf16 %v6693_v16  ;;  %v6689_v4 = vld [vmem:[%s7172_s27 + $0xed8] sm:$0xff]  }
 0x20b   : > { %3632 = vmatpush.msrb.mxu0 %v5781_v26  ;;  %3651 = vmatpush.msrb.mxu1 %v5814_v27  ;;  %v5922_v26 = vunpack.c.h.bf16 %v6668_v19  ;;  %v5957_v27 = vunpack.c.l.bf16 %v6677_v13  ;;  %v5973_v13 = vunpack.c.l.bf16 %v6681_v62 }
 0x20c   : > { %3672 = vmatpush.msrb.mxu2 %v5845_v29  ;;  %3691 = vmatpush.msrb.mxu3 %v5878_v30  ;;  %v5986_v29 = vunpack.c.h.bf16 %v6684_v22  ;;  %v6021_v30 = vunpack.c.l.bf16 %v6693_v16  ;;  %v5906_v16 = vunpack.c.h.bf16 %v6664_v8 }
 0x20d   : > { %3633 = vmatpush.msrb.mxu0 %v5778_v32  ;;  %3652 = vmatpush.msrb.mxu1 %v5813_v33  ;;  %v5921_v32 = vunpack.c.l.bf16 %v6668_v19  ;;  %v5954_v33 = vunpack.c.h.bf16 %v6676_v25 }
 0x20e   : > { %3673 = vmatpush.msrb.mxu2 %v5842_v35  ;;  %3692 = vmatpush.msrb.mxu3 %v5877_v36  ;;  %v5985_v35 = vunpack.c.l.bf16 %v6684_v22  ;;  %v6018_v36 = vunpack.c.h.bf16 %v6692_v28  ;;  %v6663_v22 = vld [vmem:[%s7172_s27 + $0xe08] sm:$0xff]  }
 0x20f   : > { %3634 = vmatpush.msrb.mxu0 %v5777_v38  ;;  %3653 = vmatpush.msrb.mxu1 %v5810_v39  ;;  %v5918_v38 = vunpack.c.h.bf16 %v6667_v31  ;;  %v5953_v39 = vunpack.c.l.bf16 %v6676_v25  ;;  %v5901_v40 = vunpack.c.l.bf16 %v6663_v22 }
 0x210   : > { %3674 = vmatpush.msrb.mxu2 %v5841_v41  ;;  %3693 = vmatpush.msrb.mxu3 %v5874_v42  ;;  %v5982_v41 = vunpack.c.h.bf16 %v6683_v34  ;;  %v6017_v42 = vunpack.c.l.bf16 %v6692_v28 }
 0x211   : > { %3635 = vmatpush.msrb.mxu0 %v5774_v44  ;;  %3654 = vmatpush.msrb.mxu1 %v5809_v45  ;;  %v2620_v44 = vpop.f32.mrf.mxu1  ;;  %v5917_v45 = vunpack.c.l.bf16 %v6667_v31 }
 0x212   : > { %3675 = vmatpush.msrb.mxu2 %v5838_v47  ;;  %3694 = vmatpush.msrb.mxu3 %v5873_v48  ;;  %v6682_v47 = vld [vmem:[%s7172_s27 + $0xea0] sm:$0xff]   ;;  %v5981_v48 = vunpack.c.l.bf16 %v6683_v34 }
 0x213   : > { %3636 = vmatpush.msrb.mxu0 %v5773_v52  ;;  %3655 = vmatpush.msrb.mxu1 %v5806_v53  ;;  %v5914_v52 = vunpack.c.h.bf16 %v6666_v43  ;;  %v5949_v53 = vunpack.c.l.bf16 %v6675_v37  ;;  %v402_v37 = vld [vmem:[%s7190_s24 + $0xe0] sm:$0xff] }
 0x214   : > { %3676 = vmatpush.msrb.mxu2 %v5837_v55  ;;  %3695 = vmatpush.msrb.mxu3 %v5870_v56  ;;  %v2621_v55 = vadd.f32 %v2620_v44, %v2600_v51  ;;  %v5978_v56 = vunpack.c.h.bf16 %v6682_v47 }
 0x215   : > { %3637 = vmatpush.msrb.mxu0 %v5770_v58  ;;  %3656 = vmatpush.msrb.mxu1 %v5805_v59  ;;  %v6665_v58 = vld [vmem:[%s7172_s27 + $0xe18] sm:$0xff]   ;;  %v2640_v59 = vpop.f32.mrf.mxu2 }
 0x216   : > { %3677 = vmatpush.msrb.mxu2 %v5834_v63  ;;  %3696 = vmatpush.msrb.mxu3 %v5869_v0  ;;  %v5977_v63 = vunpack.c.l.bf16 %v6682_v47  ;;  %v6010_v0 = vunpack.c.h.bf16 %v6690_v54 }
 0x217   : > { %3638 = vmatpush.msrb.mxu0 %v5769_v1  ;;  %3657 = vmatpush.msrb.mxu1 %v5802_v2  ;;  %v6673_v1 = vld [vmem:[%s7172_s27 + $0xe58] sm:$0xff]   ;;  %v5910_v2 = vunpack.c.h.bf16 %v6665_v58 }
 0x218   : > { %3678 = vmatpush.msrb.mxu2 %v5833_v5  ;;  %3697 = vmatpush.msrb.mxu3 %v5866_v6  ;;  %v2641_v5 = vadd.f32 %v2640_v59, %v2621_v55  ;;  %v5974_v6 = vunpack.c.h.bf16 %v6681_v62 }
 0x219   : > { %3639 = vmatmul.f32.vlgmr.msrb.gmra.mxu0 %v522_v9  ;;  %3679 = vmatmul.f32.vlgmr.msrb.gmra.mxu2 %v524_v10  ;;  %v2660_v9 = vpop.f32.mrf.mxu3  ;;  %v5909_v10 = vunpack.c.l.bf16 %v6665_v58  ;;  %v6717_v58 = vld [vmem:[%s7172_s27 + $0xfb8] sm:$0xff]  }
 0x21a   : > { %3703 = vmatpush.msra.mxu0 %v5926_v11  ;;  %3743 = vmatpush.msra.mxu2 %v5990_v12  ;;  %v5942_v11 = vunpack.c.h.bf16 %v6673_v1  ;;  %v6680_v12 = vld [vmem:[%s7172_s27 + $0xe90] sm:$0xff]   ;;  %v2661_v19 = vadd.f32 %v2660_v9, %v2641_v5 }
 0x21b   : > { %3658 = vmatpush.msrb.mxu1 %v5801_v14  ;;  %3698 = vmatpush.msrb.mxu3 %v5865_v15  ;;  %v6006_v14 = vunpack.c.h.bf16 %v6689_v4  ;;  %v6672_v15 = vld [vmem:[%s7172_s27 + $0xe50] sm:$0xff]  }
 0x21c   : > { %3659 = vmatmul.f32.vlgmr.msrb.gmra.mxu1 %v523_v17  ;;  %3699 = vmatmul.f32.vlgmr.msrb.gmra.mxu3 %v525_v18  ;;  %v5941_v17 = vunpack.c.l.bf16 %v6673_v1  ;;  %v6688_v18 = vld [vmem:[%s7172_s27 + $0xed0] sm:$0xff]   ;;  %v5938_v25 = vunpack.c.h.bf16 %v6672_v15  ;;  %v5937_v31 = vunpack.c.l.bf16 %v6672_v15 }
 0x21d   : > { %3704 = vmatpush.msra.mxu0 %v5925_v20  ;;  %3723 = vmatpush.msra.mxu1 %v5958_v21  ;;  %v5970_v20 = vunpack.c.h.bf16 %v6680_v12  ;;  %v6005_v21 = vunpack.c.l.bf16 %v6689_v4  ;;  %v6002_v28 = vunpack.c.h.bf16 %v6688_v18  ;;  %v2720_v54 = vpop.f32.mrf.mxu2  ;;  %v6709_v4 = vld [vmem:[%s7172_s27 + $0xf78] sm:$0xff]   ;;  %v6716_v15 = vld [vmem:[%s7172_s27 + $0xfb0] sm:$0xff]  }
 0x21e   : > { %3744 = vmatpush.msra.mxu2 %v5989_v23  ;;  %3763 = vmatpush.msra.mxu3 %v6022_v24  ;;  %v2680_v23 = vpop.f32.mrf.mxu0  ;;  %v5905_v24 = vunpack.c.l.bf16 %v6664_v8  ;;  %v6725_v8 = vld [vmem:[%s7172_s27 + $0xff8] sm:$0xff]  }
 0x21f   : > { %3705 = vmatpush.msra.mxu0 %v5922_v26  ;;  %3724 = vmatpush.msra.mxu1 %v5957_v27  ;;  %v6679_v26 = vld [vmem:[%s7172_s27 + $0xe88] sm:$0xff]   ;;  %v5969_v27 = vunpack.c.l.bf16 %v6680_v12 }
 0x220   : > { %3745 = vmatpush.msra.mxu2 %v5986_v29  ;;  %3764 = vmatpush.msra.mxu3 %v6021_v30  ;;  %v6671_v29 = vld [vmem:[%s7172_s27 + $0xe48] sm:$0xff]   ;;  %v5902_v30 = vunpack.c.h.bf16 %v6663_v22  ;;  %v5966_v34 = vunpack.c.h.bf16 %v6679_v26  ;;  %v5965_v43 = vunpack.c.l.bf16 %v6679_v26  ;;  %v6724_v22 = vld [vmem:[%s7172_s27 + $0xff0] sm:$0xff]  }
 0x221   : > { %3706 = vmatpush.msra.mxu0 %v5921_v32  ;;  %3725 = vmatpush.msra.mxu1 %v5954_v33  ;;  %v6687_v32 = vld [vmem:[%s7172_s27 + $0xec8] sm:$0xff]   ;;  %v2681_v33 = vadd.f32 %v2680_v23, %v2661_v19  ;;  %v5933_v47 = vunpack.c.l.bf16 %v6671_v29  ;;  %v2740_v5 = vpop.f32.mrf.mxu3  ;;  %v6708_v19 = vld [vmem:[%s7172_s27 + $0xf70] sm:$0xff]  }
 0x222   : > { %3746 = vmatpush.msra.mxu2 %v5985_v35  ;;  %3765 = vmatpush.msra.mxu3 %v6018_v36  ;;  %v6001_v35 = vunpack.c.l.bf16 %v6688_v18  ;;  %v6662_v36 = vld [vmem:[%s7172_s27 + $0xe00] sm:$0xff]   ;;  %v5998_v44 = vunpack.c.h.bf16 %v6687_v32  ;;  %v6150_v18 = vunpack.c.h.bf16 %v6725_v8  ;;  %v6699_v26 = vld [vmem:[%s7172_s27 + $0xf28] sm:$0xff]  }
 0x223   : > { %3707 = vmatpush.msra.mxu0 %v5918_v38  ;;  %3726 = vmatpush.msra.mxu1 %v5953_v39  ;;  %v403_v38 = vld [vmem:[%s7190_s24 + $0xe8] sm:$0xff]  ;;  %v2700_v39 = vpop.f32.mrf.mxu1  ;;  %v5897_v55 = vunpack.c.l.bf16 %v6662_v36 }
 0x224   : > { %3747 = vmatpush.msra.mxu2 %v5982_v41  ;;  %3766 = vmatpush.msra.mxu3 %v6017_v42  ;;  %v5934_v41 = vunpack.c.h.bf16 %v6671_v29  ;;  %v6678_v42 = vld [vmem:[%s7172_s27 + $0xe80] sm:$0xff]   ;;  %v464_v50 = vunpack.c.l.bf16 %v403_v38  ;;  %v2701_v51 = vadd.f32 %v2700_v39, %v2681_v33  ;;  %v465_v62 = vunpack.c.h.bf16 %v403_v38  ;;  %v6707_v33 = vld [vmem:[%s7172_s27 + $0xf68] sm:$0xff]  }
 0x225   : > { %3708 = vmatpush.msra.mxu0 %v5917_v45  ;;  %3727 = vmatpush.msra.mxu1 %v5950_v46  ;;  %v6670_v45 = vld [vmem:[%s7172_s27 + $0xe40] sm:$0xff]   ;;  %v5898_v46 = vunpack.c.h.bf16 %v6662_v36  ;;  %v5961_v59 = vunpack.c.l.bf16 %v6678_v42  ;;  %v6082_v29 = vunpack.c.h.bf16 %v6708_v19  ;;  %v6081_v36 = vunpack.c.l.bf16 %v6708_v19 }
 0x226   : > { %3748 = vmatpush.msra.mxu2 %v5981_v48  ;;  %3767 = vmatpush.msra.mxu3 %v6014_v49  ;;  %v6686_v48 = vld [vmem:[%s7172_s27 + $0xec0] sm:$0xff]   ;;  %v462_v49 = vunpack.c.l.bf16 %v402_v37  ;;  %v2721_v1 = vadd.f32 %v2720_v54, %v2701_v51  ;;  %v2760_v12 = vpop.f32.mrf.mxu0  ;;  %v6077_v51 = vunpack.c.l.bf16 %v6707_v33 }
 0x227   : > { %3709 = vmatpush.msra.mxu0 %v5914_v52  ;;  %3728 = vmatpush.msra.mxu1 %v5949_v53  ;;  %v5962_v52 = vunpack.c.h.bf16 %v6678_v42  ;;  %v5997_v53 = vunpack.c.l.bf16 %v6687_v32  ;;  %v6146_v32 = vunpack.c.h.bf16 %v6724_v22  ;;  %v6045_v42 = vunpack.c.l.bf16 %v6699_v26 }
 0x228   : > { %3749 = vmatpush.msra.mxu2 %v5978_v56  ;;  %3768 = vmatpush.msra.mxu3 %v6013_v57  ;;  %v5930_v56 = vunpack.c.h.bf16 %v6670_v45  ;;  %v6701_v57 = vld [vmem:[%s7172_s27 + $0xf38] sm:$0xff]  }
 0x229   : > { %3710 = vmatpush.msra.mxu0 %v5913_v60  ;;  %3729 = vmatpush.msra.mxu1 %v5946_v61  ;;  %v5994_v60 = vunpack.c.h.bf16 %v6686_v48  ;;  %v463_v61 = vunpack.c.h.bf16 %v402_v37  ;;  %v6723_v37 = vld [vmem:[%s7172_s27 + $0xfe8] sm:$0xff]  }
 0x22a   : > { %3750 = vmatpush.msra.mxu2 %v5977_v63  ;;  %3769 = vmatpush.msra.mxu3 %v6010_v0  ;;  %v526_v63 = vmul.f32 0.003921569, %v462_v49  ;;  %v528_v0 = vmul.f32 0.003921569, %v464_v50  ;;  %v2820_v49 = vpop.f32.mrf.mxu3  ;;  %v6141_v54 = vunpack.c.l.bf16 %v6723_v37 }
 0x22b   : > { %3711 = vmatpush.msra.mxu0 %v5910_v2  ;;  %3730 = vmatpush.msra.mxu1 %v5945_v3  ;;  %v6054_v2 = vunpack.c.h.bf16 %v6701_v57  ;;  %v6118_v3 = vunpack.c.h.bf16 %v6717_v58  ;;  %v527_v9 = vmul.f32 0.003921569, %v463_v61 }
 0x22c   : > { %3751 = vmatpush.msra.mxu2 %v5974_v6  ;;  %3770 = vmatpush.msra.mxu3 %v6009_v7  ;;  %v5929_v6 = vunpack.c.l.bf16 %v6670_v45  ;;  %v5993_v7 = vunpack.c.l.bf16 %v6686_v48  ;;  %v6706_v48 = vld [vmem:[%s7172_s27 + $0xf60] sm:$0xff]  }
 0x22d   : > { %3712 = vmatpush.msra.mxu0 %v5909_v10  ;;  %3731 = vmatpush.msra.mxu1 %v5942_v11  ;;  %v529_v10 = vmul.f32 0.003921569, %v465_v62  ;;  %v6700_v11 = vld [vmem:[%s7172_s27 + $0xf30] sm:$0xff]  }
 0x22e   : > { %3752 = vmatpush.msra.mxu2 %v5973_v13  ;;  %3771 = vmatpush.msra.mxu3 %v6006_v14  ;;  %v6053_v13 = vunpack.c.l.bf16 %v6701_v57  ;;  %v6086_v14 = vunpack.c.h.bf16 %v6709_v4 }
 0x22f   : > { %3713 = vmatpush.msra.mxu0 %v5906_v16  ;;  %3732 = vmatpush.msra.mxu1 %v5941_v17  ;;  %v2741_v16 = vadd.f32 %v2740_v5, %v2721_v1  ;;  %v6117_v17 = vunpack.c.l.bf16 %v6717_v58  ;;  %v6074_v58 = vunpack.c.h.bf16 %v6706_v48  ;;  %v6073_v1 = vunpack.c.l.bf16 %v6706_v48  ;;  %v6718_v48 = vld [vmem:[%s7172_s27 + $0xfc0] sm:$0xff]  }
 0x230   : > { %3753 = vmatpush.msra.mxu2 %v5970_v20  ;;  %3772 = vmatpush.msra.mxu3 %v6005_v21  ;;  %v6050_v20 = vunpack.c.h.bf16 %v6700_v11  ;;  %v6085_v21 = vunpack.c.l.bf16 %v6709_v4 }
 0x231   : > { %3714 = vmatpush.msra.mxu0 %v5905_v24  ;;  %3733 = vmatpush.msra.mxu1 %v5938_v25  ;;  %v2761_v23 = vadd.f32 %v2760_v12, %v2741_v16  ;;  %v6114_v24 = vunpack.c.h.bf16 %v6716_v15  ;;  %v6149_v25 = vunpack.c.l.bf16 %v6725_v8 }
 0x232   : > { %3754 = vmatpush.msra.mxu2 %v5969_v27  ;;  %3773 = vmatpush.msra.mxu3 %v6002_v28  ;;  %v2780_v27 = vpop.f32.mrf.mxu1  ;;  %v6049_v28 = vunpack.c.l.bf16 %v6700_v11 }
 0x233   : > { %3715 = vmatpush.msra.mxu0 %v5902_v30  ;;  %3734 = vmatpush.msra.mxu1 %v5937_v31  ;;  %v6715_v30 = vld [vmem:[%s7172_s27 + $0xfa8] sm:$0xff]   ;;  %v6113_v31 = vunpack.c.l.bf16 %v6716_v15  ;;  %v2781_v38 = vadd.f32 %v2780_v27, %v2761_v23 }
 0x234   : > { %3755 = vmatpush.msra.mxu2 %v5966_v34  ;;  %3774 = vmatpush.msra.mxu3 %v6001_v35  ;;  %v2800_v34 = vpop.f32.mrf.mxu2  ;;  %v6046_v35 = vunpack.c.h.bf16 %v6699_v26  ;;  %v6110_v39 = vunpack.c.h.bf16 %v6715_v30 }
 0x235   : > { %3716 = vmatpush.msra.mxu0 %v5901_v40  ;;  %3735 = vmatpush.msra.mxu1 %v5934_v41  ;;  %v6145_v40 = vunpack.c.l.bf16 %v6724_v22  ;;  %v6698_v41 = vld [vmem:[%s7172_s27 + $0xf20] sm:$0xff]   ;;  %v2801_v45 = vadd.f32 %v2800_v34, %v2781_v38 }
 0x236   : > { %3756 = vmatpush.msra.mxu2 %v5965_v43  ;;  %3775 = vmatpush.msra.mxu3 %v5998_v44  ;;  %v6078_v43 = vunpack.c.h.bf16 %v6707_v33  ;;  %v6714_v44 = vld [vmem:[%s7172_s27 + $0xfa0] sm:$0xff]   ;;  %v6042_v50 = vunpack.c.h.bf16 %v6698_v41  ;;  %v6041_v57 = vunpack.c.l.bf16 %v6698_v41 }
 0x237   : > { %3717 = vmatpush.msra.mxu0 %v5898_v46  ;;  %3736 = vmatpush.msra.mxu1 %v5933_v47  ;;  %v6109_v46 = vunpack.c.l.bf16 %v6715_v30  ;;  %v6142_v47 = vunpack.c.h.bf16 %v6723_v37  ;;  %v6105_v61 = vunpack.c.l.bf16 %v6714_v44  ;;  %v405_v37 = vld [vmem:[%s7190_s24 + $0xf8] sm:$0xff]  ;;  %v6710_v41 = vld [vmem:[%s7172_s27 + $0xf80] sm:$0xff]  }
 0x238   : > { %3757 = vmatpush.msra.mxu2 %v5962_v52  ;;  %3776 = vmatpush.msra.mxu3 %v5997_v53  ;;  %v6722_v52 = vld [vmem:[%s7172_s27 + $0xfe0] sm:$0xff]   ;;  %v6106_v53 = vunpack.c.h.bf16 %v6714_v44 }
 0x239   : > { %3718 = vmatpush.msra.mxu0 %v5897_v55  ;;  %3737 = vmatpush.msra.mxu1 %v5930_v56  ;;  %v6697_v55 = vld [vmem:[%s7172_s27 + $0xf18] sm:$0xff]   ;;  %v2840_v56 = vpop.f32.mrf.mxu0  ;;  %v6138_v62 = vunpack.c.h.bf16 %v6722_v52  ;;  %v6137_v5 = vunpack.c.l.bf16 %v6722_v52  ;;  %v6090_v52 = vunpack.c.h.bf16 %v6710_v41 }
 0x23a   : > { %3758 = vmatpush.msra.mxu2 %v5961_v59  ;;  %3777 = vmatpush.msra.mxu3 %v5994_v60  ;;  %v6713_v59 = vld [vmem:[%s7172_s27 + $0xf98] sm:$0xff]   ;;  %v2821_v60 = vadd.f32 %v2820_v49, %v2801_v45  ;;  %v6037_v8 = vunpack.c.l.bf16 %v6697_v55  ;;  %v6702_v45 = vld [vmem:[%s7172_s27 + $0xf40] sm:$0xff]  }
 0x23b   : > { %3719 = vmatmul.f32.vlgmr.msra.gmra.mxu0 %v526_v63  ;;  %3759 = vmatmul.f32.vlgmr.msra.gmra.mxu2 %v528_v0  ;;  %v6705_v63 = vld [vmem:[%s7172_s27 + $0xf58] sm:$0xff]   ;;  %v6038_v0 = vunpack.c.h.bf16 %v6697_v55  ;;  %v6102_v4 = vunpack.c.h.bf16 %v6713_v59  ;;  %v6101_v11 = vunpack.c.l.bf16 %v6713_v59  ;;  %v6058_v55 = vunpack.c.h.bf16 %v6702_v45 }
 0x23c   : > { %3783 = vmatpush.msrb.mxu0 %v6054_v2  ;;  %3823 = vmatpush.msrb.mxu2 %v6118_v3  ;;  %v6721_v2 = vld [vmem:[%s7172_s27 + $0xfd8] sm:$0xff]   ;;  %v2841_v3 = vadd.f32 %v2840_v56, %v2821_v60  ;;  %v6069_v16 = vunpack.c.l.bf16 %v6705_v63  ;;  %v6089_v59 = vunpack.c.l.bf16 %v6710_v41  ;;  %v6122_v60 = vunpack.c.h.bf16 %v6718_v48 }
 0x23d   : > { %3738 = vmatpush.msra.mxu1 %v5929_v6  ;;  %3778 = vmatpush.msra.mxu3 %v5993_v7  ;;  %v6696_v6 = vld [vmem:[%s7172_s27 + $0xf10] sm:$0xff]   ;;  %v2860_v7 = vpop.f32.mrf.mxu1  ;;  %v6134_v12 = vunpack.c.h.bf16 %v6721_v2 }
 0x23e   : > { %3739 = vmatmul.f32.vlgmr.msra.gmra.mxu1 %v527_v9  ;;  %3779 = vmatmul.f32.vlgmr.msra.gmra.mxu3 %v529_v10  ;;  %v6070_v9 = vunpack.c.h.bf16 %v6705_v63  ;;  %v6712_v10 = vld [vmem:[%s7172_s27 + $0xf90] sm:$0xff]   ;;  %v6034_v15 = vunpack.c.h.bf16 %v6696_v6  ;;  %v6033_v22 = vunpack.c.l.bf16 %v6696_v6 }
 0x23f   : > { %3784 = vmatpush.msrb.mxu0 %v6053_v13  ;;  %3803 = vmatpush.msrb.mxu1 %v6086_v14  ;;  %v6704_v13 = vld [vmem:[%s7172_s27 + $0xf50] sm:$0xff]   ;;  %v2880_v14 = vpop.f32.mrf.mxu2  ;;  %v6098_v19 = vunpack.c.h.bf16 %v6712_v10  ;;  %v6097_v26 = vunpack.c.l.bf16 %v6712_v10 }
 0x240   : > { %3824 = vmatpush.msrb.mxu2 %v6117_v17  ;;  %3843 = vmatpush.msrb.mxu3 %v6150_v18  ;;  %v6720_v17 = vld [vmem:[%s7172_s27 + $0xfd0] sm:$0xff]   ;;  %v2861_v18 = vadd.f32 %v2860_v7, %v2841_v3  ;;  %v6066_v23 = vunpack.c.h.bf16 %v6704_v13 }
 0x241   : > { %3785 = vmatpush.msrb.mxu0 %v6050_v20  ;;  %3804 = vmatpush.msrb.mxu1 %v6085_v21  ;;  %v6133_v20 = vunpack.c.l.bf16 %v6721_v2  ;;  %v6695_v21 = vld [vmem:[%s7172_s27 + $0xf08] sm:$0xff]   ;;  %v6130_v27 = vunpack.c.h.bf16 %v6720_v17  ;;  %v6129_v34 = vunpack.c.l.bf16 %v6720_v17  ;;  %v2920_v38 = vpop.f32.mrf.mxu0 }
 0x242   : > { %3825 = vmatpush.msrb.mxu2 %v6114_v24  ;;  %3844 = vmatpush.msrb.mxu3 %v6149_v25  ;;  %v6711_v24 = vld [vmem:[%s7172_s27 + $0xf88] sm:$0xff]   ;;  %v2881_v25 = vadd.f32 %v2880_v14, %v2861_v18  ;;  %v6030_v30 = vunpack.c.h.bf16 %v6695_v21 }
 0x243   : > { %3786 = vmatpush.msrb.mxu0 %v6049_v28  ;;  %3805 = vmatpush.msrb.mxu1 %v6082_v29  ;;  %v6703_v28 = vld [vmem:[%s7172_s27 + $0xf48] sm:$0xff]   ;;  %v2900_v29 = vpop.f32.mrf.mxu3  ;;  %v6094_v33 = vunpack.c.h.bf16 %v6711_v24 }
 0x244   : > { %3826 = vmatpush.msrb.mxu2 %v6113_v31  ;;  %3845 = vmatpush.msrb.mxu3 %v6146_v32  ;;  %v6065_v31 = vunpack.c.l.bf16 %v6704_v13  ;;  %v6719_v32 = vld [vmem:[%s7172_s27 + $0xfc8] sm:$0xff]  }
 0x245   : > { %3787 = vmatpush.msrb.mxu0 %v6046_v35  ;;  %3806 = vmatpush.msrb.mxu1 %v6081_v36  ;;  %v6694_v35 = vld [vmem:[%s7172_s27 + $0xf00] sm:$0xff]   ;;  %v404_v36 = vld [vmem:[%s7190_s24 + $0xf0] sm:$0xff]  ;;  %v6126_v44 = vunpack.c.h.bf16 %v6719_v32 }
 0x246   : > { %3827 = vmatpush.msrb.mxu2 %v6110_v39  ;;  %3846 = vmatpush.msrb.mxu3 %v6145_v40  ;;  %v6029_v39 = vunpack.c.l.bf16 %v6695_v21  ;;  %v6062_v40 = vunpack.c.h.bf16 %v6703_v28  ;;  %v466_v49 = vunpack.c.l.bf16 %v404_v36  ;;  %v467_v56 = vunpack.c.h.bf16 %v404_v36 }
 0x247   : > { %3788 = vmatpush.msrb.mxu0 %v6045_v42  ;;  %3807 = vmatpush.msrb.mxu1 %v6078_v43  ;;  %v2901_v42 = vadd.f32 %v2900_v29, %v2881_v25  ;;  %v6093_v43 = vunpack.c.l.bf16 %v6711_v24  ;;  %v2960_v63 = vpop.f32.mrf.mxu2 }
 0x248   : > { %3828 = vmatpush.msrb.mxu2 %v6109_v46  ;;  %3847 = vmatpush.msrb.mxu3 %v6142_v47  ;;  %v6026_v46 = vunpack.c.h.bf16 %v6694_v35  ;;  %v6061_v47 = vunpack.c.l.bf16 %v6703_v28  ;;  %v531_v3 = vmul.f32 0.003921569, %v467_v56 }
 0x249   : > { %3789 = vmatpush.msrb.mxu0 %v6042_v50  ;;  %3808 = vmatpush.msrb.mxu1 %v6077_v51  ;;  %v468_v50 = vunpack.c.l.bf16 %v405_v37  ;;  %v2921_v51 = vadd.f32 %v2920_v38, %v2901_v42  ;;  %v3000_v7 = vpop.f32.mrf.mxu0 }
 0x24a   : > { %3829 = vmatpush.msrb.mxu2 %v6106_v53  ;;  %3848 = vmatpush.msrb.mxu3 %v6141_v54  ;;  %v6125_v53 = vunpack.c.l.bf16 %v6719_v32  ;;  %v6025_v54 = vunpack.c.l.bf16 %v6694_v35 }
 0x24b   : > { %3790 = vmatpush.msrb.mxu0 %v6041_v57  ;;  %3809 = vmatpush.msrb.mxu1 %v6074_v58  ;;  %v469_v57 = vunpack.c.h.bf16 %v405_v37  ;;  %v2940_v58 = vpop.f32.mrf.mxu1  ;;  %v2980_v6 = vpop.f32.mrf.mxu3 }
 0x24c   : > { %3830 = vmatpush.msrb.mxu2 %v6105_v61  ;;  %3849 = vmatpush.msrb.mxu3 %v6138_v62  ;;  %v530_v61 = vmul.f32 0.003921569, %v466_v49  ;;  %v532_v62 = vmul.f32 0.003921569, %v468_v50  ;;  %v2941_v2 = vadd.f32 %v2940_v58, %v2921_v51 }
 0x24d   : > { %3791 = vmatpush.msrb.mxu0 %v6038_v0  ;;  %3810 = vmatpush.msrb.mxu1 %v6073_v1  ;;  %v6057_v0 = vunpack.c.l.bf16 %v6702_v45  ;;  %v6121_v1 = vunpack.c.l.bf16 %v6718_v48 }
 0x24e   : > { %3831 = vmatpush.msrb.mxu2 %v6102_v4  ;;  %3850 = vmatpush.msrb.mxu3 %v6137_v5  ;;  %v533_v4 = vmul.f32 0.003921569, %v469_v57  ;;  %v2961_v5 = vadd.f32 %v2960_v63, %v2941_v2 }
 0x24f   : > { %3792 = vmatpush.msrb.mxu0 %v6037_v8  ;;  %3811 = vmatpush.msrb.mxu1 %v6070_v9 }
 0x250   : > { %3832 = vmatpush.msrb.mxu2 %v6101_v11  ;;  %3851 = vmatpush.msrb.mxu3 %v6134_v12  ;;  %v2981_v8 = vadd.f32 %v2980_v6, %v2961_v5  ;;  %v3040_v11 = vpop.f32.mrf.mxu2 }
 0x251   : > { %3793 = vmatpush.msrb.mxu0 %v6034_v15  ;;  %3812 = vmatpush.msrb.mxu1 %v6069_v16  ;;  %v3080_v15 = vpop.f32.mrf.mxu0 }
 0x252   : > { %3833 = vmatpush.msrb.mxu2 %v6098_v19  ;;  %3852 = vmatpush.msrb.mxu3 %v6133_v20  ;;  %v3001_v9 = vadd.f32 %v3000_v7, %v2981_v8 }
 0x253   : > { %3794 = vmatpush.msrb.mxu0 %v6033_v22  ;;  %3813 = vmatpush.msrb.mxu1 %v6066_v23  ;;  %v3020_v10 = vpop.f32.mrf.mxu1  ;;  %v3060_v14 = vpop.f32.mrf.mxu3 }
 0x254   : > { %3834 = vmatpush.msrb.mxu2 %v6097_v26  ;;  %3853 = vmatpush.msrb.mxu3 %v6130_v27  ;;  %v3021_v12 = vadd.f32 %v3020_v10, %v3001_v9 }
 0x255   : > { %3795 = vmatpush.msrb.mxu0 %v6030_v30  ;;  %3814 = vmatpush.msrb.mxu1 %v6065_v31 }
 0x256   : > { %3835 = vmatpush.msrb.mxu2 %v6094_v33  ;;  %3854 = vmatpush.msrb.mxu3 %v6129_v34  ;;  %v3041_v13 = vadd.f32 %v3040_v11, %v3021_v12 }
 0x257   : > { %3796 = vmatpush.msrb.mxu0 %v6029_v39  ;;  %3815 = vmatpush.msrb.mxu1 %v6062_v40 }
 0x258   : > { %3836 = vmatpush.msrb.mxu2 %v6093_v43  ;;  %3855 = vmatpush.msrb.mxu3 %v6126_v44  ;;  %v3061_v16 = vadd.f32 %v3060_v14, %v3041_v13  ;;  %v3120_v19 = vpop.f32.mrf.mxu2 }
 0x259   : > { %3797 = vmatpush.msrb.mxu0 %v6026_v46  ;;  %3816 = vmatpush.msrb.mxu1 %v6061_v47  ;;  %v3160_v23 = vpop.f32.mrf.mxu0 }
 0x25a   : > { %3837 = vmatpush.msrb.mxu2 %v6090_v52  ;;  %3856 = vmatpush.msrb.mxu3 %v6125_v53  ;;  %v3081_v17 = vadd.f32 %v3080_v15, %v3061_v16 }
 0x25b   : > { %3798 = vmatpush.msrb.mxu0 %v6025_v54  ;;  %3817 = vmatpush.msrb.mxu1 %v6058_v55  ;;  %v3100_v18 = vpop.f32.mrf.mxu1  ;;  %v3140_v22 = vpop.f32.mrf.mxu3 }
 0x25c   : > { %3838 = vmatpush.msrb.mxu2 %v6089_v59  ;;  %3857 = vmatpush.msrb.mxu3 %v6122_v60  ;;  %v3101_v20 = vadd.f32 %v3100_v18, %v3081_v17 }
 0x25d   : > { %3799 = vmatmul.f32.vlgmr.msrb.gmra.mxu0 %v530_v61  ;;  %3839 = vmatmul.f32.vlgmr.msrb.gmra.mxu2 %v532_v62 }
 0x25e   : > { %3818 = vmatpush.msrb.mxu1 %v6057_v0  ;;  %3858 = vmatpush.msrb.mxu3 %v6121_v1  ;;  %v3121_v21 = vadd.f32 %v3120_v19, %v3101_v20 }
 0x25f   : > { %3819 = vmatmul.f32.vlgmr.msrb.gmra.mxu1 %v531_v3  ;;  %3859 = vmatmul.f32.vlgmr.msrb.gmra.mxu3 %v533_v4 }
 0x260   : > { %v3141_v24 = vadd.f32 %v3140_v22, %v3121_v21  ;;  %v3200_v27 = vpop.f32.mrf.mxu2 }
 0x261   : > { %v3240_v31 = vpop.f32.mrf.mxu0 }
 0x262   : > { %v3161_v25 = vadd.f32 %v3160_v23, %v3141_v24 }
 0x263   : > { %v3180_v26 = vpop.f32.mrf.mxu1  ;;  %v3220_v30 = vpop.f32.mrf.mxu3 }
 0x264   : > { %v3181_v28 = vadd.f32 %v3180_v26, %v3161_v25 }
 0x266   : > { %v3201_v29 = vadd.f32 %v3200_v27, %v3181_v28 }
 0x268   : > { %v3221_v32 = vadd.f32 %v3220_v30, %v3201_v29  ;;  %v3280_v35 = vpop.f32.mrf.mxu2  ;;  %v534_v30 = vld [vmem:[#allocation2] sm:$0xff] }
 0x269   : > { %v3320_v39 = vpop.f32.mrf.mxu0 }
 0x26a   : > { %v3241_v33 = vadd.f32 %v3240_v31, %v3221_v32 }
 0x26b   : > { %v3260_v34 = vpop.f32.mrf.mxu1  ;;  %v3300_v38 = vpop.f32.mrf.mxu3 }
 0x26c   : > { %v3261_v36 = vadd.f32 %v3260_v34, %v3241_v33 }
 0x26e   : > { %v3281_v37 = vadd.f32 %v3280_v35, %v3261_v36 }
 0x270   : > { %v3301_v40 = vadd.f32 %v3300_v38, %v3281_v37  ;;  %v3360_v43 = vpop.f32.mrf.mxu2 }
 0x271   : > { %v3400_v47 = vpop.f32.mrf.mxu0 }
 0x272   : > { %v3321_v41 = vadd.f32 %v3320_v39, %v3301_v40 }
 0x273   : > { %v3340_v42 = vpop.f32.mrf.mxu1  ;;  %v3380_v46 = vpop.f32.mrf.mxu3 }
 0x274   : > { %v3341_v44 = vadd.f32 %v3340_v42, %v3321_v41 }
 0x276   : > { %v3361_v45 = vadd.f32 %v3360_v43, %v3341_v44 }
 0x278   : > { %v3381_v48 = vadd.f32 %v3380_v46, %v3361_v45  ;;  %v3440_v51 = vpop.f32.mrf.mxu2 }
 0x279   : > { %v3480_v55 = vpop.f32.mrf.mxu0 }
 0x27a   : > { %v3401_v49 = vadd.f32 %v3400_v47, %v3381_v48 }
 0x27b   : > { %v3420_v50 = vpop.f32.mrf.mxu1  ;;  %v3460_v54 = vpop.f32.mrf.mxu3 }
 0x27c   : > { %v3421_v52 = vadd.f32 %v3420_v50, %v3401_v49 }
 0x27e   : > { %v3441_v53 = vadd.f32 %v3440_v51, %v3421_v52 }
 0x280   : > { %v3461_v56 = vadd.f32 %v3460_v54, %v3441_v53  ;;  %v3520_v59 = vpop.f32.mrf.mxu2 }
 0x281   : > { %v3560_v63 = vpop.f32.mrf.mxu0 }
 0x282   : > { %v3481_v57 = vadd.f32 %v3480_v55, %v3461_v56 }
 0x283   : > { %v3500_v58 = vpop.f32.mrf.mxu1  ;;  %v3540_v62 = vpop.f32.mrf.mxu3 }
 0x284   : > { %v3501_v60 = vadd.f32 %v3500_v58, %v3481_v57 }
 0x286   : > { %v3521_v61 = vadd.f32 %v3520_v59, %v3501_v60 }
 0x288   : > { %v3541_v0 = vadd.f32 %v3540_v62, %v3521_v61  ;;  %v3600_v3 = vpop.f32.mrf.mxu2 }
 0x28a   : > { %v3561_v1 = vadd.f32 %v3560_v63, %v3541_v0 }
 0x28b   : > { %v3580_v2 = vpop.f32.mrf.mxu1  ;;  %v3620_v6 = vpop.f32.mrf.mxu3 }
 0x28c   : > { %v3581_v4 = vadd.f32 %v3580_v2, %v3561_v1 }
 0x28e   : > { %v3601_v5 = vadd.f32 %v3600_v3, %v3581_v4 }
 0x290   : > { %v3621_v8 = vadd.f32 %v3620_v6, %v3601_v5 }
 0x296   : > { %v3640_v7 = vpop.f32.mrf.mxu0 }
 0x297   : > { %v3641_v9 = vadd.f32 %v3640_v7, %v3621_v8 }
 0x299   : > { %v3660_v10 = vpop.f32.mrf.mxu1 }
 0x29a   : > { %v3661_v12 = vadd.f32 %v3660_v10, %v3641_v9 }
 0x29c   : > { %v3680_v11 = vpop.f32.mrf.mxu2 }
 0x29d   : > { %v3681_v13 = vadd.f32 %v3680_v11, %v3661_v12 }
 0x29f   : > { %v3700_v14 = vpop.f32.mrf.mxu3 }
 0x2a0   : > { %v3701_v16 = vadd.f32 %v3700_v14, %v3681_v13 }
 0x2b8   : > { %v3720_v15 = vpop.f32.mrf.mxu0 }
 0x2b9   : > { %v3721_v17 = vadd.f32 %v3720_v15, %v3701_v16 }
 0x2bb   : > { %v3740_v18 = vpop.f32.mrf.mxu1 }
 0x2bc   : > { %v3741_v20 = vadd.f32 %v3740_v18, %v3721_v17 }
 0x2be   : > { %v3760_v19 = vpop.f32.mrf.mxu2 }
 0x2bf   : > { %v3761_v21 = vadd.f32 %v3760_v19, %v3741_v20 }
 0x2c1   : > { %v3780_v22 = vpop.f32.mrf.mxu3 }
 0x2c2   : > { %v3781_v23 = vadd.f32 %v3780_v22, %v3761_v21 }
 0x2da   : > { %v3800_v24 = vpop.f32.mrf.mxu0 }
 0x2db   : > { %v3801_v25 = vadd.f32 %v3800_v24, %v3781_v23 }
 0x2dc   : > { %v3820_v26 = vpop.f32.mrf.mxu1 }
 0x2dd   : > { %v3821_v27 = vadd.f32 %v3820_v26, %v3801_v25 }
 0x2e0   : > { %v3840_v28 = vpop.f32.mrf.mxu2 }
 0x2e1   : > { %v3841_v29 = vadd.f32 %v3840_v28, %v3821_v27 }
 0x2e2   : > { %v3860_v31 = vpop.f32.mrf.mxu3 }
 0x2e3   : > { %v3861_v32 = vadd.f32 %v3860_v31, %v3841_v29  ;;  %3868 = sbr.rel (%p4099_p1) target bundleno = 1037 (0x40d), region = 76 }
 0x2e5   : > { %v3863_v33 = vadd.f32 %v3861_v32, %v534_v30 }
 0x2e7   : > { %3864 = vst [vmem:[#allocation2] sm:$0xff] %v3863_v33 }
 0x2e8   : > { %v6732_v34 = vld [vmem:[#allocation7 + $0x38] sm:$0xff]   ;;  %v6731_v35 = vld [vmem:[#allocation7 + $0x30] sm:$0xff]   ;;  %v6730_v40 = vld [vmem:[#allocation7 + $0x28] sm:$0xff]   ;;  %vm3989_vm0 = vcmask 48128  }
 0x2e9   : > { %v6182_v36 = vunpack.c.h.bf16 %v6732_v34  ;;  %v6181_v37 = vunpack.c.l.bf16 %v6732_v34  ;;  %v6178_v38 = vunpack.c.h.bf16 %v6731_v35  ;;  %v6739_v39 = vld [vmem:[%s7784_s5 + $0x38] sm:$0xff]   ;;  %v6738_v41 = vld [vmem:[%s7784_s5 + $0x30] sm:$0xff]   ;;  %v6177_v42 = vunpack.c.l.bf16 %v6731_v35  ;;  %v6737_v48 = vld [vmem:[%s7784_s5 + $0x28] sm:$0xff]  }
 0x2ea   : > { %v6214_v43 = vunpack.c.h.bf16 %v6739_v39  ;;  %v6213_v44 = vunpack.c.l.bf16 %v6739_v39  ;;  %v6174_v45 = vunpack.c.h.bf16 %v6730_v40  ;;  %v6210_v46 = vunpack.c.h.bf16 %v6738_v41  ;;  %v6729_v47 = vld [vmem:[#allocation7 + $0x20] sm:$0xff]   ;;  %v6728_v53 = vld [vmem:[#allocation7 + $0x18] sm:$0xff]   ;;  %v6727_v59 = vld [vmem:[#allocation7 + $0x10] sm:$0xff]  }
 0x2eb   : > { %3912 = vmatpush.msra.mxu0 %v6182_v36  ;;  %v6173_v49 = vunpack.c.l.bf16 %v6730_v40  ;;  %v6209_v50 = vunpack.c.l.bf16 %v6738_v41  ;;  %v6170_v51 = vunpack.c.h.bf16 %v6729_v47  ;;  %v6206_v52 = vunpack.c.h.bf16 %v6737_v48  ;;  %v6736_v54 = vld [vmem:[%s7784_s5 + $0x20] sm:$0xff]   ;;  %v6735_v60 = vld [vmem:[%s7784_s5 + $0x18] sm:$0xff]   ;;  %v6734_v2 = vld [vmem:[%s7784_s5 + $0x10] sm:$0xff]  }
 0x2ec   : > { %3969 = vmatpush.msra.mxu1 %v6214_v43  ;;  %v6169_v55 = vunpack.c.l.bf16 %v6729_v47  ;;  %v6205_v56 = vunpack.c.l.bf16 %v6737_v48  ;;  %v6166_v57 = vunpack.c.h.bf16 %v6728_v53  ;;  %v6202_v58 = vunpack.c.h.bf16 %v6736_v54  ;;  %v6726_v1 = vld [vmem:[#allocation7 + $0x8] sm:$0xff]   ;;  %v6823_v5 = vld [vmem:[#allocation5] ss:$0 sm:$0xff]  ;;  %v6152_v9 = vld [vmem:[#allocation7] sm:$0xff]  }
 0x2ed   : > { %3913 = vmatpush.msra.mxu0 %v6181_v37  ;;  %v6165_v61 = vunpack.c.l.bf16 %v6728_v53  ;;  %v6201_v62 = vunpack.c.l.bf16 %v6736_v54  ;;  %v6162_v63 = vunpack.c.h.bf16 %v6727_v59  ;;  %v6198_v0 = vunpack.c.h.bf16 %v6735_v60  ;;  %v6733_v10 = vld [vmem:[%s7784_s5 + $0x8] sm:$0xff]   ;;  %v6184_v19 = vld [vmem:[%s7784_s5] sm:$0xff]  }
 0x2ee   : > { %3970 = vmatpush.msra.mxu1 %v6213_v44  ;;  %v6161_v3 = vunpack.c.l.bf16 %v6727_v59  ;;  %v6197_v4 = vunpack.c.l.bf16 %v6735_v60  ;;  %v6158_v6 = vunpack.c.h.bf16 %v6726_v1  ;;  %v3869_v7 = vld [vmem:[#allocation2] sm:$0xff]  ;;  %v6194_v8 = vunpack.c.h.bf16 %v6734_v2  ;;  %v6824_v22 = vld [vmem:[#allocation8] ss:$0 sm:$0xff]  ;;  %v6825_v26 = vld [vmem:[#allocation10] ss:$0 sm:$0xff] }
 0x2ef   : > { %3914 = vmatpush.msra.mxu0 %v6178_v38  ;;  %v6157_v11 = vunpack.c.l.bf16 %v6726_v1  ;;  %v6193_v12 = vunpack.c.l.bf16 %v6734_v2  ;;  %v3874_v13 = vadd.f32 %v6823_v5, %v3869_v7  ;;  %v6154_v14 = vunpack.c.h.bf16 %v6152_v9 }
 0x2f0   : > { %3971 = vmatpush.msra.mxu1 %v6210_v46  ;;  %v6190_v15 = vunpack.c.h.bf16 %v6733_v10  ;;  %v6153_v16 = vunpack.c.l.bf16 %v6152_v9  ;;  %v6189_v18 = vunpack.c.l.bf16 %v6733_v10  ;;  %v6186_v20 = vunpack.c.h.bf16 %v6184_v19 }
 0x2f1   : > { %3915 = vmatpush.msra.mxu0 %v6177_v42  ;;  %v3875_v17 = vmax.f32 %v3874_v13, 0.0  ;;  %v6185_v21 = vunpack.c.l.bf16 %v6184_v19 }
 0x2f2   : > { %3972 = vmatpush.msra.mxu1 %v6209_v50 }
 0x2f3   : > { %3916 = vmatpush.msra.mxu0 %v6174_v45 }
 0x2f4   : > { %3973 = vmatpush.msra.mxu1 %v6206_v52 }
 0x2f5   : > { %3917 = vmatpush.msra.mxu0 %v6173_v49 }
 0x2f6   : > { %3974 = vmatpush.msra.mxu1 %v6205_v56 }
 0x2f7   : > { %3918 = vmatpush.msra.mxu0 %v6170_v51 }
 0x2f8   : > { %3975 = vmatpush.msra.mxu1 %v6202_v58 }
 0x2f9   : > { %3919 = vmatpush.msra.mxu0 %v6169_v55 }
 0x2fa   : > { %3976 = vmatpush.msra.mxu1 %v6201_v62 }
 0x2fb   : > { %3920 = vmatpush.msra.mxu0 %v6166_v57 }
 0x2fc   : > { %3977 = vmatpush.msra.mxu1 %v6198_v0 }
 0x2fd   : > { %3921 = vmatpush.msra.mxu0 %v6165_v61 }
 0x2fe   : > { %3978 = vmatpush.msra.mxu1 %v6197_v4 }
 0x2ff   : > { %3922 = vmatpush.msra.mxu0 %v6162_v63 }
 0x300   : > { %3979 = vmatpush.msra.mxu1 %v6194_v8 }
 0x301   : > { %3923 = vmatpush.msra.mxu0 %v6161_v3 }
 0x302   : > { %3980 = vmatpush.msra.mxu1 %v6193_v12 }
 0x303   : > { %3924 = vmatpush.msra.mxu0 %v6158_v6 }
 0x304   : > { %3981 = vmatpush.msra.mxu1 %v6190_v15 }
 0x305   : > { %3925 = vmatpush.msra.mxu0 %v6157_v11 }
 0x306   : > { %3982 = vmatpush.msra.mxu1 %v6189_v18 }
 0x307   : > { %3926 = vmatpush.msra.mxu0 %v6154_v14 }
 0x308   : > { %3983 = vmatpush.msra.mxu1 %v6186_v20 }
 0x309   : > { %3927 = vmatpush.msra.mxu0 %v6153_v16 }
 0x30a   : > { %3928 = vmatmul.f32.vlgmr.msra.gmra.mxu0 %v3875_v17  ;;  %3984 = vmatpush.msra.mxu1 %v6185_v21 }
 0x387   : > { %v3929_v23 = vpop.f32.mrf.mxu0 }
 0x388   : > { %v3930_v24 = vadd.f32 %v6824_v22, %v3929_v23 }
 0x38a   : > { %v3932_v25 = vmax.f32 %v3930_v24, 0.0 }
 0x38c   : > { %3985 = vmatmul.f32.vlgmr.msra.gmra.mxu1 %v3932_v25 }
 0x409   : > { %v3986_v27 = vpop.f32.mrf.mxu1 }
 0x40a   : > { %v3987_v28 = vadd.f32 %v6825_v26, %v3986_v27 }
 0x40c   : > { %3990 = vst.msk [vmem:[%s7786_s7] sm:$0xff] %vm3989_vm0, %v3987_v28 }
 0x40d PF: > { %p19_p4 = scmp.ge.s32.totalorder %s7135_s14, 4   ;;  %s7791_s24 = smov %s7010_s25 }
 0x40e   : > { %s7792_s25 = smov %s7014_s26  ;;  %s7793_s26 = smov %s7145_s20 }
 0x40f   : > { %s7794_s27 = smov %s7135_s14  ;;  %21 = sbr.rel (!%p19_p4) target bundleno = 5 (0x5), region = 111 }
 0x414   :  { %4002 = vsyncpa [#allocation4], 1 }
 0x415   :  { %4004 = vsyncpa [#allocation4 + $0x1], 1 }
 0x416   :  { %4005 = vsyncpa [#allocation6], 1 }
 0x417   :  { %4006 = vsyncpa [#allocation9], 1 }

</bundles_post_ra>
